<compile_context>
chip_gen: v7x
topology: tpu7x:2x2x1
jax: 0.10.0
libtpu: 0.0.40
codegen_flags: <defaults>
</compile_context>

<pallas_src>
import jax
import jax.numpy as jnp
import numpy as np
from jax.experimental import pallas as pl
from jax.experimental.pallas import tpu as pltpu


def _round_up(x, m):
    return ((x + m - 1) // m) * m


def _num_tensorcores_per_chip():
    """Best-effort TensorCores-per-chip detection (megacore parts get 2)."""
    try:
        kind = jax.devices()[0].device_kind.lower().replace(" ", "")
    except Exception:  # defensive: never let detection break the kernel
        return 1
    for tag in ("v7", "tpu7", "v5p", "v4"):
        if tag in kind:
            return 2
    return 1


def _choose_tile_n(n_points, requested, n_cores, feature_widths):
    """Lane tile size: large (amortise grid-step overhead), 128-aligned,
    VMEM-budget-safe, split into n_cores tiles only on multi-TC chips."""
    in_f, out_f = feature_widths[0], feature_widths[-1]
    widest = max(feature_widths)
    # Conservative per-lane f32 footprint: pipelined input/output blocks plus
    # a few live intermediates at the widest layer.
    bytes_per_lane = 4 * (3 * in_f + 4 * widest + 3 * out_f)
    vmem_budget = 12 * 1024 * 1024            # fits v5e's 16 MiB scoped default
    vmem_cap = max(128, (vmem_budget // bytes_per_lane) // 128 * 128)

    t = max(128, (int(requested) // 128) * 128)
    t = min(t, vmem_cap)

    n_pad = _round_up(max(int(n_points), 1), 128)
    if n_cores > 1:
        # v7x / megacore: n_cores equally sized big tiles for the "parallel" axis.
        per_core = _round_up(pl.cdiv(n_pad, n_cores), 128)
        t = min(t, per_core)
    else:
        # v5e / v6e: single TensorCore -> extra grid steps are pure overhead.
        t = min(t, n_pad)
    return max(t, 128)


def _make_finer_kernel(omegas, n_linear, in_features):
    """omegas: per-FinerLayer omega_0 (len == n_linear - 1, final layer is linear)."""

    def kernel(x_ref, *refs):
        # refs = (w0, b0, w1, b1, ..., w_{L-1}, b_{L-1}, out_ref)
        out_ref = refs[-1]
        wb = refs[:-1]
        x = x_ref[...].astype(jnp.float32)               # (in_features, tile_n)

        h = x
        for i in range(n_linear):
            w = wb[2 * i][...]                           # (out_i, in_i)
            b = wb[2 * i + 1][...].astype(jnp.float32)   # (out_i, 1)
            if i == 0 and in_features <= 4:
                # Tiny-K first layer: VPU lane-broadcast madds in f32, no MXU.
                w32 = w.astype(jnp.float32)
                z = w32[:, 0:1] * x[0:1, :]
                for k in range(1, in_features):
                    z = z + w32[:, k:k + 1] * x[k:k + 1, :]
                z = z + b
            else:
                # bf16 mode: w is pre-cast bf16, h is cast here; f32 accumulate.
                z = jnp.dot(w, h.astype(w.dtype),
                            preferred_element_type=jnp.float32) + b
            if i < len(omegas):
                # FINER activation in f32 (sin argument ~ omega * |z| is large).
                h = jnp.sin(omegas[i] * (jnp.abs(z) + 1.0) * z)
            else:
                h = z                                    # final linear layer
        out_ref[...] = h.astype(out_ref.dtype)

    return kernel


def finer_forward(coords, weights, biases, omegas, *,
                  tile_n=16384, precision="float32"):
    """coords: (N, in_features); weights[i]: (out_i, in_i); biases[i]: (out_i, 1).

    precision:
      "float32"  : exact f32 everywhere (matches the PyTorch module).
      "bfloat16" : bf16 matmul operands (MXU-native single pass), f32
                   accumulation and f32 activation chain.
    Returns (N, out_features).
    """
    N, in_features = coords.shape
    out_features = weights[-1].shape[0]
    n_linear = len(weights)
    assert n_linear == len(omegas) + 1
    assert precision in ("float32", "bfloat16")

    feature_widths = [in_features] + [w.shape[0] for w in weights]
    n_cores = _num_tensorcores_per_chip()
    tile_n = _choose_tile_n(N, tile_n, n_cores, feature_widths)
    n_pad = _round_up(N, tile_n)
    grid = n_pad // tile_n

    # Feature-major: the point axis becomes the lane axis.
    x_fm = jnp.transpose(coords)                         # (in_features, N)
    if n_pad != N:
        x_fm = jnp.pad(x_fm, ((0, 0), (0, n_pad - N)))

    mm_dtype = jnp.bfloat16 if precision == "bfloat16" else jnp.float32
    wb_args, wb_specs = [], []
    for li, (w, b) in enumerate(zip(weights, biases)):
        # First-layer weight stays f32 (coordinate / VPU path); hidden + final
        # weights are pre-cast once so the MXU sees native bf16 operands.
        w_use = w if li == 0 else w.astype(mm_dtype)
        wb_args += [w_use, jnp.asarray(b, jnp.float32)]
        # Full-array blocks with constant index_map: fetched once, resident in
        # VMEM across all grid steps.
        wb_specs += [
            pl.BlockSpec(w_use.shape, lambda i: (0, 0)),
            pl.BlockSpec(b.shape, lambda i: (0, 0)),
        ]

    kernel = _make_finer_kernel(tuple(float(o) for o in omegas), n_linear,
                                in_features)

    out_fm = pl.pallas_call(
        kernel,
        out_shape=jax.ShapeDtypeStruct((out_features, n_pad), coords.dtype),
        grid_spec=pltpu.PrefetchScalarGridSpec(
            num_scalar_prefetch=0,
            grid=(grid,),
            in_specs=[pl.BlockSpec((in_features, tile_n), lambda i: (0, i))]
            + wb_specs,
            out_specs=pl.BlockSpec((out_features, tile_n), lambda i: (0, i)),
        ),
        compiler_params=pltpu.CompilerParams(
            dimension_semantics=("parallel",)),
    )(x_fm, *wb_args)

    return jnp.transpose(out_fm[:, :N])                  # (N, out_features)


def init_finer_params(key, in_features, hidden_features, hidden_layers,
                      out_features, first_omega_0=30.0, hidden_omega_0=30.0,
                      first_bias_scale=None):
    """Deterministic init mirroring the PyTorch module.

    Weights are (out, in) (nn.Linear.weight layout), biases are (out, 1).
    """
    dims = [in_features] + [hidden_features] * (hidden_layers + 1) + [out_features]
    weights, biases, omegas = [], [], []
    n_linear = len(dims) - 1
    for li in range(n_linear):
        fan_in, fan_out = dims[li], dims[li + 1]
        key, kw, kb = jax.random.split(key, 3)
        is_first = (li == 0)
        is_final = (li == n_linear - 1)
        if is_first:
            wbound = 1.0 / fan_in
        else:
            # hidden and final layers use the same bound in the reference module
            wbound = np.sqrt(6.0 / fan_in) / hidden_omega_0
        w = jax.random.uniform(kw, (fan_out, fan_in), jnp.float32,
                               minval=-wbound, maxval=wbound)
        # nn.Linear default bias init U(-1/sqrt(fan_in), 1/sqrt(fan_in)),
        # optionally overridden for the first layer by first_bias_scale.
        if is_first and first_bias_scale is not None:
            bbound = first_bias_scale
        else:
            bbound = 1.0 / np.sqrt(fan_in)
        b = jax.random.uniform(kb, (fan_out, 1), jnp.float32,
                               minval=-bbound, maxval=bbound)
        weights.append(w)
        biases.append(b)
        if not is_final:
            omegas.append(first_omega_0 if is_first else hidden_omega_0)
    return weights, biases, omegas


def finer_reference(coords, weights, biases, omegas):
    """Pure-JAX reference (f32, highest matmul precision)."""
    h = coords.astype(jnp.float32)                       # (N, in)
    n_linear = len(weights)
    for i in range(n_linear):
        z = jnp.dot(h, weights[i].astype(jnp.float32).T,
                    precision=jax.lax.Precision.HIGHEST) + biases[i].T
        if i < len(omegas):
            h = jnp.sin(omegas[i] * (jnp.abs(z) + 1.0) * z)
        else:
            h = z
    return h.astype(coords.dtype)


if __name__ == "__main__":
    key = jax.random.PRNGKey(0)

    # Small shapes consistent with the module: 2D coords -> scalar field.
    # N is intentionally NOT a multiple of 128 to exercise the padded path.
    N = 300
    in_features = 2
    hidden_features = 32
    hidden_layers = 2
    out_features = 1

    kp, kx = jax.random.split(key)
    weights, biases, omegas = init_finer_params(
        kp, in_features, hidden_features, hidden_layers, out_features,
        first_omega_0=30.0, hidden_omega_0=30.0, first_bias_scale=None)

    coords = jax.random.uniform(kx, (N, in_features), jnp.float32,
                                minval=-1.0, maxval=1.0)

    ref = finer_reference(coords, weights, biases, omegas)

    # Exact f32 path (default) -- must match the reference tightly.
    out_f32 = jax.block_until_ready(
        finer_forward(coords, weights, biases, omegas, precision="float32"))
    assert out_f32.shape == (N, out_features)
    np.testing.assert_allclose(np.asarray(out_f32), np.asarray(ref),
                               atol=5e-4, rtol=5e-4)

    # bf16-matmul fast path (MXU-native operands, f32 accumulate + activation).
    out_bf16 = jax.block_until_ready(
        finer_forward(coords, weights, biases, omegas, precision="bfloat16"))
    assert out_bf16.shape == (N, out_features)
    np.testing.assert_allclose(np.asarray(out_bf16), np.asarray(ref),
                               atol=2e-2, rtol=2e-2)

    print("KERNEL_OK")
</pallas_src>

<mosaic_0001>
module attributes {stable_mosaic.version = 11 : i64} {
  func.func @kernel(%arg0: i32, %arg1: memref<2x384xf32, #tpu.memory_space<vmem>>, %arg2: memref<32x2xf32, #tpu.memory_space<vmem>>, %arg3: memref<32x1xf32, #tpu.memory_space<vmem>>, %arg4: memref<32x32xf32, #tpu.memory_space<vmem>>, %arg5: memref<32x1xf32, #tpu.memory_space<vmem>>, %arg6: memref<32x32xf32, #tpu.memory_space<vmem>>, %arg7: memref<32x1xf32, #tpu.memory_space<vmem>>, %arg8: memref<1x32xf32, #tpu.memory_space<vmem>>, %arg9: memref<1x1xf32, #tpu.memory_space<vmem>>, %arg10: memref<1x384xf32, #tpu.memory_space<vmem>>) attributes {dimension_semantics = [#tpu.dimension_semantics<parallel>], iteration_bounds = array<i64: 1>, scalar_prefetch = 0 : i64, scratch_operands = 0 : i64, tpu.core_type = #tpu.core_type<tc>, window_params = [{transform_indices = @transform_0, window_bounds = array<i64: 2, 384>}, {pipeline_mode = #tpu.pipeline_mode<synchronous>, transform_indices = @transform_1, window_bounds = array<i64: 32, 2>}, {pipeline_mode = #tpu.pipeline_mode<synchronous>, transform_indices = @transform_2, window_bounds = array<i64: 32, 1>}, {pipeline_mode = #tpu.pipeline_mode<synchronous>, transform_indices = @transform_3, window_bounds = array<i64: 32, 32>}, {pipeline_mode = #tpu.pipeline_mode<synchronous>, transform_indices = @transform_4, window_bounds = array<i64: 32, 1>}, {pipeline_mode = #tpu.pipeline_mode<synchronous>, transform_indices = @transform_5, window_bounds = array<i64: 32, 32>}, {pipeline_mode = #tpu.pipeline_mode<synchronous>, transform_indices = @transform_6, window_bounds = array<i64: 32, 1>}, {pipeline_mode = #tpu.pipeline_mode<synchronous>, transform_indices = @transform_7, window_bounds = array<i64: 1, 32>}, {pipeline_mode = #tpu.pipeline_mode<synchronous>, transform_indices = @transform_8, window_bounds = array<i64: 1, 1>}, {transform_indices = @transform_9, window_bounds = array<i64: 1, 384>}]} {
    %c0 = arith.constant 0 : index
    %c0_0 = arith.constant 0 : index
    %0 = vector.load %arg1[%c0, %c0_0] : memref<2x384xf32, #tpu.memory_space<vmem>>, vector<2x384xf32>
    %c0_1 = arith.constant 0 : index
    %c0_2 = arith.constant 0 : index
    %1 = vector.load %arg2[%c0_1, %c0_2] : memref<32x2xf32, #tpu.memory_space<vmem>>, vector<32x2xf32>
    %c0_3 = arith.constant 0 : index
    %c0_4 = arith.constant 0 : index
    %2 = vector.load %arg3[%c0_3, %c0_4] : memref<32x1xf32, #tpu.memory_space<vmem>>, vector<32x1xf32>
    %3 = vector.extract_strided_slice %1 {offsets = [0, 0], sizes = [32, 1], strides = [1, 1]} : vector<32x2xf32> to vector<32x1xf32>
    %4 = vector.extract_strided_slice %0 {offsets = [0, 0], sizes = [1, 384], strides = [1, 1]} : vector<2x384xf32> to vector<1x384xf32>
    %5 = vector.broadcast %3 : vector<32x1xf32> to vector<32x384xf32>
    %6 = vector.broadcast %4 : vector<1x384xf32> to vector<32x384xf32>
    %7 = arith.mulf %5, %6 : vector<32x384xf32>
    %8 = vector.extract_strided_slice %1 {offsets = [0, 1], sizes = [32, 1], strides = [1, 1]} : vector<32x2xf32> to vector<32x1xf32>
    %9 = vector.extract_strided_slice %0 {offsets = [1, 0], sizes = [1, 384], strides = [1, 1]} : vector<2x384xf32> to vector<1x384xf32>
    %10 = vector.broadcast %8 : vector<32x1xf32> to vector<32x384xf32>
    %11 = vector.broadcast %9 : vector<1x384xf32> to vector<32x384xf32>
    %12 = arith.mulf %10, %11 : vector<32x384xf32>
    %13 = arith.addf %7, %12 : vector<32x384xf32>
    %14 = vector.broadcast %2 : vector<32x1xf32> to vector<32x384xf32>
    %15 = arith.addf %13, %14 : vector<32x384xf32>
    %16 = math.absf %15 : vector<32x384xf32>
    %cst = arith.constant 1.000000e+00 : f32
    %17 = vector.broadcast %cst : f32 to vector<32x384xf32>
    %18 = arith.addf %16, %17 : vector<32x384xf32>
    %cst_5 = arith.constant 3.000000e+01 : f32
    %19 = vector.broadcast %cst_5 : f32 to vector<32x384xf32>
    %20 = arith.mulf %19, %18 : vector<32x384xf32>
    %21 = arith.mulf %20, %15 : vector<32x384xf32>
    %22 = math.sin %21 : vector<32x384xf32>
    %c0_6 = arith.constant 0 : index
    %c0_7 = arith.constant 0 : index
    %23 = vector.load %arg4[%c0_6, %c0_7] : memref<32x32xf32, #tpu.memory_space<vmem>>, vector<32x32xf32>
    %c0_8 = arith.constant 0 : index
    %c0_9 = arith.constant 0 : index
    %24 = vector.load %arg5[%c0_8, %c0_9] : memref<32x1xf32, #tpu.memory_space<vmem>>, vector<32x1xf32>
    %cst_10 = arith.constant dense<0.000000e+00> : vector<32x384xf32>
    %25 = tpu.matmul %23, %22, %cst_10 {dimension_numbers = #tpu.dot_dimension_numbers<[1], [0], [0], [1], [0, 0, 1, 1], [], []>} : vector<32x32xf32>, vector<32x384xf32>, vector<32x384xf32> -> vector<32x384xf32>
    %26 = vector.broadcast %24 : vector<32x1xf32> to vector<32x384xf32>
    %27 = arith.addf %25, %26 : vector<32x384xf32>
    %28 = math.absf %27 : vector<32x384xf32>
    %cst_11 = arith.constant 1.000000e+00 : f32
    %29 = vector.broadcast %cst_11 : f32 to vector<32x384xf32>
    %30 = arith.addf %28, %29 : vector<32x384xf32>
    %cst_12 = arith.constant 3.000000e+01 : f32
    %31 = vector.broadcast %cst_12 : f32 to vector<32x384xf32>
    %32 = arith.mulf %31, %30 : vector<32x384xf32>
    %33 = arith.mulf %32, %27 : vector<32x384xf32>
    %34 = math.sin %33 : vector<32x384xf32>
    %c0_13 = arith.constant 0 : index
    %c0_14 = arith.constant 0 : index
    %35 = vector.load %arg6[%c0_13, %c0_14] : memref<32x32xf32, #tpu.memory_space<vmem>>, vector<32x32xf32>
    %c0_15 = arith.constant 0 : index
    %c0_16 = arith.constant 0 : index
    %36 = vector.load %arg7[%c0_15, %c0_16] : memref<32x1xf32, #tpu.memory_space<vmem>>, vector<32x1xf32>
    %cst_17 = arith.constant dense<0.000000e+00> : vector<32x384xf32>
    %37 = tpu.matmul %35, %34, %cst_17 {dimension_numbers = #tpu.dot_dimension_numbers<[1], [0], [0], [1], [0, 0, 1, 1], [], []>} : vector<32x32xf32>, vector<32x384xf32>, vector<32x384xf32> -> vector<32x384xf32>
    %38 = vector.broadcast %36 : vector<32x1xf32> to vector<32x384xf32>
    %39 = arith.addf %37, %38 : vector<32x384xf32>
    %40 = math.absf %39 : vector<32x384xf32>
    %cst_18 = arith.constant 1.000000e+00 : f32
    %41 = vector.broadcast %cst_18 : f32 to vector<32x384xf32>
    %42 = arith.addf %40, %41 : vector<32x384xf32>
    %cst_19 = arith.constant 3.000000e+01 : f32
    %43 = vector.broadcast %cst_19 : f32 to vector<32x384xf32>
    %44 = arith.mulf %43, %42 : vector<32x384xf32>
    %45 = arith.mulf %44, %39 : vector<32x384xf32>
    %46 = math.sin %45 : vector<32x384xf32>
    %c0_20 = arith.constant 0 : index
    %c0_21 = arith.constant 0 : index
    %47 = vector.load %arg8[%c0_20, %c0_21] : memref<1x32xf32, #tpu.memory_space<vmem>>, vector<1x32xf32>
    %c0_22 = arith.constant 0 : index
    %c0_23 = arith.constant 0 : index
    %48 = vector.load %arg9[%c0_22, %c0_23] : memref<1x1xf32, #tpu.memory_space<vmem>>, vector<1x1xf32>
    %cst_24 = arith.constant dense<0.000000e+00> : vector<1x384xf32>
    %49 = tpu.matmul %47, %46, %cst_24 {dimension_numbers = #tpu.dot_dimension_numbers<[1], [0], [0], [1], [0, 0, 1, 1], [], []>} : vector<1x32xf32>, vector<32x384xf32>, vector<1x384xf32> -> vector<1x384xf32>
    %50 = vector.broadcast %48 : vector<1x1xf32> to vector<1x384xf32>
    %51 = arith.addf %49, %50 : vector<1x384xf32>
    %c0_25 = arith.constant 0 : index
    %c0_26 = arith.constant 0 : index
    %52 = vector.load %arg10[%c0_25, %c0_26] : memref<1x384xf32, #tpu.memory_space<vmem>>, vector<1x384xf32>
    tpu.vector_store %arg10[%c0_25, %c0_26], %51 {strides = array<i32>} : memref<1x384xf32, #tpu.memory_space<vmem>>, vector<1x384xf32>,
    return
  }
  func.func @transform_0(%arg0: i32) -> (i32, i32) {
    %c0_i32 = arith.constant 0 : i32
    %c0_i32_0 = arith.constant 0 : i32
    return %c0_i32, %arg0 : i32, i32
  }
  func.func @transform_1(%arg0: i32) -> (i32, i32) {
    %c0_i32 = arith.constant 0 : i32
    %c0_i32_0 = arith.constant 0 : i32
    %c0_i32_1 = arith.constant 0 : i32
    return %c0_i32, %c0_i32_0 : i32, i32
  }
  func.func @transform_2(%arg0: i32) -> (i32, i32) {
    %c0_i32 = arith.constant 0 : i32
    %c0_i32_0 = arith.constant 0 : i32
    %c0_i32_1 = arith.constant 0 : i32
    return %c0_i32, %c0_i32_0 : i32, i32
  }
  func.func @transform_3(%arg0: i32) -> (i32, i32) {
    %c0_i32 = arith.constant 0 : i32
    %c0_i32_0 = arith.constant 0 : i32
    %c0_i32_1 = arith.constant 0 : i32
    return %c0_i32, %c0_i32_0 : i32, i32
  }
  func.func @transform_4(%arg0: i32) -> (i32, i32) {
    %c0_i32 = arith.constant 0 : i32
    %c0_i32_0 = arith.constant 0 : i32
    %c0_i32_1 = arith.constant 0 : i32
    return %c0_i32, %c0_i32_0 : i32, i32
  }
  func.func @transform_5(%arg0: i32) -> (i32, i32) {
    %c0_i32 = arith.constant 0 : i32
    %c0_i32_0 = arith.constant 0 : i32
    %c0_i32_1 = arith.constant 0 : i32
    return %c0_i32, %c0_i32_0 : i32, i32
  }
  func.func @transform_6(%arg0: i32) -> (i32, i32) {
    %c0_i32 = arith.constant 0 : i32
    %c0_i32_0 = arith.constant 0 : i32
    %c0_i32_1 = arith.constant 0 : i32
    return %c0_i32, %c0_i32_0 : i32, i32
  }
  func.func @transform_7(%arg0: i32) -> (i32, i32) {
    %c0_i32 = arith.constant 0 : i32
    %c0_i32_0 = arith.constant 0 : i32
    %c0_i32_1 = arith.constant 0 : i32
    return %c0_i32, %c0_i32_0 : i32, i32
  }
  func.func @transform_8(%arg0: i32) -> (i32, i32) {
    %c0_i32 = arith.constant 0 : i32
    %c0_i32_0 = arith.constant 0 : i32
    %c0_i32_1 = arith.constant 0 : i32
    return %c0_i32, %c0_i32_0 : i32, i32
  }
  func.func @transform_9(%arg0: i32) -> (i32, i32) {
    %c0_i32 = arith.constant 0 : i32
    %c0_i32_0 = arith.constant 0 : i32
    return %c0_i32, %arg0 : i32, i32
  }
}

</mosaic_0001>

<bundles_post_ra>
// kernel: tpu_custom_call.1
= control target key start
LH: loop header
LB: loop body
LE: loop exit
PB: predicated region body
PF: predicated region fallthrough
CT: control target
= control target key end

     0   :  { %s9221_s0 = inlined_call_operand.vmem [shape: f32[2,384], index: 0, kind: input, shape index: {}]   ;;  %s9222_s1 = inlined_call_operand.vmem [shape: f32[32,2], index: 1, kind: input, shape index: {}]   ;;  %s9223_s2 = inlined_call_operand.vmem [shape: f32[32,1], index: 2, kind: input, shape index: {}]   ;;  %s9224_s3 = inlined_call_operand.vmem [shape: f32[32,32], index: 3, kind: input, shape index: {}]   ;;  %s9225_s4 = inlined_call_operand.vmem [shape: f32[32,1], index: 4, kind: input, shape index: {}]   ;;  %s9226_s5 = inlined_call_operand.vmem [shape: f32[32,32], index: 5, kind: input, shape index: {}]   ;;  %s9227_s6 = inlined_call_operand.vmem [shape: f32[32,1], index: 6, kind: input, shape index: {}]   ;;  %s9228_s7 = inlined_call_operand.vmem [shape: f32[1,32], index: 7, kind: input, shape index: {}]   ;;  %s9229_s8 = inlined_call_operand.<no memory space> [shape: f32[1,1], index: 8, kind: input, shape index: {}]   ;;  %s9230_s9 = inlined_call_operand.hbm [shape: f32[1,384], index: 9, kind: output, shape index: {}]  }
   0x1   :  { %v14_v0 = vstv %s9229_s8 }
   0x2   :  { %15 = vst [vmem:[#allocation2] sm:$0x1] %v14_v0 }
   0x3   :  { %v38_v1 = vld [vmem:[%s9222_s1 + $0x10] sm:$0xff]  ;;  %v36_v2 = vld [vmem:[%s9222_s1] sm:$0xff]  ;;  %v9231_v3 = vlaneseq  ;;  %v5321_v4 = vmov 1   ;;  %v37_v6 = vld [vmem:[%s9222_s1 + $0x8] sm:$0xff]  ;;  %v5322_v9 = vmov 0  }
   0x4   :  { %5148 = vset.pattern.permute.xlu0 %v5321_v4  ;;  %5146 = vset.pattern.permute.xlu1 %v5321_v4  ;;  %v5403_v8 = vld [vmem:[%s9221_s0] sm:$0x3f] }
   0x5   :  { %113 = vperm.xlu0 %5148, %v38_v1   ;;  %105 = vperm.xlu1 %5146, %v36_v2   ;;  %v5394_v5 = vshrl.u32 %v9231_v3, 7 }
   0x7   :  { %9352 = vst [vmem:[#allocation6_spill] sm:$0xff] %v5394_v5  ;;  %v122_v7 = vsub.s32 1, %v5394_v5 }
   0x9   :  { %5149 = vset.pattern.permute.xlu0 %v5322_v9  ;;  %109 = vperm.xlu1 %5146, %v37_v6   ;;  %v123_v10 = vrot.slane %v5403_v8, %v122_v7 }
   0xa   :  { %16 = vsyncpa [#allocation4], 0  ;;  %46 = vperm.xlu0 %5149, %v36_v2   ;;  %v39_v11 = vld [vmem:[%s9222_s1 + $0x18] sm:$0xff]  ;;  %v41_v13 = vld [vmem:[%s9223_s2 + $0x8] sm:$0xff]  ;;  %v126_v26 = vsub.s32 3, %v5394_v5  ;;  %v130_v27 = vsub.s32 5, %v5394_v5 }
   0xb   :  { %v5409_v12 = vrot.slane %v123_v10, %v122_v7  ;;  %v40_v14 = vld [vmem:[%s9223_s2] sm:$0xff]  ;;  %v42_v16 = vld [vmem:[%s9223_s2 + $0x10] sm:$0xff]  ;;  %v43_v18 = vld [vmem:[%s9223_s2 + $0x18] sm:$0xff]  ;;  %v5450_v28 = vsub.s32 0, %v5394_v5  ;;  %v71_v38 = vsub.s32 2, %v5394_v5  ;;  %v75_v39 = vsub.s32 4, %v5394_v5 }
   0xc   :  { %v1503_v15 = vld [vmem:[%s9225_s4] sm:$0xff]  ;;  %v1505_v17 = vld [vmem:[%s9225_s4 + $0x10] sm:$0xff]  ;;  %v1504_v20 = vld [vmem:[%s9225_s4 + $0x8] sm:$0xff]  ;;  %v127_v29 = vrot.slane %v5403_v8, %v126_v26  ;;  %v131_v30 = vrot.slane %v5403_v8, %v130_v27 }
   0xd   :  { %5147 = vset.pattern.permute.xlu1 %v5322_v9  ;;  %v3014_v19 = vld [vmem:[%s9227_s6] sm:$0xff]  ;;  %v3016_v21 = vld [vmem:[%s9227_s6 + $0x10] sm:$0xff]  ;;  %v1506_v22 = vld [vmem:[%s9225_s4 + $0x18] sm:$0xff]  ;;  %9353 = vst [vmem:[#allocation7_spill] sm:$0xff] %v5450_v28  ;;  %v68_v31 = vrot.slane %v5403_v8, %v5450_v28  ;;  %v72_v46 = vrot.slane %v5403_v8, %v71_v38  ;;  %v76_v47 = vrot.slane %v5403_v8, %v75_v39 }
   0xe   :  { %51 = vperm.xlu0 %5149, %v37_v6   ;;  %61 = vperm.xlu1 %5147, %v39_v11   ;;  %v4521_v23 = vld [vmem:[#allocation2] sm:$0x1]  ;;  %v3015_v24 = vld [vmem:[%s9227_s6 + $0x8] sm:$0xff]  ;;  %v3017_v25 = vld [vmem:[%s9227_s6 + $0x18] sm:$0xff]  ;;  %v142_v33 = vrot.slane %v127_v29, %v122_v7  ;;  %v146_v34 = vrot.slane %v131_v30, %v122_v7 }
   0xf   :  { %v83_v42 = vrot.slane %v68_v31, %v5450_v28  ;;  %v87_v50 = vrot.slane %v72_v46, %v5450_v28  ;;  %v91_v51 = vrot.slane %v76_v47, %v5450_v28 }
  0x12   :  { %56 = vperm.xlu0 %5149, %v38_v1   ;;  %5150 = vset.pattern.permute.xlu1 %v5321_v4 }
  0x13   :  { %117 = vperm.xlu1 %5150, %v39_v11  }
  0x16   :  { %178 = vperm.xlu0 %5149, %v41_v13  }
  0x17   :  { %5151 = vset.pattern.permute.xlu1 %v5322_v9 }
  0x18   :  { %173 = vperm.xlu1 %5151, %v40_v14  }
  0x1a   :  { %1509 = vperm.xlu0 %5149, %v1503_v15  }
  0x1c   :  { %183 = vperm.xlu1 %5151, %v42_v16  }
  0x1e   :  { %1519 = vperm.xlu0 %5149, %v1505_v17  }
  0x20   :  { %188 = vperm.xlu1 %5151, %v43_v18  }
  0x22   :  { %3020 = vperm.xlu0 %5149, %v3014_v19  }
  0x24   :  { %1514 = vperm.xlu1 %5151, %v1504_v20  }
  0x26   :  { %3030 = vperm.xlu0 %5149, %v3016_v21  }
  0x28   :  { %1524 = vperm.xlu1 %5151, %v1506_v22  }
  0x2a   :  { %4524 = vperm.xlu0 %5149, %v4521_v23  }
  0x2c   :  { %3025 = vperm.xlu1 %5151, %v3015_v24  }
  0x30   :  { %3035 = vperm.xlu1 %5151, %v3017_v25  }
  0x84   :  { %v106_v32 = vpop.permute.xlu1 %105  ;;  %v114_v35 = vpop.permute.xlu0 %113 }
  0x85   :  { %v147_v36 = vmul.f32 %v5409_v12, %v106_v32  ;;  %v153_v37 = vmul.f32 %v5409_v12, %v114_v35  ;;  %v154_v40 = vmul.f32 %v142_v33, %v114_v35  ;;  %v155_v41 = vmul.f32 %v146_v34, %v114_v35 }
  0x86   :  { %v148_v20 = vmul.f32 %v142_v33, %v106_v32  ;;  %v149_v23 = vmul.f32 %v146_v34, %v106_v32 }
  0x88   :  { %v110_v43 = vpop.permute.xlu1 %109 }
  0x89   :  { %v150_v44 = vmul.f32 %v5409_v12, %v110_v43  ;;  %v47_v45 = vpop.permute.xlu0 %46  ;;  %v151_v59 = vmul.f32 %v142_v33, %v110_v43  ;;  %v152_v60 = vmul.f32 %v146_v34, %v110_v43 }
  0x8a   :  { %v92_v48 = vmul.f32 %v83_v42, %v47_v45  ;;  %v93_v6 = vmul.f32 %v87_v50, %v47_v45  ;;  %v94_v10 = vmul.f32 %v91_v51, %v47_v45 }
  0x8c   :  { %v159_v49 = vadd.f32 %v147_v36, %v92_v48  ;;  %v160_v26 = vadd.f32 %v148_v20, %v93_v6  ;;  %v161_v29 = vadd.f32 %v149_v23, %v94_v10 }
  0x8d   :  { %v52_v52 = vpop.permute.xlu0 %51  ;;  %v62_v53 = vpop.permute.xlu1 %61 }
  0x8e   :  { %v95_v54 = vmul.f32 %v83_v42, %v52_v52  ;;  %v101_v55 = vmul.f32 %v83_v42, %v62_v53  ;;  %v102_v56 = vmul.f32 %v87_v50, %v62_v53  ;;  %v103_v57 = vmul.f32 %v91_v51, %v62_v53 }
  0x8f   :  { %v96_v61 = vmul.f32 %v87_v50, %v52_v52  ;;  %v97_v63 = vmul.f32 %v91_v51, %v52_v52 }
  0x90   :  { %v162_v58 = vadd.f32 %v150_v44, %v95_v54 }
  0x91   :  { %v57_v62 = vpop.permute.xlu0 %56  ;;  %v163_v16 = vadd.f32 %v151_v59, %v96_v61  ;;  %v164_v21 = vadd.f32 %v152_v60, %v97_v63 }
  0x92   :  { %v98_v0 = vmul.f32 %v83_v42, %v57_v62  ;;  %v99_v1 = vmul.f32 %v87_v50, %v57_v62  ;;  %v100_v2 = vmul.f32 %v91_v51, %v57_v62  ;;  %v118_v4 = vpop.permute.xlu1 %117 }
  0x93   :  { %v156_v7 = vmul.f32 %v5409_v12, %v118_v4  ;;  %v157_v8 = vmul.f32 %v142_v33, %v118_v4  ;;  %v158_v9 = vmul.f32 %v146_v34, %v118_v4 }
  0x94   :  { %v165_v11 = vadd.f32 %v153_v37, %v98_v0  ;;  %v166_v13 = vadd.f32 %v154_v40, %v99_v1  ;;  %v167_v14 = vadd.f32 %v155_v41, %v100_v2 }
  0x95   :  { %v179_v15 = vpop.permute.xlu0 %178  ;;  %v5467_v17 = vadd.f32 %v156_v7, %v101_v55  ;;  %v5469_v18 = vadd.f32 %v157_v8, %v102_v56  ;;  %v5471_v19 = vadd.f32 %v158_v9, %v103_v57 }
  0x96   :  { %v194_v22 = vadd.f32 %v179_v15, %v162_v58  ;;  %v195_v24 = vadd.f32 %v179_v15, %v163_v16  ;;  %v196_v25 = vadd.f32 %v179_v15, %v164_v21 }
  0x97   :  { %v174_v12 = vpop.permute.xlu1 %173 }
  0x98   :  { %v191_v27 = vadd.f32 %v174_v12, %v159_v49  ;;  %v206_v30 = vand.u32 2147483647, %v194_v22  ;;  %v192_v31 = vadd.f32 %v174_v12, %v160_v26  ;;  %v207_v35 = vand.u32 2147483647, %v195_v24 }
  0x99   :  { %v193_v36 = vadd.f32 %v174_v12, %v161_v29  ;;  %v208_v38 = vand.u32 2147483647, %v196_v25 }
  0x9a   :  { %v203_v39 = vand.u32 2147483647, %v191_v27  ;;  %v218_v41 = vadd.f32 1.0, %v206_v30  ;;  %v204_v42 = vand.u32 2147483647, %v192_v31  ;;  %v219_v43 = vadd.f32 1.0, %v207_v35 }
  0x9b   :  { %v184_v37 = vpop.permute.xlu1 %183  ;;  %v205_v44 = vand.u32 2147483647, %v193_v36  ;;  %v220_v34 = vadd.f32 1.0, %v208_v38 }
  0x9c   :  { %v197_v40 = vadd.f32 %v184_v37, %v165_v11  ;;  %v198_v33 = vadd.f32 %v184_v37, %v166_v13  ;;  %v199_v32 = vadd.f32 %v184_v37, %v167_v14  ;;  %v215_v45 = vadd.f32 1.0, %v203_v39 }
  0x9d   :  { %v230_v46 = vmul.f32 30.0, %v218_v41  ;;  %v216_v47 = vadd.f32 1.0, %v204_v42  ;;  %v231_v50 = vmul.f32 30.0, %v219_v43  ;;  %v217_v51 = vadd.f32 1.0, %v205_v44 }
  0x9e   :  { %v209_v48 = vand.u32 2147483647, %v197_v40  ;;  %v210_v49 = vand.u32 2147483647, %v198_v33  ;;  %v211_v52 = vand.u32 2147483647, %v199_v32 }
  0x9f   :  { %v232_v53 = vmul.f32 30.0, %v220_v34  ;;  %v227_v54 = vmul.f32 30.0, %v215_v45  ;;  %v5473_v55 = vmul.f32 %v230_v46, %v194_v22  ;;  %v228_v56 = vmul.f32 30.0, %v216_v47  ;;  %v189_v11 = vpop.permute.xlu1 %188 }
  0xa0   :  { %v221_v57 = vadd.f32 1.0, %v209_v48  ;;  %v222_v58 = vadd.f32 1.0, %v210_v49  ;;  %v5475_v59 = vmul.f32 %v231_v50, %v195_v24  ;;  %v229_v60 = vmul.f32 30.0, %v217_v51 }
  0xa1   :  { %v223_v61 = vadd.f32 1.0, %v211_v52  ;;  %v5477_v62 = vmul.f32 %v232_v53, %v196_v25  ;;  %v5479_v63 = vmul.f32 %v227_v54, %v191_v27  ;;  %v566_v0 = vand.u32 2139095040, %v5473_v55 }
  0xa2   :  { %v5482_v1 = vmul.f32 %v228_v56, %v192_v31  ;;  %v233_v2 = vmul.f32 30.0, %v221_v57  ;;  %v234_v4 = vmul.f32 30.0, %v222_v58  ;;  %v670_v6 = vand.u32 2139095040, %v5475_v59 }
  0xa3   :  { %v5485_v7 = vmul.f32 %v229_v60, %v193_v36  ;;  %v235_v8 = vmul.f32 30.0, %v223_v61  ;;  %v774_v9 = vand.u32 2139095040, %v5477_v62  ;;  %v254_v10 = vand.u32 2139095040, %v5479_v63 }
  0xa4   :  { %v567_v13 = vshrl.u32 %v566_v0, 23  ;;  %v358_v14 = vand.u32 2139095040, %v5482_v1  ;;  %v5490_v15 = vmul.f32 %v233_v2, %v197_v40  ;;  %v5492_v16 = vmul.f32 %v234_v4, %v198_v33 }
  0xa5   :  { %v671_v20 = vshrl.u32 %v670_v6, 23  ;;  %v462_v21 = vand.u32 2139095040, %v5485_v7  ;;  %v5495_v22 = vmul.f32 %v235_v8, %v199_v32  ;;  %v5498_v23 = vadd.f32 %v189_v11, %v5467_v17 }
  0xa6   :  { %9354 = vst [vmem:[#allocation8_spill] sm:$0xff] %v5490_v15  ;;  %9355 = vst [vmem:[#allocation9_spill] sm:$0xff] %v5492_v16  ;;  %v775_v24 = vshrl.u32 %v774_v9, 23  ;;  %v255_v12 = vshrl.u32 %v254_v10, 23  ;;  %v878_v25 = vand.u32 2139095040, %v5490_v15  ;;  %v982_v26 = vand.u32 2139095040, %v5492_v16 }
  0xa7   :  { %9356 = vst [vmem:[#allocation10_spill] sm:$0xff] %v5495_v22  ;;  %v1086_v27 = vand.u32 2139095040, %v5495_v22  ;;  %v359_v29 = vshrl.u32 %v358_v14, 23  ;;  %v4733_v35 = vadd.s32 4294967169, %v567_v13  ;;  %v463_v36 = vshrl.u32 %v462_v21, 23 }
  0xa8   :  { %v879_v30 = vshrl.u32 %v878_v25, 23  ;;  %v983_v31 = vshrl.u32 %v982_v26, 23  ;;  %v4737_v37 = vadd.s32 4294967169, %v671_v20  ;;  %v4741_v38 = vadd.s32 4294967169, %v775_v24 }
  0xa9   :  { %v4721_v39 = vadd.s32 4294967169, %v255_v12  ;;  %v1087_v17 = vshrl.u32 %v1086_v27, 23  ;;  %v201_v42 = vadd.f32 %v189_v11, %v5469_v18  ;;  %v4725_v33 = vadd.s32 4294967169, %v359_v29 }
  0xaa   :  { %v4745_v40 = vadd.s32 4294967169, %v879_v30  ;;  %v4749_v41 = vadd.s32 4294967169, %v983_v31  ;;  %v573_v43 = vadd.s32 1, %v4733_v35  ;;  %v4729_v44 = vadd.s32 4294967169, %v463_v36 }
  0xab   :  { %v677_v32 = vadd.s32 1, %v4737_v37  ;;  %v781_v34 = vadd.s32 1, %v4741_v38  ;;  %v261_v45 = vadd.s32 1, %v4721_v39  ;;  %v4753_v48 = vadd.s32 4294967169, %v1087_v17 }
  0xac   :  { %v885_v46 = vadd.s32 1, %v4745_v40  ;;  %v989_v47 = vadd.s32 1, %v4749_v41  ;;  %v212_v49 = vand.u32 2147483647, %v5498_v23  ;;  %v213_v50 = vand.u32 2147483647, %v201_v42 }
  0xad   :  { %v365_v51 = vadd.s32 1, %v4725_v33  ;;  %vm574_vm0 = vcmp.gt.s32.totalorder %v573_v43, 0  ;;  %v469_v52 = vadd.s32 1, %v4729_v44  ;;  %v5506_v53 = vadd.f32 %v189_v11, %v5471_v19 }
  0xae   :  { %vm678_vm1 = vcmp.gt.s32.totalorder %v677_v32, 0  ;;  %vm782_vm2 = vcmp.gt.s32.totalorder %v781_v34, 0  ;;  %vm262_vm3 = vcmp.gt.s32.totalorder %v261_v45, 0  ;;  %vm886_vm4 = vcmp.gt.s32.totalorder %v885_v46, 0 }
  0xaf   :  { %vm990_vm5 = vcmp.gt.s32.totalorder %v989_v47, 0  ;;  %v1093_v18 = vadd.s32 1, %v4753_v48  ;;  %v224_v54 = vadd.f32 1.0, %v212_v49  ;;  %v225_v56 = vadd.f32 1.0, %v213_v50 }
  0xb0   :  { %v575_v57 = vsel %vm574_vm0, %v573_v43, 0  ;;  %vm366_vm6 = vcmp.gt.s32.totalorder %v365_v51, 0  ;;  %v679_v58 = vsel %vm678_vm1, %v677_v32, 0  ;;  %vm470_vm7 = vcmp.gt.s32.totalorder %v469_v52, 0 }
  0xb1   :  { %v887_v60 = vsel %vm886_vm4, %v885_v46, 0  ;;  %v214_v61 = vand.u32 2147483647, %v5506_v53  ;;  %v783_v0 = vsel %vm782_vm2, %v781_v34, 0  ;;  %v263_v2 = vsel %vm262_vm3, %v261_v45, 0 }
  0xb2   :  { %v991_v4 = vsel %vm990_vm5, %v989_v47, 0  ;;  %v367_v19 = vsel %vm366_vm6, %v365_v51, 0  ;;  %vm1094_vm8 = vcmp.gt.s32.totalorder %v1093_v18, 0  ;;  %v236_v6 = vmul.f32 30.0, %v224_v54 }
  0xb3   :  { %v237_v8 = vmul.f32 30.0, %v225_v56  ;;  %v5509_v9 = vand.u32 31, %v575_v57  ;;  %v5511_v10 = vand.u32 31, %v679_v58  ;;  %v471_v11 = vsel %vm470_vm7, %v469_v52, 0 }
  0xb4   :  { %v5513_v13 = vand.u32 31, %v887_v60  ;;  %v5515_v14 = vshrl.u32 %v575_v57, 5  ;;  %v5517_v20 = vand.u32 31, %v783_v0  ;;  %v5519_v21 = vand.u32 31, %v991_v4 }
  0xb5   :  { %9357 = vst [vmem:[#allocation11_spill] sm:$0xff] %v5509_v9  ;;  %v226_v24 = vadd.f32 1.0, %v214_v61  ;;  %v5521_v12 = vshrl.u32 %v679_v58, 5  ;;  %v5523_v25 = vand.u32 31, %v263_v2  ;;  %v5525_v26 = vand.u32 31, %v367_v19 }
  0xb6   :  { %9358 = vst [vmem:[#allocation12_spill] sm:$0xff] %v5513_v13  ;;  %9359 = vst [vmem:[#allocation13_spill] sm:$0xff] %v5515_v14  ;;  %v1095_v27 = vsel %vm1094_vm8, %v1093_v18, 0  ;;  %v5527_v29 = vshrl.u32 %v783_v0, 5  ;;  %v5529_v30 = vand.u32 31, %v471_v11  ;;  %v5532_v31 = vmul.f32 %v236_v6, %v5498_v23 }
  0xb7   :  { %9360 = vst [vmem:[#allocation14_spill] sm:$0xff] %v5519_v21  ;;  %v5534_v35 = vmul.f32 %v237_v8, %v201_v42  ;;  %v5537_v36 = vsub.s32 32, %v5509_v9  ;;  %v5540_v37 = vsub.s32 32, %v5511_v10  ;;  %v5543_v38 = vsub.s32 32, %v5513_v13 }
  0xb8   :  { %9361 = vst [vmem:[#allocation15_spill] sm:$0xff] %v5532_v31  ;;  %v9232_v39 = vand.u32 2147483647, %v5482_v1  ;;  %v5547_v40 = vsub.s32 32, %v5517_v20  ;;  %v5550_v41 = vsub.s32 32, %v5519_v21  ;;  %v5552_v23 = vand.u32 31, %v1095_v27 }
  0xb9   :  { %9362 = vst [vmem:[#allocation16_spill] sm:$0xff] %v5534_v35  ;;  %9363 = vst [vmem:[#allocation17_spill] sm:$0xff] %v5537_v36  ;;  %v238_v17 = vmul.f32 30.0, %v226_v24  ;;  %v5554_v42 = vshrl.u32 %v263_v2, 5  ;;  %v5557_v33 = vsub.s32 32, %v5523_v25  ;;  %v5559_v43 = vshrl.u32 %v367_v19, 5 }
  0xba   :  { %9364 = vst [vmem:[#allocation18_spill] sm:$0xff] %v5543_v38  ;;  %9365 = vst [vmem:[#allocation19_spill] sm:$0xff] %v5550_v41  ;;  %v370_v44 = vsub.s32 32, %v5525_v26  ;;  %v5562_v32 = vshrl.u32 %v471_v11, 5  ;;  %v5565_v34 = vsub.s32 32, %v5529_v30  ;;  %v1190_v45 = vand.u32 2139095040, %v5532_v31 }
  0xbb   :  { %9366 = vst [vmem:[#allocation20_spill] sm:$0xff] %v5552_v23  ;;  %v1294_v46 = vand.u32 2139095040, %v5534_v35  ;;  %v5569_v47 = vshrl.u32 %v887_v60, 5  ;;  %v9233_v48 = vmov 920167782   ;;  %v5573_v50 = vshrl.u32 %v991_v4, 5 }
  0xbc   :  { %v902_v49 = vshrl.u32 %v9233_v48, %v5543_v38  ;;  %v362_v51 = vand.u32 8388607, %v9232_v39  ;;  %v9236_v52 = vmov 1326507024   ;;  %v1006_v54 = vshrl.u32 %v9233_v48, %v5550_v41 }
  0xbd   :  { %9367 = vst [vmem:[#allocation21_spill] sm:$0xff] %v5569_v47  ;;  %v5579_v18 = vshrl.u32 %v9236_v52, %v5543_v38  ;;  %v5584_v56 = vsub.s32 32, %v5552_v23  ;;  %v5587_v57 = vmul.f32 %v238_v17, %v5506_v53  ;;  %v9239_v58 = vmov 2102212464  }
  0xbe   :  { %v901_v60 = vshll.u32 %v9239_v58, %v5513_v13  ;;  %v5593_v61 = vshll.u32 %v9233_v48, %v5513_v13  ;;  %v1005_v0 = vshll.u32 %v9239_v58, %v5519_v21  ;;  %v5599_v2 = vshll.u32 %v9233_v48, %v5519_v21 }
  0xbf   :  { %9368 = vst [vmem:[#allocation22_spill] sm:$0xff] %v5584_v56  ;;  %9369 = vst [vmem:[#allocation23_spill] sm:$0xff] %v5587_v57  ;;  %v5603_v4 = vshrl.u32 %v9236_v52, %v5550_v41  ;;  %v5605_v53 = vshrl.u32 %v1095_v27, 5  ;;  %v1191_v19 = vshrl.u32 %v1190_v45, 23  ;;  %v1295_v6 = vshrl.u32 %v1294_v46, 23 }
  0xc0   :  { %v5607_v8 = vor.u32 %v902_v49, %v901_v60  ;;  %v9247_v11 = vmov 2475754826   ;;  %v9253_v17 = vmov 2131351028   ;;  %v379_v39 = vshrl.u32 %v9239_v58, %v370_v44 }
  0xc1   :  { %v373_v24 = vshrl.u32 %v9247_v11, %v370_v44  ;;  %v376_v3 = vshrl.u32 %v9253_v17, %v370_v44  ;;  %v5614_v5 = vor.u32 %v1006_v54, %v1005_v0  ;;  %v1109_v27 = vshll.u32 %v9239_v58, %v5552_v23 }
  0xc2   :  { %9370 = vst [vmem:[#allocation24_spill] sm:$0xff] %v5607_v8  ;;  %v9371_v45 = vmov 920167782   ;;  %v9243_v49 = vmov 683565275   ;;  %v375_v52 = vshll.u32 %v9247_v11, %v5525_v26  ;;  %v378_v28 = vshll.u32 %v9253_v17, %v5525_v26 }
  0xc3   :  { %v1110_v46 = vshrl.u32 %v9371_v45, %v5584_v56  ;;  %v372_v60 = vshll.u32 %v9243_v49, %v5525_v26  ;;  %v382_v48 = vshrl.u32 %v9371_v45, %v370_v44  ;;  %v5631_v0 = vshll.u32 %v9371_v45, %v5552_v23 }
  0xc4   :  { %v9372_v58 = vmov 1326507024   ;;  %v9373_v49 = vmov 2102212464   ;;  %v4757_v11 = vadd.s32 4294967169, %v1191_v19  ;;  %v377_v15 = vor.u32 %v376_v3, %v375_v52 }
  0xc5   :  { %v5635_v31 = vshrl.u32 %v9372_v58, %v5584_v56  ;;  %v381_v13 = vshll.u32 %v9373_v49, %v5525_v26  ;;  %v374_v38 = vor.u32 %v373_v24, %v372_v60  ;;  %v380_v17 = vor.u32 %v379_v39, %v378_v28 }
  0xc6   :  { %v4761_v22 = vadd.s32 4294967169, %v1295_v6  ;;  %v384_v54 = vshll.u32 %v9371_v45, %v5525_v26  ;;  %v385_v21 = vshrl.u32 %v9372_v58, %v370_v44  ;;  %v5642_v23 = vor.u32 %v1110_v46, %v1109_v27 }
  0xc7   :  { %v383_v35 = vor.u32 %v382_v48, %v381_v13  ;;  %v1398_v41 = vand.u32 2139095040, %v5587_v57  ;;  %v363_v56 = vor.u32 8388608, %v362_v51  ;;  %v9374_v16 = vmov 683565275  }
  0xc8   :  { %v371_v14 = vshrl.u32 %v9374_v16, %v370_v44  ;;  %v386_v36 = vor.u32 %v385_v21, %v384_v54  ;;  %vm387_vm9 = vcmp.lt.s32.totalorder %v5559_v43, 1  ;;  %vm389_vm10 = vcmp.lt.s32.totalorder %v5559_v43, 3 }
  0xc9   :  { %vm390_vm11 = vcmp.lt.s32.totalorder %v5559_v43, 4  ;;  %v395_v13 = vsel %vm387_vm9, %v374_v38, %v377_v15  ;;  %vm388_vm12 = vcmp.lt.s32.totalorder %v5559_v43, 2  ;;  %v399_v44 = vsel %vm387_vm9, %v377_v15, %v380_v17 }
  0xca   :  { %v391_v3 = vsel %vm387_vm9, %v371_v14, %v374_v38  ;;  %v392_v28 = vsel %vm390_vm11, %v380_v17, 2102212464  ;;  %v396_v26 = vsel %vm390_vm11, %v383_v35, 920167782  ;;  %v1197_v21 = vadd.s32 1, %v4757_v11 }
  0xcb   :  { %v393_v39 = vsel %vm389_vm10, %v377_v15, %v392_v28  ;;  %v397_v48 = vsel %vm389_vm10, %v380_v17, %v396_v26  ;;  %v400_v52 = vsel %vm390_vm11, %v386_v36, 1326507024  ;;  %v403_v19 = vshll.u32 %v363_v56, 8 }
  0xcc   :  { %v398_v51 = vsel %vm388_vm12, %v395_v13, %v397_v48  ;;  %v394_v14 = vsel %vm388_vm12, %v391_v3, %v393_v39  ;;  %v401_v38 = vsel %vm389_vm10, %v383_v35, %v400_v52  ;;  %v9271_v24 = vand.u32 2147483647, %v5475_v59 }
  0xcd   :  { %v5659_v27 = vadd.s32 1, %v4761_v22  ;;  %v402_v46 = vsel %vm388_vm12, %v399_v44, %v401_v38  ;;  %v5661_v60 = vmul.u32.u64.low %v403_v19, %v398_v51  ;;  %v5662_v54 = vmul.u32.u64.high %v403_v19, %v398_v51, %v5661_v60 }
  0xce   :  { %v5665_v15 = vshrl.u32 %v1398_v41, 23  ;;  %v5667_v36 = vmul.u32.u64.low %v403_v19, %v402_v46  ;;  %v5668_v56 = vmul.u32.u64.high %v403_v19, %v402_v46, %v5667_v36  ;;  %v674_v11 = vand.u32 8388607, %v9271_v24 }
  0xcf   :  { %vm1198_vm13 = vcmp.gt.s32.totalorder %v1197_v21, 0  ;;  %v410_v43 = vmul.u32 %v403_v19, %v394_v14  ;;  %v684_v35 = vshll.u32 %v9374_v16, %v5511_v10  ;;  %v9375_v22 = vmov 2475754826  }
  0xd0   :  { %v685_v17 = vshrl.u32 %v9375_v22, %v5540_v37  ;;  %v687_v3 = vshll.u32 %v9375_v22, %v5511_v10  ;;  %v9376_v41 = vmov 2131351028   ;;  %v691_v26 = vshrl.u32 %v9373_v49, %v5540_v37 }
  0xd1   :  { %v688_v28 = vshrl.u32 %v9376_v41, %v5540_v37  ;;  %v690_v13 = vshll.u32 %v9376_v41, %v5511_v10  ;;  %vm910_vm14 = vcmp.lt.s32.totalorder %v5569_v47, 4  ;;  %vm1302_vm15 = vcmp.gt.s32.totalorder %v5659_v27, 0 }
  0xd2   :  { %v413_v39 = vadd.s32 1, %v5662_v54  ;;  %v686_v48 = vor.u32 %v685_v17, %v684_v35  ;;  %v693_v44 = vshll.u32 %v9373_v49, %v5511_v10  ;;  %v694_v51 = vshrl.u32 %v9371_v45, %v5540_v37 }
  0xd3   :  { %vm1014_vm0 = vcmp.lt.s32.totalorder %v5573_v50, 4  ;;  %vm412_vm1 = vc.u32 %v5668_v56, %v5661_v60  ;;  %v675_v52 = vor.u32 8388608, %v674_v11  ;;  %v689_v19 = vor.u32 %v688_v28, %v687_v3 }
  0xd4   :  { %v692_v14 = vor.u32 %v691_v26, %v690_v13  ;;  %v414_v38 = vsel %vm412_vm1, %v413_v39, %v5662_v54  ;;  %v695_v46 = vor.u32 %v694_v51, %v693_v44  ;;  %v696_v36 = vshll.u32 %v9371_v45, %v5511_v10 }
  0xd5   :  { %v697_v35 = vshrl.u32 %v9372_v58, %v5540_v37  ;;  %vm1118_vm2 = vcmp.lt.s32.totalorder %v5605_v53, 4  ;;  %v415_v17 = vadd.s32 %v414_v38, %v410_v43  ;;  %v683_v24 = vshrl.u32 %v9374_v16, %v5540_v37 }
  0xd6   :  { %vm699_vm3 = vcmp.lt.s32.totalorder %v5521_v12, 1  ;;  %vm700_vm4 = vcmp.lt.s32.totalorder %v5521_v12, 2  ;;  %vm701_vm5 = vcmp.lt.s32.totalorder %v5521_v12, 3  ;;  %vm702_vm6 = vcmp.lt.s32.totalorder %v5521_v12, 4 }
  0xd7   :  { %v698_v11 = vor.u32 %v697_v35, %v696_v36  ;;  %v707_v54 = vsel %vm699_vm3, %v686_v48, %v689_v19  ;;  %v416_v10 = vadd.s32 536870912, %v415_v17  ;;  %v704_v3 = vsel %vm702_vm6, %v692_v14, 2102212464 }
  0xd8   :  { %v708_v28 = vsel %vm702_vm6, %v695_v46, 920167782  ;;  %v711_v13 = vsel %vm699_vm3, %v689_v19, %v692_v14  ;;  %v703_v26 = vsel %vm699_vm3, %v683_v24, %v686_v48  ;;  %v715_v44 = vshll.u32 %v675_v52, 8 }
  0xd9   :  { %v709_v39 = vsel %vm701_vm5, %v692_v14, %v708_v28  ;;  %v712_v43 = vsel %vm702_vm6, %v698_v11, 1326507024  ;;  %vm357_vm7 = vcmp.lt.s32.totalorder %v5482_v1, 0  ;;  %v417_v37 = vshrl.u32 %v416_v10, 30 }
  0xda   :  { %v705_v51 = vsel %vm701_vm5, %v689_v19, %v704_v3  ;;  %v710_v38 = vsel %vm700_vm4, %v707_v54, %v709_v39  ;;  %v713_v36 = vsel %vm701_vm5, %v695_v46, %v712_v43  ;;  %v1199_v35 = vsel %vm1198_vm13, %v1197_v21, 0 }
  0xdb   :  { %v714_v6 = vsel %vm700_vm4, %v711_v13, %v713_v36  ;;  %v5712_v57 = vmul.u32.u64.low %v715_v44, %v710_v38  ;;  %v5713_v9 = vmul.u32.u64.high %v715_v44, %v710_v38, %v5712_v57  ;;  %v5719_v24 = vsel %vm910_vm14, %v5607_v8, 920167782 }
  0xdc   :  { %9377 = vst [vmem:[#allocation25_spill] sm:$0xff] %v5719_v24  ;;  %v418_v48 = vshll.u32 %v417_v37, 30  ;;  %v5721_v52 = vmul.u32.u64.low %v715_v44, %v714_v6  ;;  %v5722_v19 = vmul.u32.u64.high %v715_v44, %v714_v6, %v5721_v52  ;;  %v9378_v14 = vor.u32 %v5579_v18, %v5593_v61 }
  0xdd   :  { %v5734_v46 = vsel %vm1014_vm0, %v5614_v5, 920167782  ;;  %v9380_v11 = vor.u32 %v5603_v4, %v5599_v2  ;;  %v9381_v6 = vand.u32 2147483647, %v5482_v1  ;;  %v706_v61 = vsel %vm700_vm4, %v703_v26, %v705_v51 }
  0xde   :  { %v5729_v21 = vsel %vm910_vm14, %v9378_v14, 1326507024  ;;  %v5751_v10 = vand.u32 31, %v1199_v35  ;;  %v1303_v3 = vsel %vm1302_vm15, %v5659_v27, 0  ;;  %v4765_v2 = vadd.s32 4294967169, %v5665_v15 }
  0xdf   :  { %9379 = vst [vmem:[#allocation26_spill] sm:$0xff] %v5729_v21  ;;  %v5741_v54 = vsel %vm1014_vm0, %v9380_v11, 1326507024  ;;  %vm5745_vm8 = vcmp.le.f32.partialorder %v9381_v6, 0.7853982  ;;  %v5757_v4 = vsub.s32 %v415_v17, %v418_v48  ;;  %v9385_v13 = vor.u32 %v5635_v31, %v5631_v0 }
  0xe0   :  { %9384 = vst [vmem:[#allocation27_spill] sm:$0xff] %v5751_v10  ;;  %v5762_v28 = vsel %vm1118_vm2, %v5642_v23, 920167782  ;;  %v441_v26 = vsub.s32 4, %v417_v37  ;;  %v725_v39 = vadd.s32 1, %v5713_v9  ;;  %v722_v15 = vmul.u32 %v715_v44, %v706_v61 }
  0xe1   :  { %v5769_v12 = vsel %vm1118_vm2, %v9385_v13, 1326507024  ;;  %v421_v27 = vsub.s32 0, %v5757_v4  ;;  %vm724_vm9 = vc.u32 %v5722_v19, %v5712_v57  ;;  %v9276_v17 = vand.u32 2147483647, %v5485_v7 }
  0xe2   :  { %v5776_v43 = vshrl.u32 %v1199_v35, 5  ;;  %v5778_v51 = vshrl.u32 %v1303_v3, 5  ;;  %v5780_v31 = vand.u32 31, %v1303_v3  ;;  %v726_v0 = vsel %vm724_vm9, %v725_v39, %v5713_v9 }
  0xe3   :  { %v5784_v38 = vsub.s32 32, %v5751_v10  ;;  %v5786_v36 = vadd.s32 1, %v4765_v2  ;;  %v4726_v44 = vmin.u32 %v421_v27, %v5757_v4  ;;  %v727_v48 = vadd.s32 %v726_v0, %v722_v15 }
  0xe4   :  { %9386 = vst [vmem:[#allocation28_spill] sm:$0xff] %v5776_v43  ;;  %v5791_v52 = vshll.u32 %v9373_v49, %v5751_v10  ;;  %v411_v35 = vadd.s32 %v5661_v60, %v5668_v56  ;;  %v442_v14 = vsel %vm357_vm7, %v441_v26, %v417_v37  ;;  %v486_v9 = vshrl.u32 %v9371_v45, %v5565_v34 }
  0xe5   :  { %9387 = vst [vmem:[#allocation29_spill] sm:$0xff] %v5784_v38  ;;  %v423_v11 = vclz %v4726_v44  ;;  %v466_v6 = vand.u32 8388607, %v9276_v17  ;;  %v475_v61 = vshrl.u32 %v9374_v16, %v5565_v34  ;;  %v477_v3 = vshrl.u32 %v9375_v22, %v5565_v34 }
  0xe6   :  { %9388 = vst [vmem:[#allocation30_spill] sm:$0xff] %v5791_v52  ;;  %v728_v2 = vadd.s32 536870912, %v727_v48  ;;  %v480_v60 = vshrl.u32 %v9376_v41, %v5565_v34  ;;  %v483_v56 = vshrl.u32 %v9373_v49, %v5565_v34  ;;  %v485_v37 = vshll.u32 %v9373_v49, %v5529_v30 }
  0xe7   :  { %v4727_v13 = vadd.s32 4294967294, %v423_v11  ;;  %v444_v26 = vsel %vm5745_vm8, 0, %v442_v14  ;;  %v476_v39 = vshll.u32 %v9374_v16, %v5529_v30  ;;  %v489_v27 = vshrl.u32 %v9372_v58, %v5565_v34 }
  0xe8   :  { %v729_v15 = vshrl.u32 %v728_v2, 30  ;;  %v479_v0 = vshll.u32 %v9375_v22, %v5529_v30  ;;  %v482_v44 = vshll.u32 %v9376_v41, %v5529_v30  ;;  %v487_v17 = vor.u32 %v486_v9, %v485_v37 }
  0xe9   :  { %vm4728_vm10 = vcmp.lt.s32.totalorder %v4727_v13, 0  ;;  %vm669_vm11 = vcmp.lt.s32.totalorder %v5475_v59, 0  ;;  %v467_v11 = vor.u32 8388608, %v466_v6  ;;  %v478_v43 = vor.u32 %v477_v3, %v476_v39 }
  0xea   :  { %v488_v14 = vshll.u32 %v9371_v45, %v5529_v30  ;;  %v426_v10 = vsel %vm4728_vm10, 0, %v4727_v13  ;;  %v730_v24 = vshll.u32 %v729_v15, 30  ;;  %v481_v8 = vor.u32 %v480_v60, %v479_v0 }
  0xeb   :  { %v484_v34 = vor.u32 %v483_v56, %v482_v44  ;;  %v427_v2 = vsub.s32 32, %v426_v10  ;;  %v431_v21 = vsub.s32 4294967266, %v426_v10  ;;  %vm494_vm12 = vcmp.lt.s32.totalorder %v5562_v32, 4 }
  0xec   :  { %v490_v47 = vor.u32 %v489_v27, %v488_v14  ;;  %v5825_v52 = vsub.s32 %v727_v48, %v730_v24  ;;  %vm491_vm13 = vcmp.lt.s32.totalorder %v5562_v32, 1  ;;  %vm493_vm15 = vcmp.lt.s32.totalorder %v5562_v32, 3 }
  0xed   :  { %v500_v9 = vsel %vm494_vm12, %v487_v17, 920167782  ;;  %v428_v30 = vshll.u32 %v5757_v4, %v426_v10  ;;  %v429_v6 = vshrl.u32 %v411_v35, %v427_v2  ;;  %v432_v3 = vadd.s32 127, %v431_v21 }
  0xee   :  { %v753_v60 = vsub.s32 4, %v729_v15  ;;  %v733_v56 = vsub.s32 0, %v5825_v52  ;;  %v499_v37 = vsel %vm491_vm13, %v478_v43, %v481_v8  ;;  %v501_v24 = vsel %vm493_vm15, %v484_v34, %v500_v9 }
  0xef   :  { %v503_v48 = vsel %vm491_vm13, %v481_v8, %v484_v34  ;;  %v430_v13 = vor.u32 %v429_v6, %v428_v30  ;;  %v433_v39 = vshll.u32 %v432_v3, 23  ;;  %v496_v27 = vsel %vm494_vm12, %v484_v34, 2102212464 }
  0xf0   :  { %v504_v21 = vsel %vm494_vm12, %v490_v47, 1326507024  ;;  %v448_v10 = vadd.s32 3, %v444_v26  ;;  %v4738_v4 = vmin.u32 %v733_v56, %v5825_v52  ;;  %vm492_vm1 = vcmp.lt.s32.totalorder %v5562_v32, 2 }
  0xf1   :  { %v505_v35 = vsel %vm493_vm15, %v487_v17, %v504_v21  ;;  %v434_v0 = vor.u32 4788187, %v433_v39  ;;  %v502_v44 = vsel %vm492_vm1, %v499_v37, %v501_v24  ;;  %v507_v2 = vshll.u32 %v467_v11, 8 }
  0xf2   :  { %v506_v14 = vsel %vm492_vm1, %v503_v48, %v505_v35  ;;  %v735_v34 = vclz %v4738_v4  ;;  %v754_v47 = vsel %vm669_vm11, %v753_v60, %v729_v15  ;;  %v495_v26 = vsel %vm491_vm13, %v475_v61, %v478_v43 }
  0xf3   :  { %v497_v9 = vsel %vm493_vm15, %v481_v8, %v496_v27  ;;  %v435_v30 = vand.u32 2147483647, %v434_v0  ;;  %v437_v17 = vcvt.s32.f32 %v430_v13  ;;  %v9389_v56 = vand.u32 2147483647, %v5475_v59 }
  0xf4   :  { %v5857_v6 = vmul.u32.u64.low %v507_v2, %v506_v14  ;;  %v5858_v3 = vmul.u32.u64.high %v507_v2, %v506_v14, %v5857_v6  ;;  %v4739_v11 = vadd.s32 4294967294, %v735_v34  ;;  %v5871_v43 = vsub.s32 32, %v5780_v31 }
  0xf5   :  { %vm5862_vm3 = vcmp.le.f32.partialorder %v9389_v56, 0.7853982  ;;  %v5866_v24 = vmul.u32.u64.low %v507_v2, %v502_v44  ;;  %v5867_v15 = vmul.u32.u64.high %v507_v2, %v502_v44, %v5866_v24  ;;  %v438_v8 = vmul.f32 %v437_v17, %v435_v30 }
  0xf6   :  { %v756_v61 = vsel %vm5862_vm3, 0, %v754_v47  ;;  %v771_v60 = vand.u32 2147483647, %v5477_v62  ;;  %v5878_v48 = vshll.u32 %v9373_v49, %v5780_v31  ;;  %v723_v13 = vadd.s32 %v5712_v57, %v5722_v19 }
  0xf7   :  { %vm4740_vm4 = vcmp.lt.s32.totalorder %v4739_v11, 0  ;;  %v498_v39 = vsel %vm492_vm1, %v495_v26, %v497_v9  ;;  %v439_v27 = vxor.u32 2147483648, %v438_v8  ;;  %v5884_v21 = vand.u32 3, %v448_v10 }
  0xf8   :  { %v738_v4 = vsel %vm4740_vm4, 0, %v4739_v11  ;;  %vm516_vm5 = vc.u32 %v5858_v3, %v5866_v24  ;;  %v760_v44 = vadd.s32 3, %v756_v61  ;;  %v517_v14 = vadd.s32 1, %v5867_v15 }
  0xf9   :  { %v739_v35 = vsub.s32 32, %v738_v4  ;;  %v743_v0 = vsub.s32 4294967266, %v738_v4  ;;  %v440_v34 = vsel %vm357_vm7, %v439_v27, %v438_v8  ;;  %v740_v57 = vshll.u32 %v5825_v52, %v738_v4 }
  0xfa   :  { %v514_v19 = vmul.u32 %v507_v2, %v498_v39  ;;  %v5894_v32 = vand.u32 8388607, %v771_v60  ;;  %v443_v10 = vsel %vm5745_vm8, %v5482_v1, %v440_v34  ;;  %v518_v9 = vsel %vm516_vm5, %v517_v14, %v5867_v15 }
  0xfb   :  { %v741_v47 = vshrl.u32 %v723_v13, %v739_v35  ;;  %v744_v26 = vadd.s32 127, %v743_v0  ;;  %5152 = vcosq.f32 %v443_v10  ;;  %v789_v17 = vshrl.u32 %v9375_v22, %v5547_v40 }
  0xfc   :  { %v519_v30 = vadd.s32 %v518_v9, %v514_v19  ;;  %v792_v52 = vshrl.u32 %v9376_v41, %v5547_v40  ;;  %5154 = vsinq.f32 %v443_v10  ;;  %v795_v56 = vshrl.u32 %v9373_v49, %v5547_v40 }
  0xfd   :  { %v742_v2 = vor.u32 %v741_v47, %v740_v57  ;;  %v745_v6 = vshll.u32 %v744_v26, 23  ;;  %v788_v11 = vshll.u32 %v9374_v16, %v5517_v20  ;;  %v797_v15 = vshll.u32 %v9373_v49, %v5517_v20 }
  0xfe   :  { %v520_v18 = vadd.s32 536870912, %v519_v30  ;;  %v798_v8 = vshrl.u32 %v9371_v45, %v5547_v40  ;;  %v791_v13 = vshll.u32 %v9375_v22, %v5517_v20  ;;  %v794_v39 = vshll.u32 %v9376_v41, %v5517_v20 }
  0xff   :  { %v746_v61 = vor.u32 4788187, %v745_v6  ;;  %v801_v27 = vshrl.u32 %v9372_v58, %v5547_v40  ;;  %v790_v35 = vor.u32 %v789_v17, %v788_v11  ;;  %v800_v14 = vshll.u32 %v9371_v45, %v5517_v20 }
 0x100   :  { %v521_v4 = vshrl.u32 %v520_v18, 30  ;;  %v799_v0 = vor.u32 %v798_v8, %v797_v15  ;;  %vm451_vm6 = vcmp.eq.s32.totalorder %v5884_v21, 0  ;;  %vm454_vm7 = vcmp.eq.s32.totalorder %v5884_v21, 2 }
 0x101   :  { %v747_v34 = vand.u32 2147483647, %v746_v61  ;;  %v749_v57 = vcvt.s32.f32 %v742_v2  ;;  %v793_v19 = vor.u32 %v792_v52, %v791_v13  ;;  %v796_v10 = vor.u32 %v795_v56, %v794_v39 }
 0x102   :  { %v5922_v47 = vand.u32 3, %v760_v44  ;;  %vm461_vm8 = vcmp.lt.s32.totalorder %v5485_v7, 0  ;;  %v522_v26 = vshll.u32 %v521_v4, 30  ;;  %v802_v9 = vor.u32 %v801_v27, %v800_v14 }
 0x103   :  { %vm806_vm9 = vcmp.lt.s32.totalorder %v5527_v29, 4  ;;  %v750_v17 = vmul.f32 %v749_v57, %v747_v34  ;;  %v779_v6 = vor.u32 8388608, %v5894_v32  ;;  %v787_v20 = vshrl.u32 %v9374_v16, %v5547_v40 }
 0x104   :  { %v812_v18 = vsel %vm806_vm9, %v799_v0, 920167782  ;;  %v5931_v2 = vsub.s32 %v519_v30, %v522_v26  ;;  %vm803_vm10 = vcmp.lt.s32.totalorder %v5527_v29, 1  ;;  %vm804_vm12 = vcmp.lt.s32.totalorder %v5527_v29, 2 }
 0x105   :  { %vm805_vm13 = vcmp.lt.s32.totalorder %v5527_v29, 3  ;;  %v751_v44 = vxor.u32 2147483648, %v750_v17  ;;  %v545_v52 = vsub.s32 4, %v521_v4  ;;  %v808_v56 = vsel %vm806_vm9, %v796_v10, 2102212464  ;;  %v5153_v11 = vpop.eup %5152 }
 0x106   :  { %v811_v32 = vsel %vm803_vm10, %v790_v35, %v793_v19  ;;  %v525_v40 = vsub.s32 0, %v5931_v2  ;;  %v813_v15 = vsel %vm805_vm13, %v796_v10, %v812_v18  ;;  %v815_v30 = vsel %vm803_vm10, %v793_v19, %v796_v10  ;;  %v5155_v61 = vpop.eup %5154 }
 0x107   :  { %v816_v8 = vsel %vm806_vm9, %v802_v9, 1326507024  ;;  %v455_v13 = vxor.u32 2147483648, %v5153_v11  ;;  %v752_v39 = vsel %vm669_vm11, %v751_v44, %v750_v17  ;;  %v807_v27 = vsel %vm803_vm10, %v787_v20, %v790_v35 }
 0x108   :  { %v817_v14 = vsel %vm805_vm13, %v799_v0, %v816_v8  ;;  %v452_v34 = vxor.u32 2147483648, %v5155_v61  ;;  %v755_v57 = vsel %vm5862_vm3, %v5475_v59, %v752_v39  ;;  %v4730_v26 = vmin.u32 %v525_v40, %v5931_v2 }
 0x109   :  { %v809_v10 = vsel %vm805_vm13, %v793_v19, %v808_v56  ;;  %5156 = vcosq.f32 %v755_v57  ;;  %v814_v9 = vsel %vm804_vm12, %v811_v32, %v813_v15  ;;  %v818_v35 = vsel %vm804_vm12, %v815_v30, %v817_v14 }
 0x10a   :  { %v819_v17 = vshll.u32 %v779_v6, 8  ;;  %v453_v0 = vsel %vm451_vm6, %v5153_v11, %v452_v34  ;;  %v456_v37 = vsel %vm454_vm7, %v455_v13, %v5155_v61  ;;  %5158 = vsinq.f32 %v755_v57 }
 0x10b   :  { %v527_v20 = vclz %v4730_v26  ;;  %v5963_v18 = vshrl.u32 %v9371_v45, %v5871_v43  ;;  %v5967_v19 = vshll.u32 %v9371_v45, %v5780_v31  ;;  %vm450_vm11 = vcmp.lt.s32.totalorder %v5884_v21, 2 }
 0x10c   :  { %v5972_v6 = vsel %vm461_vm8, %v545_v52, %v521_v4  ;;  %v810_v56 = vsel %vm804_vm12, %v807_v27, %v809_v10  ;;  %v5976_v32 = vmul.u32.u64.low %v819_v17, %v818_v35  ;;  %v5977_v11 = vmul.u32.u64.high %v819_v17, %v818_v35, %v5976_v32 }
 0x10d   :  { %v4731_v44 = vadd.s32 4294967294, %v527_v20  ;;  %v457_v40 = vsel %vm450_vm11, %v453_v0, %v456_v37  ;;  %v5979_v15 = vmul.u32.u64.low %v819_v17, %v814_v9  ;;  %v5980_v30 = vmul.u32.u64.high %v819_v17, %v814_v9, %v5979_v15 }
 0x10e   :  { %v9284_v8 = vand.u32 2147483647, %v5479_v63  ;;  %vm447_vm15 = vweird.f32 %v5482_v1  ;;  %vm763_vm1 = vcmp.eq.s32.totalorder %v5922_v47, 0  ;;  %v9392_v21 = vand.u32 2147483647, %v5485_v7 }
 0x10f   :  { %vm4732_vm4 = vcmp.lt.s32.totalorder %v4731_v44, 0  ;;  %vm762_vm5 = vcmp.lt.s32.totalorder %v5922_v47, 2  ;;  %vm766_vm6 = vcmp.eq.s32.totalorder %v5922_v47, 2  ;;  %v515_v29 = vadd.s32 %v5866_v24, %v5858_v3 }
 0x110   :  { %vm5988_vm3 = vcmp.le.f32.partialorder %v9392_v21, 0.7853982  ;;  %v530_v52 = vsel %vm4732_vm4, 0, %v4731_v44  ;;  %v458_v61 = vsel %vm447_vm15, nan, %v457_v40  ;;  %vm759_vm7 = vweird.f32 %v5475_v59 }
 0x111   :  { %v548_v1 = vsel %vm5988_vm3, 0, %v5972_v6  ;;  %v531_v13 = vsub.s32 32, %v530_v52  ;;  %v535_v39 = vsub.s32 4294967266, %v530_v52  ;;  %v826_v27 = vmul.u32 %v819_v17, %v810_v56 }
 0x112   :  { %vm828_vm9 = vc.u32 %v5977_v11, %v5979_v15  ;;  %v829_v14 = vadd.s32 1, %v5980_v30  ;;  %v6005_v34 = vand.u32 8388607, %v9284_v8  ;;  %v269_v3 = vshrl.u32 %v9375_v22, %v5557_v33 }
 0x113   :  { %v532_v24 = vshll.u32 %v5931_v2, %v530_v52  ;;  %v533_v57 = vshrl.u32 %v515_v29, %v531_v13  ;;  %v536_v26 = vadd.s32 127, %v535_v39  ;;  %v268_v10 = vshll.u32 %v9374_v16, %v5523_v25  ;;  %v5157_v9 = vpop.eup %5156 }
 0x114   :  { %v830_v35 = vsel %vm828_vm9, %v829_v14, %v5980_v30  ;;  %v271_v17 = vshll.u32 %v9375_v22, %v5523_v25  ;;  %v272_v0 = vshrl.u32 %v9376_v41, %v5557_v33  ;;  %v278_v37 = vshrl.u32 %v9371_v45, %v5557_v33  ;;  %v5159_v20 = vpop.eup %5158 }
 0x115   :  { %v767_v6 = vxor.u32 2147483648, %v5157_v9  ;;  %v534_v2 = vor.u32 %v533_v57, %v532_v24  ;;  %v537_v44 = vshll.u32 %v536_v26, 23  ;;  %v831_v56 = vadd.s32 %v830_v35, %v826_v27 }
 0x116   :  { %v764_v32 = vxor.u32 2147483648, %v5159_v20  ;;  %v270_v40 = vor.u32 %v269_v3, %v268_v10  ;;  %v275_v21 = vshrl.u32 %v9373_v49, %v5557_v33  ;;  %v277_v30 = vshll.u32 %v9373_v49, %v5523_v25 }
 0x117   :  { %vm1406_vm10 = vcmp.gt.s32.totalorder %v5786_v36, 0  ;;  %v768_v29 = vsel %vm766_vm6, %v767_v6, %v5159_v20  ;;  %v538_v52 = vor.u32 4788187, %v537_v44  ;;  %v832_v13 = vadd.s32 536870912, %v831_v56 }
 0x118   :  { %v274_v39 = vshll.u32 %v9376_v41, %v5523_v25  ;;  %v765_v27 = vsel %vm763_vm1, %v5157_v9, %v764_v32  ;;  %v279_v14 = vor.u32 %v278_v37, %v277_v30  ;;  %v280_v3 = vshll.u32 %v9371_v45, %v5523_v25 }
 0x119   :  { %v281_v24 = vshrl.u32 %v9372_v58, %v5557_v33  ;;  %v769_v57 = vsel %vm762_vm5, %v765_v27, %v768_v29  ;;  %v539_v26 = vand.u32 2147483647, %v538_v52  ;;  %v541_v10 = vcvt.s32.f32 %v534_v2 }
 0x11a   :  { %vm773_vm12 = vcmp.lt.s32.totalorder %v5477_v62, 0  ;;  %v833_v35 = vshrl.u32 %v832_v13, 30  ;;  %v770_v20 = vsel %vm759_vm7, nan, %v769_v57  ;;  %v273_v6 = vor.u32 %v272_v0, %v271_v17 }
 0x11b   :  { %v276_v9 = vor.u32 %v275_v21, %v274_v39  ;;  %v282_v37 = vor.u32 %v281_v24, %v280_v3  ;;  %v4943_v44 = vpack.c.bf16 %v770_v20, %v458_v61  ;;  %v542_v32 = vmul.f32 %v541_v10, %v539_v26 }
 0x11c   :  { %v834_v25 = vshll.u32 %v833_v35, 30  ;;  %vm286_vm13 = vcmp.lt.s32.totalorder %v5554_v42, 4  ;;  %v552_v30 = vadd.s32 3, %v548_v1  ;;  %v259_v47 = vor.u32 8388608, %v6005_v34 }
 0x11d   :  { %vm283_vm11 = vcmp.lt.s32.totalorder %v5554_v42, 1  ;;  %v292_v2 = vsel %vm286_vm13, %v279_v14, 920167782  ;;  %4944 = vmatprep.subr.bf16.mxu0 %v4943_v44  ;;  %v543_v29 = vxor.u32 2147483648, %v542_v32  ;;  %v857_v17 = vsub.s32 4, %v833_v35 }
 0x11e   :  { %v6044_v59 = vsub.s32 %v831_v56, %v834_v25  ;;  %vm285_vm15 = vcmp.lt.s32.totalorder %v5554_v42, 3  ;;  %v291_v61 = vsel %vm283_vm11, %v270_v40, %v273_v6  ;;  %v295_v34 = vsel %vm283_vm11, %v273_v6, %v276_v9 }
 0x11f   :  { %v293_v1 = vsel %vm285_vm15, %v276_v9, %v292_v2  ;;  %v296_v0 = vsel %vm286_vm13, %v282_v37, 1326507024  ;;  %v544_v21 = vsel %vm461_vm8, %v543_v29, %v542_v32  ;;  %v267_v52 = vshrl.u32 %v9374_v16, %v5557_v33 }
 0x120   :  { %v837_v56 = vsub.s32 0, %v6044_v59  ;;  %vm284_vm1 = vcmp.lt.s32.totalorder %v5554_v42, 2  ;;  %v547_v13 = vsel %vm5988_vm3, %v5485_v7, %v544_v21  ;;  %v288_v39 = vsel %vm286_vm13, %v276_v9, 2102212464 }
 0x121   :  { %v297_v27 = vsel %vm285_vm15, %v279_v14, %v296_v0  ;;  %v299_v3 = vshll.u32 %v259_v47, 8  ;;  %5160 = vcosq.f32 %v547_v13  ;;  %v294_v57 = vsel %vm284_vm1, %v291_v61, %v293_v1 }
 0x122   :  { %v4742_v24 = vmin.u32 %v837_v56, %v6044_v59  ;;  %v298_v33 = vsel %vm284_vm1, %v295_v34, %v297_v27  ;;  %v1407_v4 = vsel %vm1406_vm10, %v5786_v36, 0  ;;  %v858_v26 = vsel %vm773_vm12, %v857_v17, %v833_v35 }
 0x123   :  { %v6078_v10 = vmul.u32.u64.low %v299_v3, %v298_v33  ;;  %v6079_v20 = vmul.u32.u64.high %v299_v3, %v298_v33, %v6078_v10  ;;  %5162 = vsinq.f32 %v547_v13  ;;  %v287_v9 = vsel %vm283_vm11, %v267_v52, %v270_v40  ;;  %v9400_v13 = vld [vmem:[#allocation17_spill] sm:$0xff] }
 0x124   :  { %v839_v14 = vclz %v4742_v24  ;;  %v289_v37 = vsel %vm285_vm15, %v273_v6, %v288_v39  ;;  %v6087_v44 = vshrl.u32 %v9371_v45, %v5784_v38  ;;  %vm6091_vm8 = vcmp.le.f32.partialorder %v771_v60, 0.7853982 }
 0x125   :  { %v6095_v35 = vmul.u32.u64.low %v299_v3, %v294_v57  ;;  %v6096_v32 = vmul.u32.u64.high %v299_v3, %v294_v57, %v6095_v35  ;;  %v6101_v40 = vshrl.u32 %v9372_v58, %v5784_v38  ;;  %v6103_v25 = vand.u32 3, %v552_v30 }
 0x126   :  { %9395 = vst [vmem:[#allocation31_spill] sm:$0xff] %v6087_v44  ;;  %v4743_v6 = vadd.s32 4294967294, %v839_v14  ;;  %v860_v47 = vsel %vm6091_vm8, 0, %v858_v26  ;;  %v6109_v60 = vshrl.u32 %v9372_v58, %v5871_v43  ;;  %v6111_v2 = vshrl.u32 %v1407_v4, 5  ;;  %v9401_v44 = vld [vmem:[#allocation13_spill] sm:$0xff] }
 0x127   :  { %9398 = vst [vmem:[#allocation32_spill] sm:$0xff] %v6101_v40  ;;  %v6113_v29 = vand.u32 31, %v1407_v4  ;;  %v290_v17 = vsel %vm284_vm1, %v287_v9, %v289_v37  ;;  %v6119_v61 = vor.u32 %v5963_v18, %v5878_v48  ;;  %v827_v30 = vadd.s32 %v5979_v15, %v5977_v11  ;;  %v9399_v18 = vld [vmem:[#allocation11_spill] sm:$0xff] }
 0x128   :  { %vm4744_vm3 = vcmp.lt.s32.totalorder %v4743_v6, 0  ;;  %vm308_vm4 = vc.u32 %v6079_v20, %v6095_v35  ;;  %v6125_v34 = vadd.s32 3, %v860_v47  ;;  %v309_v0 = vadd.s32 1, %v6096_v32 }
 0x129   :  { %v842_v1 = vsel %vm4744_vm3, 0, %v4743_v6  ;;  %v9283_v21 = vand.u32 2147483647, %v5473_v55  ;;  %vm558_vm5 = vcmp.eq.s32.totalorder %v6103_v25, 2  ;;  %v306_v48 = vmul.u32 %v299_v3, %v290_v17 }
 0x12a   :  { %v843_v42 = vsub.s32 32, %v842_v1  ;;  %v847_v56 = vsub.s32 4294967266, %v842_v1  ;;  %v580_v52 = vshll.u32 %v9374_v16, %v9399_v18  ;;  %v844_v11 = vshll.u32 %v6044_v59, %v842_v1 }
 0x12b   :  { %v310_v15 = vsel %vm308_vm4, %v309_v0, %v6096_v32  ;;  %v581_v39 = vshrl.u32 %v9375_v22, %v9400_v13  ;;  %v590_v27 = vshrl.u32 %v9371_v45, %v9400_v13  ;;  %v5161_v24 = vpop.eup %5160  ;;  %v587_v3 = vshrl.u32 %v9373_v49, %v9400_v13 }
 0x12c   :  { %v845_v57 = vshrl.u32 %v827_v30, %v843_v42  ;;  %v848_v33 = vadd.s32 127, %v847_v56  ;;  %v311_v4 = vadd.s32 %v310_v15, %v306_v48  ;;  %vm555_vm6 = vcmp.eq.s32.totalorder %v6103_v25, 0 }
 0x12d   :  { %v570_v59 = vand.u32 8388607, %v9283_v21  ;;  %v584_v26 = vshrl.u32 %v9376_v41, %v9400_v13  ;;  %v589_v10 = vshll.u32 %v9373_v49, %v9399_v18  ;;  %v593_v14 = vshrl.u32 %v9372_v58, %v9400_v13  ;;  %v5163_v9 = vpop.eup %5162 }
 0x12e   :  { %v846_v37 = vor.u32 %v845_v57, %v844_v11  ;;  %v849_v32 = vshll.u32 %v848_v33, 23  ;;  %v312_v6 = vadd.s32 536870912, %v311_v4  ;;  %v586_v47 = vshll.u32 %v9376_v41, %v9399_v18 }
 0x12f   :  { %v559_v17 = vxor.u32 2147483648, %v5161_v24  ;;  %v583_v30 = vshll.u32 %v9375_v22, %v9399_v18  ;;  %v591_v1 = vor.u32 %v590_v27, %v589_v10  ;;  %v592_v0 = vshll.u32 %v9371_v45, %v9399_v18 }
 0x130   :  { %v850_v42 = vor.u32 4788187, %v849_v32  ;;  %v6155_v56 = vshrl.u32 %v312_v6, 30  ;;  %v579_v48 = vshrl.u32 %v9374_v16, %v9400_v13  ;;  %v588_v11 = vor.u32 %v587_v3, %v586_v47 }
 0x131   :  { %v556_v15 = vxor.u32 2147483648, %v5163_v9  ;;  %v582_v57 = vor.u32 %v581_v39, %v580_v52  ;;  %v585_v33 = vor.u32 %v584_v26, %v583_v30  ;;  %v594_v21 = vor.u32 %v593_v14, %v592_v0 }
 0x132   :  { %v851_v8 = vand.u32 2147483647, %v850_v42  ;;  %v853_v38 = vcvt.s32.f32 %v846_v37  ;;  %v314_v40 = vshll.u32 %v6155_v56, 30  ;;  %vm598_vm7 = vcmp.lt.s32.totalorder %v9401_v44, 4 }
 0x133   :  { %v560_v18 = vsel %vm558_vm5, %v559_v17, %v5163_v9  ;;  %v571_v27 = vor.u32 8388608, %v570_v59  ;;  %vm595_vm9 = vcmp.lt.s32.totalorder %v9401_v44, 1  ;;  %v604_v10 = vsel %vm598_vm7, %v591_v1, 920167782 }
 0x134   :  { %v854_v32 = vmul.f32 %v853_v38, %v851_v8  ;;  %v6164_v13 = vsub.s32 %v311_v4, %v314_v40  ;;  %vm597_vm10 = vcmp.lt.s32.totalorder %v9401_v44, 3  ;;  %v600_v52 = vsel %vm598_vm7, %v588_v11, 2102212464 }
 0x135   :  { %v603_v39 = vsel %vm595_vm9, %v582_v57, %v585_v33  ;;  %v605_v3 = vsel %vm597_vm10, %v588_v11, %v604_v10  ;;  %v607_v26 = vsel %vm595_vm9, %v585_v33, %v588_v11  ;;  %v608_v14 = vsel %vm598_vm7, %v594_v21, 1326507024 }
 0x136   :  { %v557_v37 = vsel %vm555_vm6, %v5161_v24, %v556_v15  ;;  %v855_v6 = vxor.u32 2147483648, %v854_v32  ;;  %v317_v9 = vsub.s32 0, %v6164_v13  ;;  %vm596_vm13 = vcmp.lt.s32.totalorder %v9401_v44, 2 }
 0x137   :  { %v599_v59 = vsel %vm595_vm9, %v579_v48, %v582_v57  ;;  %v601_v47 = vsel %vm597_vm10, %v585_v33, %v600_v52  ;;  %v609_v38 = vsel %vm597_vm10, %v591_v1, %v608_v14  ;;  %v611_v8 = vshll.u32 %v571_v27, 8  ;;  %v9402_v33 = vld [vmem:[#allocation9_spill] sm:$0xff] }
 0x138   :  { %v856_v40 = vsel %vm773_vm12, %v855_v6, %v854_v32  ;;  %v4722_v4 = vmin.u32 %v317_v9, %v6164_v13  ;;  %v606_v21 = vsel %vm596_vm13, %v603_v39, %v605_v3  ;;  %v610_v24 = vsel %vm596_vm13, %v607_v26, %v609_v38  ;;  %v9404_v26 = vld [vmem:[#allocation14_spill] sm:$0xff] }
 0x139   :  { %vm554_vm11 = vcmp.lt.s32.totalorder %v6103_v25, 2  ;;  %v859_v17 = vsel %vm6091_vm8, %v5477_v62, %v856_v40  ;;  %v6182_v30 = vmul.u32.u64.low %v611_v8, %v610_v24  ;;  %v6183_v1 = vmul.u32.u64.high %v611_v8, %v610_v24, %v6182_v30 }
 0x13a   :  { %v561_v0 = vsel %vm554_vm11, %v557_v37, %v560_v18  ;;  %5164 = vcosq.f32 %v859_v17  ;;  %v6186_v42 = vand.u32 3, %v6125_v34  ;;  %v319_v48 = vclz %v4722_v4 }
 0x13b   :  { %5166 = vsinq.f32 %v859_v17  ;;  %v602_v11 = vsel %vm596_vm13, %v599_v59, %v601_v47  ;;  %v6190_v15 = vmul.u32.u64.low %v611_v8, %v606_v21  ;;  %v6191_v57 = vmul.u32.u64.high %v611_v8, %v606_v21, %v6190_v15 }
 0x13c   :  { %v1322_v36 = vor.u32 %v6109_v60, %v5967_v19  ;;  %vm551_vm12 = vweird.f32 %v5485_v7  ;;  %v4723_v25 = vadd.s32 4294967294, %v319_v48  ;;  %v979_v18 = vand.u32 2147483647, %v9402_v33  ;;  %v9403_v7 = vld [vmem:[#allocation19_spill] sm:$0xff] }
 0x13d   :  { %v6199_v34 = vsub.s32 32, %v6113_v29  ;;  %v6203_v27 = vshll.u32 %v9373_v49, %v6113_v29  ;;  %v6205_v44 = vsel %vm551_vm12, nan, %v561_v0  ;;  %v307_v10 = vadd.s32 %v6095_v35, %v6079_v20 }
 0x13e   :  { %vm870_vm15 = vcmp.eq.s32.totalorder %v6186_v42, 2  ;;  %vm4724_vm1 = vcmp.lt.s32.totalorder %v4723_v25, 0  ;;  %v618_v32 = vmul.u32 %v611_v8, %v602_v11  ;;  %vm620_vm8 = vc.u32 %v6183_v1, %v6190_v15 }
 0x13f   :  { %v997_v52 = vshrl.u32 %v9375_v22, %v9403_v7  ;;  %vm867_vm3 = vcmp.eq.s32.totalorder %v6186_v42, 0  ;;  %v322_v39 = vsel %vm4724_vm1, 0, %v4723_v25  ;;  %v621_v3 = vadd.s32 1, %v6191_v57 }
 0x140   :  { %v999_v14 = vshll.u32 %v9375_v22, %v9404_v26  ;;  %v1000_v20 = vshrl.u32 %v9376_v41, %v9403_v7  ;;  %vm866_vm4 = vcmp.lt.s32.totalorder %v6186_v42, 2  ;;  %v323_v35 = vsub.s32 32, %v322_v39 }
 0x141   :  { %v327_v37 = vsub.s32 4294967266, %v322_v39  ;;  %v986_v6 = vand.u32 8388607, %v979_v18  ;;  %v996_v9 = vshll.u32 %v9374_v16, %v9404_v26  ;;  %vm863_vm5 = vweird.f32 %v5477_v62 }
 0x142   :  { %v622_v59 = vsel %vm620_vm8, %v621_v3, %v6191_v57  ;;  %v1001_v47 = vor.u32 %v1000_v20, %v999_v14  ;;  %v1002_v38 = vshll.u32 %v9376_v41, %v9404_v26  ;;  %v1003_v8 = vshrl.u32 %v9373_v49, %v9403_v7 }
 0x143   :  { %vm253_vm6 = vcmp.lt.s32.totalorder %v5479_v63, 0  ;;  %v324_v40 = vshll.u32 %v6164_v13, %v322_v39  ;;  %v325_v4 = vshrl.u32 %v307_v10, %v323_v35  ;;  %v328_v21 = vadd.s32 127, %v327_v37 }
 0x144   :  { %v623_v24 = vadd.s32 %v622_v59, %v618_v32  ;;  %v337_v17 = vsub.s32 4, %v6155_v56  ;;  %v998_v30 = vor.u32 %v997_v52, %v996_v9  ;;  %v1004_v0 = vor.u32 %v1003_v8, %v1002_v38  ;;  %v5165_v48 = vpop.eup %5164 }
 0x145   :  { %vm1011_vm7 = vcmp.lt.s32.totalorder %v5573_v50, 1  ;;  %vm1326_vm9 = vcmp.lt.s32.totalorder %v5778_v51, 4  ;;  %v326_v11 = vor.u32 %v325_v4, %v324_v40  ;;  %v329_v57 = vshll.u32 %v328_v21, 23  ;;  %v5167_v3 = vpop.eup %5166 }
 0x146   :  { %v624_v25 = vadd.s32 536870912, %v623_v24  ;;  %vm1013_vm10 = vcmp.lt.s32.totalorder %v5573_v50, 3  ;;  %v871_v26 = vxor.u32 2147483648, %v5165_v48  ;;  %v987_v13 = vor.u32 8388608, %v986_v6 }
 0x147   :  { %v1023_v10 = vsel %vm1011_vm7, %v1001_v47, %v1004_v0  ;;  %v1025_v32 = vsel %vm1013_vm10, %v5614_v5, %v5741_v54  ;;  %v868_v52 = vxor.u32 2147483648, %v5167_v3  ;;  %v330_v39 = vor.u32 4788187, %v329_v57 }
 0x148   :  { %v6243_v14 = vshrl.u32 %v624_v25, 30  ;;  %vm1012_vm13 = vcmp.lt.s32.totalorder %v5573_v50, 2  ;;  %v872_v20 = vsel %vm870_vm15, %v871_v26, %v5167_v3  ;;  %v333_v35 = vcvt.s32.f32 %v326_v11 }
 0x149   :  { %v1019_v37 = vsel %vm1011_vm7, %v998_v30, %v1001_v47  ;;  %v1021_v6 = vsel %vm1013_vm10, %v1004_v0, %v5734_v46  ;;  %v869_v5 = vsel %vm867_vm3, %v5165_v48, %v868_v52  ;;  %v331_v54 = vand.u32 2147483647, %v330_v39 }
 0x14a   :  { %v626_v9 = vshll.u32 %v6243_v14, 30  ;;  %v1026_v59 = vsel %vm1012_vm13, %v1023_v10, %v1025_v32  ;;  %v873_v38 = vsel %vm866_vm4, %v869_v5, %v872_v20  ;;  %v995_v8 = vshrl.u32 %v9374_v16, %v9403_v7  ;;  %v9408_v20 = vld [vmem:[#allocation16_spill] sm:$0xff] }
 0x14b   :  { %v1016_v40 = vsel %vm1014_vm0, %v1004_v0, 2102212464  ;;  %v1027_v4 = vshll.u32 %v987_v13, 8  ;;  %v874_v46 = vsel %vm863_vm5, nan, %v873_v38  ;;  %v334_v21 = vmul.f32 %v333_v35, %v331_v54 }
 0x14c   :  { %v6266_v48 = vsub.s32 %v623_v24, %v626_v9  ;;  %v1022_v11 = vsel %vm1012_vm13, %v1019_v37, %v1021_v6  ;;  %v4951_v57 = vpack.c.bf16 %v874_v46, %v6205_v44  ;;  %v338_v42 = vsel %vm253_vm6, %v337_v17, %v6155_v56 }
 0x14d   :  { %v6274_v7 = vmul.u32.u64.low %v1027_v4, %v1026_v59  ;;  %v6275_v25 = vmul.u32.u64.high %v1027_v4, %v1026_v59, %v6274_v7  ;;  %v335_v0 = vxor.u32 2147483648, %v334_v21  ;;  %v1015_v62 = vsel %vm1011_vm7, %v995_v8, %v998_v30 }
 0x14e   :  { %v629_v3 = vsub.s32 0, %v6266_v48  ;;  %v1017_v24 = vsel %vm1013_vm10, %v1001_v47, %v1016_v40  ;;  %v1332_v44 = vsel %vm1326_vm9, %v6119_v61, 920167782  ;;  %4952 = vmatprep.subr.bf16.mxu1 %v4951_v57  ;;  %v9405_v26 = vand.u32 2147483647, %v5479_v63 }
 0x14f   :  { %v6291_v17 = vmul.u32.u64.low %v1027_v4, %v1022_v11  ;;  %v6292_v13 = vmul.u32.u64.high %v1027_v4, %v1022_v11, %v6291_v17  ;;  %v1336_v47 = vsel %vm1326_vm9, %v1322_v36, 1326507024  ;;  %v336_v30 = vsel %vm253_vm6, %v335_v0, %v334_v21  ;;  %4954 = vmatpush3.bf16.msra.mxu1 %v4951_v57 }
 0x150   :  { %vm6287_vm0 = vcmp.le.f32.partialorder %v9405_v26, 0.7853982  ;;  %v4734_v32 = vmin.u32 %v629_v3, %v6266_v48  ;;  %v6307_v52 = vshrl.u32 %v9371_v45, %v6199_v34  ;;  %v6311_v39 = vshll.u32 %v9371_v45, %v6113_v29 }
 0x151   :  { %v340_v10 = vsel %vm6287_vm0, 0, %v338_v42  ;;  %v339_v19 = vsel %vm6287_vm0, %v5479_v63, %v336_v30  ;;  %v1018_v60 = vsel %vm1012_vm13, %v1015_v62, %v1017_v24  ;;  %vm1036_vm11 = vc.u32 %v6275_v25, %v6291_v17 }
 0x152   :  { %5168 = vcosq.f32 %v339_v19  ;;  %v631_v36 = vclz %v4734_v32  ;;  %v1291_v35 = vand.u32 2147483647, %v9408_v20  ;;  %v344_v37 = vadd.s32 3, %v340_v10 }
 0x153   :  { %5170 = vsinq.f32 %v339_v19  ;;  %vm565_vm12 = vcmp.lt.s32.totalorder %v5473_v55, 0  ;;  %v1037_v6 = vadd.s32 1, %v6292_v13  ;;  %v9409_v5 = vand.u32 2147483647, %v5473_v55 }
 0x154   :  { %v4735_v50 = vadd.s32 4294967294, %v631_v36  ;;  %v649_v9 = vsub.s32 4, %v6243_v14  ;;  %v1034_v59 = vmul.u32 %v1027_v4, %v1018_v60  ;;  %v1309_v38 = vshrl.u32 %v9375_v22, %v5871_v43 }
 0x155   :  { %vm6325_vm15 = vcmp.le.f32.partialorder %v9409_v5, 0.7853982  ;;  %v1038_v8 = vsel %vm1036_vm11, %v1037_v6, %v6292_v13  ;;  %v1308_v40 = vshll.u32 %v9374_v16, %v5780_v31  ;;  %v1311_v46 = vshll.u32 %v9375_v22, %v5780_v31 }
 0x156   :  { %v1312_v21 = vshrl.u32 %v9376_v41, %v5871_v43  ;;  %vm4736_vm1 = vcmp.lt.s32.totalorder %v4735_v50, 0  ;;  %v1039_v11 = vadd.s32 %v1038_v8, %v1034_v59  ;;  %v1298_v57 = vand.u32 8388607, %v1291_v35 }
 0x157   :  { %v1315_v4 = vshrl.u32 %v9373_v49, %v5871_v43  ;;  %v634_v42 = vsel %vm4736_vm1, 0, %v4735_v50  ;;  %v1310_v7 = vor.u32 %v1309_v38, %v1308_v40  ;;  %v1314_v3 = vshll.u32 %v9376_v41, %v5780_v31 }
 0x158   :  { %v1313_v0 = vor.u32 %v1312_v21, %v1311_v46  ;;  %v619_v62 = vadd.s32 %v6190_v15, %v6183_v1  ;;  %v635_v24 = vsub.s32 32, %v634_v42  ;;  %v639_v26 = vsub.s32 4294967266, %v634_v42 }
 0x159   :  { %v1040_v56 = vadd.s32 536870912, %v1039_v11  ;;  %v636_v13 = vshll.u32 %v6266_v48, %v634_v42  ;;  %v650_v30 = vsel %vm565_vm12, %v649_v9, %v6243_v14  ;;  %v1316_v10 = vor.u32 %v1315_v4, %v1314_v3 }
 0x15a   :  { %vm1323_vm8 = vcmp.lt.s32.totalorder %v5778_v51, 1  ;;  %v637_v32 = vshrl.u32 %v619_v62, %v635_v24  ;;  %v640_v19 = vadd.s32 127, %v639_v26  ;;  %vm1325_vm3 = vcmp.lt.s32.totalorder %v5778_v51, 3 }
 0x15b   :  { %v6352_v60 = vshrl.u32 %v1040_v56, 30  ;;  %v1299_v31 = vor.u32 8388608, %v1298_v57  ;;  %v1331_v1 = vsel %vm1323_vm8, %v1310_v7, %v1313_v0  ;;  %v1335_v15 = vsel %vm1323_vm8, %v1313_v0, %v1316_v10 }
 0x15c   :  { %v1337_v14 = vsel %vm1325_vm3, %v6119_v61, %v1336_v47  ;;  %v5169_v48 = vpop.eup %5168  ;;  %v638_v36 = vor.u32 %v637_v32, %v636_v13  ;;  %v641_v6 = vshll.u32 %v640_v19, 23  ;;  %v1333_v50 = vsel %vm1325_vm3, %v1316_v10, %v1332_v44 }
 0x15d   :  { %v1042_v5 = vshll.u32 %v6352_v60, 30  ;;  %v5171_v9 = vpop.eup %5170  ;;  %v6367_v59 = vshrl.u32 %v9372_v58, %v6199_v34  ;;  %v345_v38 = vand.u32 3, %v344_v37  ;;  %v652_v8 = vsel %vm6325_vm15, 0, %v650_v30 }
 0x15e   :  { %vm1324_vm4 = vcmp.lt.s32.totalorder %v5778_v51, 2  ;;  %v642_v61 = vor.u32 4788187, %v641_v6  ;;  %v1307_v40 = vshrl.u32 %v9374_v16, %v5871_v43  ;;  %v351_v46 = vxor.u32 2147483648, %v5169_v48 }
 0x15f   :  { %v6372_v47 = vsub.s32 %v1039_v11, %v1042_v5  ;;  %v1338_v44 = vsel %vm1324_vm4, %v1335_v15, %v1337_v14  ;;  %v1328_v21 = vsel %vm1326_vm9, %v1316_v10, 2102212464  ;;  %v1334_v37 = vsel %vm1324_vm4, %v1331_v1, %v1333_v50  ;;  %v9412_v14 = vld [vmem:[#allocation10_spill] sm:$0xff] }
 0x160   :  { %v1339_v57 = vshll.u32 %v1299_v31, 8  ;;  %v348_v4 = vxor.u32 2147483648, %v5171_v9  ;;  %v643_v42 = vand.u32 2147483647, %v642_v61  ;;  %v645_v3 = vcvt.s32.f32 %v638_v36 }
 0x161   :  { %v1045_v11 = vsub.s32 0, %v6372_v47  ;;  %vm350_vm5 = vcmp.eq.s32.totalorder %v345_v38, 2  ;;  %v656_v62 = vadd.s32 3, %v652_v8  ;;  %v1327_v13 = vsel %vm1323_vm8, %v1307_v40, %v1310_v7 }
 0x162   :  { %v6383_v24 = vmul.u32.u64.low %v1339_v57, %v1338_v44  ;;  %v6384_v43 = vmul.u32.u64.high %v1339_v57, %v1338_v44, %v6383_v24  ;;  %v646_v26 = vmul.f32 %v645_v3, %v643_v42  ;;  %v1329_v30 = vsel %vm1325_vm3, %v1313_v0, %v1328_v21  ;;  %v9413_v44 = vld [vmem:[#allocation22_spill] sm:$0xff] }
 0x163   :  { %v4750_v56 = vmin.u32 %v1045_v11, %v6372_v47  ;;  %vm347_vm6 = vcmp.eq.s32.totalorder %v345_v38, 0  ;;  %v352_v10 = vsel %vm350_vm5, %v351_v46, %v5171_v9  ;;  %v1083_v36 = vand.u32 2147483647, %v9412_v14 }
 0x164   :  { %v6391_v32 = vmul.u32.u64.low %v1339_v57, %v1334_v37  ;;  %v6392_v19 = vmul.u32.u64.high %v1339_v57, %v1334_v37, %v6391_v32  ;;  %v349_v31 = vsel %vm347_vm6, %v5169_v48, %v348_v4  ;;  %v647_v1 = vxor.u32 2147483648, %v646_v26  ;;  %v9414_v4 = vld [vmem:[#allocation20_spill] sm:$0xff] }
 0x165   :  { %v1047_v15 = vclz %v4750_v56  ;;  %v6398_v6 = vor.u32 %v6307_v52, %v6203_v27  ;;  %v1426_v7 = vor.u32 %v6367_v59, %v6311_v39  ;;  %vm346_vm7 = vcmp.lt.s32.totalorder %v345_v38, 2  ;;  %v9417_v59 = vld [vmem:[#allocation23_spill] sm:$0xff] }
 0x166   :  { %v1330_v0 = vsel %vm1324_vm4, %v1327_v13, %v1329_v30  ;;  %vm343_vm9 = vweird.f32 %v5479_v63  ;;  %v648_v48 = vsel %vm565_vm12, %v647_v1, %v646_v26  ;;  %v6407_v5 = vand.u32 3, %v656_v62 }
 0x167   :  { %v4751_v50 = vadd.s32 4294967294, %v1047_v15  ;;  %vm1348_vm10 = vc.u32 %v6384_v43, %v6391_v32  ;;  %v353_v27 = vsel %vm346_vm7, %v349_v31, %v352_v10  ;;  %v651_v52 = vsel %vm6325_vm15, %v5473_v55, %v648_v48 }
 0x168   :  { %v1035_v51 = vadd.s32 %v6291_v17, %v6275_v25  ;;  %v1349_v9 = vadd.s32 1, %v6392_v19  ;;  %5172 = vcosq.f32 %v651_v52  ;;  %v1346_v38 = vmul.u32 %v1339_v57, %v1330_v0 }
 0x169   :  { %vm4752_vm13 = vcmp.lt.s32.totalorder %v4751_v50, 0  ;;  %v1090_v8 = vand.u32 8388607, %v1083_v36  ;;  %5174 = vsinq.f32 %v651_v52  ;;  %v1101_v46 = vshrl.u32 %v9375_v22, %v9413_v44 }
 0x16a   :  { %v1050_v61 = vsel %vm4752_vm13, 0, %v4751_v50  ;;  %v1350_v40 = vsel %vm1348_vm10, %v1349_v9, %v6392_v19  ;;  %v1100_v25 = vshll.u32 %v9374_v16, %v9414_v4  ;;  %v1103_v17 = vshll.u32 %v9375_v22, %v9414_v4 }
 0x16b   :  { %v1051_v54 = vsub.s32 32, %v1050_v61  ;;  %v1055_v21 = vsub.s32 4294967266, %v1050_v61  ;;  %v1351_v37 = vadd.s32 %v1350_v40, %v1346_v38  ;;  %v1104_v57 = vshrl.u32 %v9376_v41, %v9413_v44 }
 0x16c   :  { %v1106_v42 = vshll.u32 %v9376_v41, %v9414_v4  ;;  %v1107_v3 = vshrl.u32 %v9373_v49, %v9413_v44  ;;  %v1052_v11 = vshll.u32 %v6372_v47, %v1050_v61  ;;  %vm659_vm0 = vcmp.eq.s32.totalorder %v6407_v5, 0 }
 0x16d   :  { %v1053_v62 = vshrl.u32 %v1035_v51, %v1051_v54  ;;  %v1056_v24 = vadd.s32 127, %v1055_v21  ;;  %v1352_v26 = vadd.s32 536870912, %v1351_v37  ;;  %v1102_v56 = vor.u32 %v1101_v46, %v1100_v25 }
 0x16e   :  { %v1105_v13 = vor.u32 %v1104_v57, %v1103_v17  ;;  %v1108_v30 = vor.u32 %v1107_v3, %v1106_v42  ;;  %vm658_vm11 = vcmp.lt.s32.totalorder %v6407_v5, 2  ;;  %vm662_vm12 = vcmp.eq.s32.totalorder %v6407_v5, 2 }
 0x16f   :  { %v1054_v10 = vor.u32 %v1053_v62, %v1052_v11  ;;  %v1057_v19 = vshll.u32 %v1056_v24, 23  ;;  %v6436_v31 = vshrl.u32 %v1352_v26, 30  ;;  %v354_v1 = vsel %vm343_vm9, nan, %v353_v27 }
 0x170   :  { %vm655_vm15 = vweird.f32 %v5473_v55  ;;  %v1065_v47 = vsub.s32 4, %v6352_v60  ;;  %v1091_v15 = vor.u32 8388608, %v1090_v8  ;;  %vm1115_vm1 = vcmp.lt.s32.totalorder %v5605_v53, 1 }
 0x171   :  { %vm6445_vm8 = vcmp.le.f32.partialorder %v979_v18, 0.7853982  ;;  %v1058_v48 = vor.u32 4788187, %v1057_v19  ;;  %v1354_v50 = vshll.u32 %v6436_v31, 30  ;;  %vm1117_vm3 = vcmp.lt.s32.totalorder %v5605_v53, 3 }
 0x172   :  { %v1127_v63 = vsel %vm1115_vm1, %v1105_v13, %v1108_v30  ;;  %v1099_v27 = vshrl.u32 %v9374_v16, %v9413_v44  ;;  %v1123_v52 = vsel %vm1115_vm1, %v1102_v56, %v1105_v13  ;;  %v1125_v18 = vsel %vm1117_vm3, %v1108_v30, %v5762_v28  ;;  %v5173_v9 = vpop.eup %5172 }
 0x173   :  { %v1129_v51 = vsel %vm1117_vm3, %v5642_v23, %v5769_v12  ;;  %v1059_v38 = vand.u32 2147483647, %v1058_v48  ;;  %v1061_v8 = vcvt.s32.f32 %v1054_v10  ;;  %v6464_v61 = vsub.s32 %v1351_v37, %v1354_v50  ;;  %v5175_v40 = vpop.eup %5174 }
 0x174   :  { %vm1116_vm4 = vcmp.lt.s32.totalorder %v5605_v53, 2  ;;  %v663_v44 = vxor.u32 2147483648, %v5173_v9  ;;  %v1120_v46 = vsel %vm1118_vm2, %v1108_v30, 2102212464  ;;  %v1131_v54 = vshll.u32 %v1091_v15, 8 }
 0x175   :  { %v1130_v28 = vsel %vm1116_vm4, %v1127_v63, %v1129_v51  ;;  %v660_v21 = vxor.u32 2147483648, %v5175_v40  ;;  %v1062_v4 = vmul.f32 %v1061_v8, %v1059_v38  ;;  %v1357_v23 = vsub.s32 0, %v6464_v61 }
 0x176   :  { %v1126_v12 = vsel %vm1116_vm4, %v1123_v52, %v1125_v18  ;;  %v664_v37 = vsel %vm662_vm12, %v663_v44, %v5175_v40  ;;  %v1119_v25 = vsel %vm1115_vm1, %v1099_v27, %v1102_v56  ;;  %v1121_v62 = vsel %vm1117_vm3, %v1105_v13, %v1120_v46 }
 0x177   :  { %v6478_v17 = vmul.u32.u64.low %v1131_v54, %v1130_v28  ;;  %v6479_v57 = vmul.u32.u64.high %v1131_v54, %v1130_v28, %v6478_v17  ;;  %v661_v42 = vsel %vm659_vm0, %v5173_v9, %v660_v21  ;;  %v1063_v3 = vxor.u32 2147483648, %v1062_v4 }
 0x178   :  { %v4762_v11 = vmin.u32 %v1357_v23, %v6464_v61  ;;  %v665_v24 = vsel %vm658_vm11, %v661_v42, %v664_v37  ;;  %vm981_vm2 = vcmp.lt.s32.totalorder %v9402_v33, 0  ;;  %vm1430_vm5 = vcmp.lt.s32.totalorder %v6111_v2, 4  ;;  %v9418_v17 = vld [vmem:[#allocation30_spill] sm:$0xff] }
 0x179   :  { %v6489_v26 = vmul.u32.u64.low %v1131_v54, %v1126_v12  ;;  %v6490_v30 = vmul.u32.u64.high %v1131_v54, %v1126_v12, %v6489_v26  ;;  %v666_v56 = vsel %vm655_vm15, nan, %v665_v24  ;;  %v1064_v10 = vsel %vm981_vm2, %v1063_v3, %v1062_v4 }
 0x17a   :  { %v1066_v19 = vsel %vm981_vm2, %v1065_v47, %v6352_v60  ;;  %v1359_v15 = vclz %v4762_v11  ;;  %v4945_v48 = vpack.c.bf16 %v666_v56, %v354_v1  ;;  %v1067_v5 = vsel %vm6445_vm8, %v9402_v33, %v1064_v10 }
 0x17b   :  { %v1122_v13 = vsel %vm1116_vm4, %v1119_v25, %v1121_v62  ;;  %v1436_v50 = vsel %vm1430_vm5, %v6398_v6, 920167782  ;;  %v1440_v55 = vsel %vm1430_vm5, %v1426_v7, 1326507024  ;;  %vm1140_vm6 = vc.u32 %v6479_v57, %v6489_v26 }
 0x17c   :  { %v4763_v60 = vadd.s32 4294967294, %v1359_v15  ;;  %4946 = vmatpush1.bf16.msra.mxu0 %v4945_v48  ;;  %v1068_v1 = vsel %vm6445_vm8, 0, %v1066_v19  ;;  %v1347_v53 = vadd.s32 %v6391_v32, %v6384_v43  ;;  %v1377_v47 = vsub.s32 4, %v6436_v31 }
 0x17d   :  { %v1141_v63 = vadd.s32 1, %v6490_v30  ;;  %5176 = vcosq.f32 %v1067_v5  ;;  %v1138_v39 = vmul.u32 %v1131_v54, %v1122_v13  ;;  %v1395_v7 = vand.u32 2147483647, %v9417_v59 }
 0x17e   :  { %vm4764_vm7 = vcmp.lt.s32.totalorder %v4763_v60, 0  ;;  %5178 = vsinq.f32 %v1067_v5  ;;  %v1413_v0 = vshrl.u32 %v9375_v22, %v6199_v34  ;;  %v1412_v43 = vshll.u32 %v9374_v16, %v6113_v29 }
 0x17f   :  { %v1362_v27 = vsel %vm4764_vm7, 0, %v4763_v60  ;;  %v1142_v52 = vsel %vm1140_vm6, %v1141_v63, %v6490_v30  ;;  %v1415_v38 = vshll.u32 %v9375_v22, %v6113_v29  ;;  %v1416_v8 = vshrl.u32 %v9376_v41, %v6199_v34 }
 0x180   :  { %v1363_v18 = vsub.s32 32, %v1362_v27  ;;  %v1367_v51 = vsub.s32 4294967266, %v1362_v27  ;;  %v1143_v9 = vadd.s32 %v1142_v52, %v1138_v39  ;;  %v1364_v32 = vshll.u32 %v6464_v61, %v1362_v27 }
 0x181   :  { %v1418_v40 = vshll.u32 %v9376_v41, %v6113_v29  ;;  %v1419_v54 = vshrl.u32 %v9373_v49, %v6199_v34  ;;  %vm1293_vm9 = vcmp.lt.s32.totalorder %v9408_v20, 0  ;;  %v1402_v61 = vand.u32 8388607, %v1395_v7  ;;  %v9419_v29 = vld [vmem:[#allocation31_spill] sm:$0xff] }
 0x182   :  { %v1365_v44 = vshrl.u32 %v1347_v53, %v1363_v18  ;;  %v1368_v46 = vadd.s32 127, %v1367_v51  ;;  %v1144_v28 = vadd.s32 536870912, %v1143_v9  ;;  %v1414_v21 = vor.u32 %v1413_v0, %v1412_v43 }
 0x183   :  { %v1417_v4 = vor.u32 %v1416_v8, %v1415_v38  ;;  %v1420_v25 = vor.u32 %v1419_v54, %v1418_v40  ;;  %v6540_v42 = vor.u32 %v9419_v29, %v9418_v17  ;;  %v1072_v3 = vadd.s32 3, %v1068_v1 }
 0x184   :  { %v1366_v23 = vor.u32 %v1365_v44, %v1364_v32  ;;  %v1369_v12 = vshll.u32 %v1368_v46, 23  ;;  %v6536_v37 = vshrl.u32 %v1144_v28, 30  ;;  %vm6544_vm10 = vcmp.le.f32.partialorder %v1291_v35, 0.7853982 }
 0x185   :  { %v1378_v62 = vsel %vm1293_vm9, %v1377_v47, %v6436_v31  ;;  %vm1427_vm13 = vcmp.lt.s32.totalorder %v6111_v2, 1  ;;  %vm1429_vm0 = vcmp.lt.s32.totalorder %v6111_v2, 3  ;;  %v1403_v56 = vor.u32 8388608, %v1402_v61  ;;  %v9422_v61 = vld [vmem:[#allocation8_spill] sm:$0xff] }
 0x186   :  { %v1370_v24 = vor.u32 4788187, %v1369_v12  ;;  %v1146_v30 = vshll.u32 %v6536_v37, 30  ;;  %v1435_v10 = vsel %vm1427_vm13, %v1414_v21, %v1417_v4  ;;  %v1437_v35 = vsel %vm1429_vm0, %v1420_v25, %v1436_v50 }
 0x187   :  { %v1441_v19 = vsel %vm1429_vm0, %v6398_v6, %v1440_v55  ;;  %v5177_v15 = vpop.eup %5176  ;;  %v1373_v48 = vcvt.s32.f32 %v1366_v23  ;;  %v1439_v13 = vsel %vm1427_vm13, %v1417_v4, %v1420_v25  ;;  %v1073_v1 = vand.u32 3, %v1072_v3 }
 0x188   :  { %v1371_v31 = vand.u32 2147483647, %v1370_v24  ;;  %v6561_v5 = vsub.s32 %v1143_v9, %v1146_v30  ;;  %v5179_v60 = vpop.eup %5178  ;;  %v1411_v53 = vshrl.u32 %v9374_v16, %v6199_v34  ;;  %vm1428_vm11 = vcmp.lt.s32.totalorder %v6111_v2, 2 }
 0x189   :  { %v1432_v50 = vsel %vm1430_vm5, %v1420_v25, 2102212464  ;;  %v1380_v6 = vsel %vm6544_vm10, 0, %v1378_v62  ;;  %v1438_v63 = vsel %vm1428_vm11, %v1435_v10, %v1437_v35  ;;  %v1079_v39 = vxor.u32 2147483648, %v5177_v15  ;;  %v9423_v35 = vld [vmem:[#allocation18_spill] sm:$0xff] }
 0x18a   :  { %v1374_v47 = vmul.f32 %v1373_v48, %v1371_v31  ;;  %v1149_v55 = vsub.s32 0, %v6561_v5  ;;  %v1431_v27 = vsel %vm1427_vm13, %v1411_v53, %v1414_v21  ;;  %v1442_v34 = vsel %vm1428_vm11, %v1439_v13, %v1441_v19  ;;  %v9424_v31 = vld [vmem:[#allocation12_spill] sm:$0xff] }
 0x18b   :  { %v1443_v52 = vshll.u32 %v1403_v56, 8  ;;  %v1076_v0 = vxor.u32 2147483648, %v5179_v60  ;;  %v1433_v9 = vsel %vm1429_vm0, %v1417_v4, %v1432_v50  ;;  %vm1075_vm12 = vcmp.eq.s32.totalorder %v1073_v1, 0 }
 0x18c   :  { %v1375_v18 = vxor.u32 2147483648, %v1374_v47  ;;  %v4754_v51 = vmin.u32 %v1149_v55, %v6561_v5  ;;  %v1384_v44 = vadd.s32 3, %v1380_v6  ;;  %vm1078_vm15 = vcmp.eq.s32.totalorder %v1073_v1, 2 }
 0x18d   :  { %v6582_v43 = vmul.u32.u64.low %v1443_v52, %v1442_v34  ;;  %v6583_v32 = vmul.u32.u64.high %v1443_v52, %v1442_v34, %v6582_v43  ;;  %v6585_v38 = vmul.u32.u64.low %v1443_v52, %v1438_v63  ;;  %v6586_v8 = vmul.u32.u64.high %v1443_v52, %v1438_v63, %v6585_v38 }
 0x18e   :  { %v1376_v40 = vsel %vm1293_vm9, %v1375_v18, %v1374_v47  ;;  %v1151_v46 = vclz %v4754_v51  ;;  %v1434_v54 = vsel %vm1428_vm11, %v1431_v27, %v1433_v9  ;;  %v875_v21 = vand.u32 2147483647, %v9422_v61  ;;  %v9425_v9 = vld [vmem:[#allocation21_spill] sm:$0xff] }
 0x18f   :  { %v1379_v28 = vsel %vm6544_vm10, %v9408_v20, %v1376_v40  ;;  %vm1071_vm1 = vweird.f32 %v9402_v33  ;;  %v1077_v4 = vsel %vm1075_vm12, %v5177_v15, %v1076_v0  ;;  %v1080_v23 = vsel %vm1078_vm15, %v1079_v39, %v5179_v60  ;;  %v9427_v33 = vld [vmem:[#allocation24_spill] sm:$0xff] }
 0x190   :  { %5180 = vcosq.f32 %v1379_v28  ;;  %v4755_v12 = vadd.s32 4294967294, %v1151_v46  ;;  %vm1074_vm8 = vcmp.lt.s32.totalorder %v1073_v1, 2  ;;  %vm1452_vm3 = vc.u32 %v6583_v32, %v6585_v38 }
 0x191   :  { %5182 = vsinq.f32 %v1379_v28  ;;  %v1453_v25 = vadd.s32 1, %v6586_v8  ;;  %v1385_v17 = vand.u32 3, %v1384_v44  ;;  %v1139_v2 = vadd.s32 %v6489_v26, %v6479_v57  ;;  %v9426_v44 = vld [vmem:[#allocation26_spill] sm:$0xff] }
 0x192   :  { %vm4756_vm4 = vcmp.lt.s32.totalorder %v4755_v12, 0  ;;  %v1450_v29 = vmul.u32 %v1443_v52, %v1434_v54  ;;  %v1081_v3 = vsel %vm1074_vm8, %v1077_v4, %v1080_v23  ;;  %v882_v24 = vand.u32 8388607, %v875_v21 }
 0x193   :  { %v1154_v11 = vsel %vm4756_vm4, 0, %v4755_v12  ;;  %v1454_v62 = vsel %vm1452_vm3, %v1453_v25, %v6586_v8  ;;  %v893_v19 = vshrl.u32 %v9375_v22, %v9423_v35  ;;  %v895_v57 = vshll.u32 %v9375_v22, %v9424_v31 }
 0x194   :  { %v1155_v30 = vsub.s32 32, %v1154_v11  ;;  %v1159_v56 = vsub.s32 4294967266, %v1154_v11  ;;  %v1455_v10 = vadd.s32 %v1454_v62, %v1450_v29  ;;  %v1156_v15 = vshll.u32 %v6561_v5, %v1154_v11  ;;  %v9428_v29 = vld [vmem:[#allocation25_spill] sm:$0xff] }
 0x195   :  { %v896_v26 = vshrl.u32 %v9376_v41, %v9423_v35  ;;  %v898_v48 = vshll.u32 %v9376_v41, %v9424_v31  ;;  %v899_v53 = vshrl.u32 %v9373_v49, %v9423_v35  ;;  %vm1383_vm2 = vweird.f32 %v9408_v20 }
 0x196   :  { %v1157_v13 = vshrl.u32 %v1139_v2, %v1155_v30  ;;  %v1160_v60 = vadd.s32 127, %v1159_v56  ;;  %v1456_v1 = vadd.s32 536870912, %v1455_v10  ;;  %vm1386_vm5 = vcmp.lt.s32.totalorder %v1385_v17, 2 }
 0x197   :  { %vm1387_vm6 = vcmp.eq.s32.totalorder %v1385_v17, 0  ;;  %v892_v5 = vshll.u32 %v9374_v16, %v9424_v31  ;;  %v897_v50 = vor.u32 %v896_v26, %v895_v57  ;;  %v900_v63 = vor.u32 %v899_v53, %v898_v48 }
 0x198   :  { %v1158_v47 = vor.u32 %v1157_v13, %v1156_v15  ;;  %v1161_v6 = vshll.u32 %v1160_v60, 23  ;;  %v6620_v55 = vshrl.u32 %v1456_v1, 30  ;;  %v1082_v39 = vsel %vm1071_vm1, nan, %v1081_v3 }
 0x199   :  { %vm1390_vm7 = vcmp.eq.s32.totalorder %v1385_v17, 2  ;;  %v891_v27 = vshrl.u32 %v9374_v16, %v9423_v35  ;;  %v894_v34 = vor.u32 %v893_v19, %v892_v5  ;;  %v883_v51 = vor.u32 8388608, %v882_v24  ;;  %v9429_v17 = vld [vmem:[#allocation27_spill] sm:$0xff]  ;;  %v9430_v5 = vld [vmem:[#allocation28_spill] sm:$0xff] }
 0x19a   :  { %v5181_v52 = vpop.eup %5180  ;;  %v1162_v0 = vor.u32 4788187, %v1161_v6  ;;  %v1458_v18 = vshll.u32 %v6620_v55, 30  ;;  %vm909_vm9 = vcmp.lt.s32.totalorder %v9425_v9, 3  ;;  %v1165_v40 = vcvt.s32.f32 %v1158_v47  ;;  %v9431_v6 = vld [vmem:[#allocation32_spill] sm:$0xff] }
 0x19b   :  { %v5183_v43 = vpop.eup %5182  ;;  %v1391_v8 = vxor.u32 2147483648, %v5181_v52  ;;  %vm907_vm10 = vcmp.lt.s32.totalorder %v9425_v9, 1  ;;  %v921_v46 = vsel %vm909_vm9, %v9427_v33, %v9426_v44  ;;  %v912_v25 = vsel %vm910_vm14, %v900_v63, 2102212464  ;;  %v9435_v44 = vld [vmem:[#allocation29_spill] sm:$0xff] }
 0x19c   :  { %v1388_v28 = vxor.u32 2147483648, %v5183_v43  ;;  %v1163_v54 = vand.u32 2147483647, %v1162_v0  ;;  %v1459_v4 = vsub.s32 %v1455_v10, %v1458_v18  ;;  %v919_v23 = vsel %vm907_vm10, %v897_v50, %v900_v63  ;;  %v6750_v0 = vld [vmem:[%s9224_s3] sm:$0xff] }
 0x19d   :  { %v1392_v12 = vsel %vm1390_vm7, %v1391_v8, %v5183_v43  ;;  %v915_v2 = vsel %vm907_vm10, %v894_v34, %v897_v50  ;;  %v917_v3 = vsel %vm909_vm9, %v900_v63, %v9428_v29  ;;  %vm908_vm13 = vcmp.lt.s32.totalorder %v9425_v9, 2 }
 0x19e   :  { %v1389_v11 = vsel %vm1387_vm6, %v5181_v52, %v1388_v28  ;;  %v1166_v62 = vmul.f32 %v1165_v40, %v1163_v54  ;;  %v1461_v24 = vsub.s32 0, %v1459_v4  ;;  %v911_v56 = vsel %vm907_vm10, %v891_v27, %v894_v34  ;;  %v9432_v34 = vld [vmem:[#allocation15_spill] sm:$0xff] }
 0x19f   :  { %v1393_v30 = vsel %vm1386_vm5, %v1389_v11, %v1392_v12  ;;  %v922_v10 = vsel %vm908_vm13, %v919_v23, %v921_v46  ;;  %v923_v35 = vshll.u32 %v883_v51, 8  ;;  %v913_v31 = vsel %vm909_vm9, %v897_v50, %v912_v25 }
 0x1a0   :  { %v1394_v19 = vsel %vm1383_vm2, nan, %v1393_v30  ;;  %v4766_v15 = vmin.u32 %v1461_v24, %v1459_v4  ;;  %v918_v57 = vsel %vm908_vm13, %v915_v2, %v917_v3  ;;  %v1216_v60 = vshll.u32 %v9371_v45, %v9429_v17 }
 0x1a1   :  { %v4947_v26 = vpack.c.bf16 %v1394_v19, %v1082_v39  ;;  %v6650_v48 = vmul.u32.u64.low %v923_v35, %v922_v10  ;;  %v6651_v13 = vmul.u32.u64.high %v923_v35, %v922_v10, %v6650_v48  ;;  %v1167_v1 = vxor.u32 2147483648, %v1166_v62 }
 0x1a2   :  { %v1463_v53 = vclz %v4766_v15  ;;  %vm1222_vm14 = vcmp.lt.s32.totalorder %v9430_v5, 4  ;;  %v914_v20 = vsel %vm908_vm13, %v911_v56, %v913_v31  ;;  %v1218_v63 = vor.u32 %v9431_v6, %v1216_v60 }
 0x1a3   :  { %4948 = vmatprep.subr.bf16.mxu0 %v4947_v26  ;;  %v6658_v47 = vmul.u32.u64.low %v923_v35, %v918_v57  ;;  %v6659_v50 = vmul.u32.u64.high %v923_v35, %v918_v57, %v6658_v47  ;;  %v1228_v39 = vsel %vm1222_vm14, %v6540_v42, 920167782  ;;  %v1187_v52 = vand.u32 2147483647, %v9432_v34 }
 0x1a4   :  { %v4767_v27 = vadd.s32 4294967294, %v1463_v53  ;;  %vm6669_vm0 = vcmp.le.f32.partialorder %v1083_v36, 0.7853982  ;;  %vm1085_vm11 = vcmp.lt.s32.totalorder %v9412_v14, 0  ;;  %v1169_v18 = vsub.s32 4, %v6536_v37 }
 0x1a5   :  { %v1451_v51 = vadd.s32 %v6585_v38, %v6583_v32  ;;  %v1168_v9 = vsel %vm1085_vm11, %v1167_v1, %v1166_v62  ;;  %v930_v43 = vmul.u32 %v923_v35, %v914_v20  ;;  %vm932_vm15 = vc.u32 %v6651_v13, %v6658_v47 }
 0x1a6   :  { %vm4768_vm12 = vcmp.lt.s32.totalorder %v4767_v27, 0  ;;  %v933_v36 = vadd.s32 1, %v6659_v50  ;;  %v1194_v40 = vand.u32 8388607, %v1187_v52  ;;  %v1205_v33 = vshrl.u32 %v9375_v22, %v9435_v44 }
 0x1a7   :  { %v1466_v8 = vsel %vm4768_vm12, 0, %v4767_v27  ;;  %v1204_v32 = vshll.u32 %v9374_v16, %v9429_v17  ;;  %v1207_v38 = vshll.u32 %v9375_v22, %v9429_v17  ;;  %v1208_v12 = vshrl.u32 %v9376_v41, %v9435_v44 }
 0x1a8   :  { %v1467_v46 = vsub.s32 32, %v1466_v8  ;;  %v1471_v28 = vsub.s32 4294967266, %v1466_v8  ;;  %v1468_v54 = vshll.u32 %v1459_v4, %v1466_v8  ;;  %v934_v23 = vsel %vm932_vm15, %v933_v36, %v6659_v50 }
 0x1a9   :  { %v1210_v25 = vshll.u32 %v9376_v41, %v9429_v17  ;;  %v935_v3 = vadd.s32 %v934_v23, %v930_v43  ;;  %v1211_v11 = vshrl.u32 %v9373_v49, %v9435_v44  ;;  %v1232_v62 = vsel %vm1222_vm14, %v1218_v63, 1326507024 }
 0x1aa   :  { %v1469_v2 = vshrl.u32 %v1451_v51, %v1467_v46  ;;  %v1472_v29 = vadd.s32 127, %v1471_v28  ;;  %v1171_v4 = vsel %vm6669_vm0, %v9412_v14, %v1168_v9  ;;  %v1206_v24 = vor.u32 %v1205_v33, %v1204_v32 }
 0x1ab   :  { %v1209_v30 = vor.u32 %v1208_v12, %v1207_v38  ;;  %v936_v35 = vadd.s32 536870912, %v935_v3  ;;  %v1212_v19 = vor.u32 %v1211_v11, %v1210_v25  ;;  %v1170_v15 = vsel %vm1085_vm11, %v1169_v18, %v6536_v37 }
 0x1ac   :  { %v1470_v56 = vor.u32 %v1469_v2, %v1468_v54  ;;  %v1473_v10 = vshll.u32 %v1472_v29, 23  ;;  %v1481_v31 = vsub.s32 4, %v6620_v55  ;;  %v1195_v57 = vor.u32 8388608, %v1194_v40 }
 0x1ad   :  { %vm1221_vm1 = vcmp.lt.s32.totalorder %v9430_v5, 3  ;;  %v6707_v48 = vshrl.u32 %v936_v35, 30  ;;  %vm1219_vm8 = vcmp.lt.s32.totalorder %v9430_v5, 1  ;;  %5184 = vcosq.f32 %v1171_v4 }
 0x1ae   :  { %v1474_v26 = vor.u32 4788187, %v1473_v10  ;;  %v1233_v17 = vsel %vm1221_vm1, %v6540_v42, %v1232_v62  ;;  %v1227_v60 = vsel %vm1219_vm8, %v1206_v24, %v1209_v30  ;;  %v1229_v37 = vsel %vm1221_vm1, %v1212_v19, %v1228_v39 }
 0x1af   :  { %v1231_v1 = vsel %vm1219_vm8, %v1209_v30, %v1212_v19  ;;  %v1477_v20 = vcvt.s32.f32 %v1470_v56  ;;  %v938_v50 = vshll.u32 %v6707_v48, 30  ;;  %vm1220_vm3 = vcmp.lt.s32.totalorder %v9430_v5, 2 }
 0x1b0   :  { %v1475_v53 = vand.u32 2147483647, %v1474_v26  ;;  %5186 = vsinq.f32 %v1171_v4  ;;  %v1224_v42 = vsel %vm1222_vm14, %v1212_v19, 2102212464  ;;  %v1234_v6 = vsel %vm1220_vm3, %v1231_v1, %v1233_v17 }
 0x1b1   :  { %v1235_v63 = vshll.u32 %v1195_v57, 8  ;;  %v6725_v18 = vsub.s32 %v935_v3, %v938_v50  ;;  %v1203_v39 = vshrl.u32 %v9374_v16, %v9435_v44  ;;  %v1230_v51 = vsel %vm1220_vm3, %v1227_v60, %v1229_v37 }
 0x1b2   :  { %v1478_v27 = vmul.f32 %v1477_v20, %v1475_v53  ;;  %v1172_v9 = vsel %vm6669_vm0, 0, %v1170_v15  ;;  %vm1397_vm4 = vcmp.lt.s32.totalorder %v9417_v59, 0  ;;  %v1225_v44 = vsel %vm1221_vm1, %v1209_v30, %v1224_v42 }
 0x1b3   :  { %v6734_v43 = vmul.u32.u64.low %v1235_v63, %v1234_v6  ;;  %v6735_v8 = vmul.u32.u64.high %v1235_v63, %v1234_v6, %v6734_v43  ;;  %v941_v40 = vsub.s32 0, %v6725_v18  ;;  %v1223_v33 = vsel %vm1219_vm8, %v1203_v39, %v1206_v24 }
 0x1b4   :  { %v1479_v36 = vxor.u32 2147483648, %v1478_v27  ;;  %v1482_v46 = vsel %vm1397_vm4, %v1481_v31, %v6620_v55  ;;  %v6743_v28 = vmul.u32.u64.low %v1235_v63, %v1230_v51  ;;  %v6744_v32 = vmul.u32.u64.high %v1235_v63, %v1230_v51, %v6743_v28 }
 0x1b5   :  { %vm6754_vm2 = vcmp.le.f32.partialorder %v1395_v7, 0.7853982  ;;  %v4746_v23 = vmin.u32 %v941_v40, %v6725_v18  ;;  %v1176_v12 = vadd.s32 3, %v1172_v9  ;;  %v1226_v25 = vsel %vm1220_vm3, %v1223_v33, %v1225_v44 }
 0x1b6   :  { %v1480_v54 = vsel %vm1397_vm4, %v1479_v36, %v1478_v27  ;;  %v9287_v2 = vmov 0.0   ;;  %vm9320_vm5 = vcmask 261120   ;;  %v1484_v7 = vsel %vm6754_vm2, 0, %v1482_v46 }
 0x1b7   :  { %v1483_v55 = vsel %vm6754_vm2, %v9417_v59, %v1480_v54  ;;  %1604 = vmatprep.mubr.f32.mxu0 %v9287_v2  ;;  %v943_v29 = vclz %v4746_v23  ;;  %vm1244_vm6 = vc.u32 %v6735_v8, %v6743_v28  ;;  %4912 = vmatprep.mubr.msk.f32.mxu1 %vm9320_vm5, %v6750_v0  ;;  %v5185_v3 = vpop.eup %5184  ;;  %v1245_v5 = vadd.s32 1, %v6744_v32 }
 0x1b8   :  { %5188 = vcosq.f32 %v1483_v55  ;;  %v1242_v62 = vmul.u32 %v1235_v63, %v1226_v25  ;;  %v1488_v24 = vadd.s32 3, %v1484_v7  ;;  %v1177_v56 = vand.u32 3, %v1176_v12 }
 0x1b9   :  { %5190 = vsinq.f32 %v1483_v55  ;;  %v4747_v11 = vadd.s32 4294967294, %v943_v29  ;;  %v1246_v30 = vsel %vm1244_vm6, %v1245_v5, %v6744_v32  ;;  %v1183_v35 = vxor.u32 2147483648, %v5185_v3  ;;  %v6784_v29 = vld [vmem:[%s9224_s3 + $0x8] sm:$0xff] }
 0x1ba   :  { %v5187_v4 = vpop.eup %5186  ;;  %v1247_v10 = vadd.s32 %v1246_v30, %v1242_v62  ;;  %v931_v19 = vadd.s32 %v6658_v47, %v6651_v13  ;;  %v1489_v60 = vand.u32 3, %v1488_v24  ;;  %vm1182_vm9 = vcmp.eq.s32.totalorder %v1177_v56, 2 }
 0x1bb   :  { %vm4748_vm7 = vcmp.lt.s32.totalorder %v4747_v11, 0  ;;  %v1180_v31 = vxor.u32 2147483648, %v5187_v4  ;;  %vm1179_vm10 = vcmp.eq.s32.totalorder %v1177_v56, 0  ;;  %v1184_v20 = vsel %vm1182_vm9, %v1183_v35, %v5187_v4  ;;  %v6800_v4 = vld [vmem:[%s9224_s3 + $0x18] sm:$0xff] }
 0x1bc   :  { %v946_v15 = vsel %vm4748_vm7, 0, %v4747_v11  ;;  %v1248_v17 = vadd.s32 536870912, %v1247_v10  ;;  %vm1178_vm13 = vcmp.lt.s32.totalorder %v1177_v56, 2  ;;  %vm1494_vm14 = vcmp.eq.s32.totalorder %v1489_v60, 2 }
 0x1bd   :  { %v947_v57 = vsub.s32 32, %v946_v15  ;;  %v951_v26 = vsub.s32 4294967266, %v946_v15  ;;  %v1181_v42 = vsel %vm1179_vm10, %v5185_v3, %v1180_v31  ;;  %v948_v6 = vshll.u32 %v6725_v18, %v946_v15 }
 0x1be   :  { %v6775_v53 = vshrl.u32 %v1248_v17, 30  ;;  %v1185_v36 = vsel %vm1178_vm13, %v1181_v42, %v1184_v20  ;;  %vm1491_vm0 = vcmp.eq.s32.totalorder %v1489_v60, 0  ;;  %vm1490_vm11 = vcmp.lt.s32.totalorder %v1489_v60, 2 }
 0x1bf   :  { %v949_v37 = vshrl.u32 %v931_v19, %v947_v57  ;;  %v952_v1 = vadd.s32 127, %v951_v26  ;;  %vm1175_vm12 = vweird.f32 %v9412_v14  ;;  %vm1487_vm15 = vweird.f32 %v9417_v59  ;;  %v6789_v14 = vld [vmem:[%s9224_s3 + $0x10] sm:$0xff] }
 0x1c0   :  { %v1250_v13 = vshll.u32 %v6775_v53, 30  ;;  %v1186_v32 = vsel %vm1175_vm12, nan, %v1185_v36  ;;  %v1243_v5 = vadd.s32 %v6743_v28, %v6735_v8  ;;  %vm877_vm8 = vcmp.lt.s32.totalorder %v9422_v61, 0 }
 0x1c1   :  { %v953_v63 = vshll.u32 %v952_v1, 23  ;;  %v950_v51 = vor.u32 %v949_v37, %v948_v6  ;;  %vm6809_vm3 = vcmp.le.f32.partialorder %v875_v21, 0.7853982  ;;  %v961_v31 = vsub.s32 4, %v6707_v48 }
 0x1c2   :  { %v5189_v50 = vpop.eup %5188  ;;  %v1251_v43 = vsub.s32 %v1247_v10, %v1250_v13  ;;  %v1273_v21 = vsub.s32 4, %v6775_v53  ;;  %vm1189_vm4 = vcmp.lt.s32.totalorder %v9432_v34, 0  ;;  %vm1188_vm2 = vcmp.le.f32.partialorder %v1187_v52, 0.7853982 }
 0x1c3   :  { %v5191_v47 = vpop.eup %5190  ;;  %v1495_v27 = vxor.u32 2147483648, %v5189_v50  ;;  %v954_v9 = vor.u32 4788187, %v953_v63  ;;  %v957_v54 = vcvt.s32.f32 %v950_v51  ;;  %v962_v60 = vsel %vm877_vm8, %v961_v31, %v6707_v48 }
 0x1c4   :  { %v1492_v39 = vxor.u32 2147483648, %v5191_v47  ;;  %v1253_v46 = vsub.s32 0, %v1251_v43  ;;  %v964_v1 = vsel %vm6809_vm3, 0, %v962_v60 }
 0x1c5   :  { %v1496_v40 = vsel %vm1494_vm14, %v1495_v27, %v5191_v47  ;;  %v955_v44 = vand.u32 2147483647, %v954_v9  ;;  %v968_v6 = vadd.s32 3, %v964_v1 }
 0x1c6   :  { %v1493_v33 = vsel %vm1491_vm0, %v5189_v50, %v1492_v39  ;;  %v4758_v23 = vmin.u32 %v1253_v46, %v1251_v43  ;;  %v1274_v50 = vsel %vm1189_vm4, %v1273_v21, %v6775_v53  ;;  %vm967_vm0 = vweird.f32 %v9422_v61 }
 0x1c7   :  { %v1497_v18 = vsel %vm1490_vm11, %v1493_v33, %v1496_v40  ;;  %v958_v55 = vmul.f32 %v957_v54, %v955_v44  ;;  %v1276_v63 = vsel %vm1188_vm2, 0, %v1274_v50  ;;  %v969_v27 = vand.u32 3, %v968_v6 }
 0x1c8   :  { %v1498_v38 = vsel %vm1487_vm15, nan, %v1497_v18  ;;  %v1255_v25 = vclz %v4758_v23  ;;  %v1280_v47 = vadd.s32 3, %v1276_v63  ;;  %vm1279_vm11 = vweird.f32 %v9432_v34 }
 0x1c9   :  { %v4955_v12 = vpack.c.bf16 %v1498_v38, %v1186_v32  ;;  %v959_v59 = vxor.u32 2147483648, %v958_v55  ;;  %vm971_vm6 = vcmp.eq.s32.totalorder %v969_v27, 0  ;;  %vm974_vm7 = vcmp.eq.s32.totalorder %v969_v27, 2 }
 0x1ca   :  { %v4759_v7 = vadd.s32 4294967294, %v1255_v25  ;;  %v1281_v9 = vand.u32 3, %v1280_v47  ;;  %vm970_vm9 = vcmp.lt.s32.totalorder %v969_v27, 2 }
 0x1cb   :  { %4956 = vmatprep.subr.bf16.mxu1 %v4955_v12  ;;  %v960_v24 = vsel %vm877_vm8, %v959_v59, %v958_v55 }
 0x1cc   :  { %4958 = vmatpush3.bf16.msra.mxu1 %v4955_v12  ;;  %vm4760_vm1 = vcmp.lt.s32.totalorder %v4759_v7, 0  ;;  %v963_v19 = vsel %vm6809_vm3, %v9422_v61, %v960_v24  ;;  %vm1286_vm10 = vcmp.eq.s32.totalorder %v1281_v9, 2  ;;  %vm1283_vm13 = vcmp.eq.s32.totalorder %v1281_v9, 0  ;;  %v6842_v61 = vpop.permute.xlu1 %1514  ;;  %v6844_v12 = vpop.permute.xlu0 %1509 }
 0x1cd   :  { %v1258_v3 = vsel %vm4760_vm1, 0, %v4759_v7  ;;  %5192 = vcosq.f32 %v963_v19  ;;  %vm1282_vm14 = vcmp.lt.s32.totalorder %v1281_v9, 2 }
 0x1ce   :  { %v1259_v11 = vsub.s32 32, %v1258_v3  ;;  %v1263_v62 = vsub.s32 4294967266, %v1258_v3  ;;  %v1260_v30 = vshll.u32 %v1251_v43, %v1258_v3  ;;  %5194 = vsinq.f32 %v963_v19 }
 0x1cf   :  { %4913 = vmatmul.mubr.msk.f32.vlgmr.msra.gmra.mrb[0].mxu1 %vm9320_vm5, %v6784_v29 }
 0x1d0   :  { %4915 = vmatprep.mubr.msk.f32.mxu1 %vm9320_vm5, %v6789_v14  ;;  %v1261_v56 = vshrl.u32 %v1243_v5, %v1259_v11  ;;  %v1264_v10 = vadd.s32 127, %v1263_v62  ;;  %v6848_v3 = vpop.permute.xlu1 %1524  ;;  %v6851_v24 = vpop.permute.xlu0 %1519 }
 0x1d2   :  { %v1262_v28 = vor.u32 %v1261_v56, %v1260_v30  ;;  %v1265_v35 = vshll.u32 %v1264_v10, 23 }
 0x1d3   :  { %4916 = vmatmul.mubr.msk.f32.gmra.mrb[2].mxu1 %vm9320_vm5, %v6800_v4 }
 0x1d4   :  { %3114 = vmatprep.mubr.f32.mxu1 %v9287_v2  ;;  %v1266_v15 = vor.u32 4788187, %v1265_v35  ;;  %v1269_v26 = vcvt.s32.f32 %v1262_v28 }
 0x1d6   :  { %v1267_v57 = vand.u32 2147483647, %v1266_v15 }
 0x1d7   :  { %v5193_v13 = vpop.eup %5192 }
 0x1d8   :  { %v1270_v17 = vmul.f32 %v1269_v26, %v1267_v57  ;;  %v5195_v48 = vpop.eup %5194  ;;  %v975_v51 = vxor.u32 2147483648, %v5193_v13 }
 0x1d9   :  { %v972_v39 = vxor.u32 2147483648, %v5195_v48 }
 0x1da   :  { %v1271_v37 = vxor.u32 2147483648, %v1270_v17  ;;  %v976_v36 = vsel %vm974_vm7, %v975_v51, %v5195_v48 }
 0x1db   :  { %v973_v52 = vsel %vm971_vm6, %v5193_v13, %v972_v39 }
 0x1dc   :  { %v1272_v20 = vsel %vm1189_vm4, %v1271_v37, %v1270_v17  ;;  %v977_v44 = vsel %vm970_vm9, %v973_v52, %v976_v36 }
 0x1dd   :  { %v1275_v42 = vsel %vm1188_vm2, %v9432_v34, %v1272_v20  ;;  %v978_v38 = vsel %vm967_vm0, nan, %v977_v44 }
 0x1de   :  { %5196 = vcosq.f32 %v1275_v42 }
 0x1df   :  { %5198 = vsinq.f32 %v1275_v42 }
 0x1e8   :  { %v5197_v43 = vpop.eup %5196 }
 0x1e9   :  { %v5199_v40 = vpop.eup %5198  ;;  %v1287_v53 = vxor.u32 2147483648, %v5197_v43 }
 0x1ea   :  { %v1284_v33 = vxor.u32 2147483648, %v5199_v40 }
 0x1eb   :  { %v1288_v46 = vsel %vm1286_vm10, %v1287_v53, %v5199_v40 }
 0x1ec   :  { %v1285_v18 = vsel %vm1283_vm13, %v5197_v43, %v1284_v33 }
 0x1ed   :  { %v1289_v32 = vsel %vm1282_vm14, %v1285_v18, %v1288_v46 }
 0x1ee   :  { %v1290_v54 = vsel %vm1279_vm11, nan, %v1289_v32 }
 0x1ef   :  { %v4949_v23 = vpack.c.bf16 %v1290_v54, %v978_v38 }
 0x1f1   :  { %4950 = vmatpush1.bf16.msra.mxu0 %v4949_v23 }
 0x1f4   :  { %4769 = vmatmul.mubr.msk.f32.vlgmr.msra.gmra.mrb[0].mxu0 %vm9320_vm5, %v6750_v0 }
 0x1f5   :  { %1610 = vmatprep.mubr.f32.mxu0 %v9287_v2 }
 0x1f8   :  { %4770 = vmatmul.mubr.msk.f32.gmra.mrb[2].mxu0 %vm9320_vm5, %v6784_v29 }
 0x1f9   :  { %1616 = vmatprep.mubr.f32.mxu0 %v9287_v2 }
 0x1fc   :  { %4771 = vmatmul.mubr.msk.f32.gmra.mrb[4].mxu0 %vm9320_vm5, %v6789_v14 }
 0x1fd   :  { %1622 = vmatprep.mubr.f32.mxu0 %v9287_v2 }
 0x200   :  { %4772 = vmatmul.mubr.msk.f32.gmra.mrb[6].mxu0 %vm9320_vm5, %v6800_v4 }
 0x2a2   :  { %v4914_v34 = vpop.f32.mrb[0].mxu1 }
 0x2a3   :  { %v1701_v0 = vadd.f32 %v4914_v34, %v6842_v61  ;;  %v1695_v55 = vpop.f32.mrb[1].mxu1 }
 0x2a4   :  { %v1696_v25 = vadd.f32 %v1695_v55, %v6844_v12 }
 0x2a5   :  { %v1719_v7 = vand.u32 2147483647, %v1701_v0 }
 0x2a6   :  { %v1716_v29 = vand.u32 2147483647, %v1696_v25  ;;  %v4917_v59 = vpop.f32.mrb[2].mxu1 }
 0x2a7   :  { %v1731_v14 = vadd.f32 1.0, %v1719_v7  ;;  %v1705_v5 = vpop.f32.mrb[3].mxu1  ;;  %v1711_v62 = vadd.f32 %v4917_v59, %v6848_v3 }
 0x2a8   :  { %v1728_v11 = vadd.f32 1.0, %v1716_v29  ;;  %v6856_v10 = vadd.f32 %v1705_v5, %v6851_v24 }
 0x2a9   :  { %v1743_v4 = vmul.f32 30.0, %v1731_v14  ;;  %v1725_v28 = vand.u32 2147483647, %v1711_v62 }
 0x2aa   :  { %v1740_v30 = vmul.f32 30.0, %v1728_v11  ;;  %v1722_v57 = vand.u32 2147483647, %v6856_v10 }
 0x2ab   :  { %v6853_v56 = vmul.f32 %v1743_v4, %v1701_v0  ;;  %v1737_v60 = vadd.f32 1.0, %v1725_v28 }
 0x2ac   :  { %v6858_v8 = vmul.f32 %v1740_v30, %v1696_v25  ;;  %v1734_v50 = vadd.f32 1.0, %v1722_v57 }
 0x2ad   :  { %v9292_v35 = vand.u32 2147483647, %v6853_v56  ;;  %v2285_v19 = vand.u32 2139095040, %v6853_v56  ;;  %v1749_v13 = vmul.f32 30.0, %v1737_v60 }
 0x2ae   :  { %v1973_v15 = vand.u32 2139095040, %v6858_v8  ;;  %v9293_v17 = vand.u32 2147483647, %v6858_v8  ;;  %v6876_v52 = vmul.f32 30.0, %v1734_v50 }
 0x2af   :  { %v2286_v31 = vshrl.u32 %v2285_v19, 23  ;;  %v2289_v26 = vand.u32 8388607, %v9292_v35  ;;  %v6874_v43 = vmul.f32 %v1749_v13, %v1711_v62 }
 0x2b0   :  { %v1974_v21 = vshrl.u32 %v1973_v15, 23  ;;  %v6869_v6 = vand.u32 8388607, %v9293_v17 }
 0x2b1   :  { %v4797_v37 = vadd.s32 4294967169, %v2286_v31  ;;  %v2290_v42 = vor.u32 8388608, %v2289_v26  ;;  %9440 = vst [vmem:[#allocation11_spill] sm:$0xff] %v6874_v43 }
 0x2b2   :  { %v4785_v1 = vadd.s32 4294967169, %v1974_v21  ;;  %v1978_v9 = vor.u32 8388608, %v6869_v6 }
 0x2b3   :  { %v2292_v20 = vadd.s32 1, %v4797_v37  ;;  %v6871_v51 = vshll.u32 %v2290_v42, 8 }
 0x2b4   :  { %v1980_v63 = vadd.s32 1, %v4785_v1 }
 0x2b5   :  { %vm2293_vm12 = vcmp.gt.s32.totalorder %v2292_v20, 0 }
 0x2b6   :  { %v2294_v48 = vsel %vm2293_vm12, %v2292_v20, 0  ;;  %vm1981_vm15 = vcmp.gt.s32.totalorder %v1980_v63, 0 }
 0x2b7   :  { %v2295_v47 = vshrl.u32 %v2294_v48, 5  ;;  %v2296_v27 = vand.u32 31, %v2294_v48  ;;  %v1982_v39 = vsel %vm1981_vm15, %v1980_v63, 0 }
 0x2b8   :  { %v6879_v53 = vshrl.u32 %v1982_v39, 5  ;;  %v1984_v33 = vand.u32 31, %v1982_v39 }
 0x2b9   :  { %v2297_v36 = vsub.s32 32, %v2296_v27  ;;  %v2299_v40 = vshll.u32 %v9374_v16, %v2296_v27  ;;  %v2302_v44 = vshll.u32 %v9375_v22, %v2296_v27  ;;  %v2305_v46 = vshll.u32 %v9376_v41, %v2296_v27 }
 0x2ba   :  { %v2308_v18 = vshll.u32 %v9373_v49, %v2296_v27  ;;  %v2311_v32 = vshll.u32 %v9371_v45, %v2296_v27  ;;  %vm2314_vm1 = vcmp.lt.s32.totalorder %v2295_v47, 1  ;;  %vm2315_vm8 = vcmp.lt.s32.totalorder %v2295_v47, 2 }
 0x2bb   :  { %v2300_v38 = vshrl.u32 %v9375_v22, %v2297_v36  ;;  %v2303_v54 = vshrl.u32 %v9376_v41, %v2297_v36  ;;  %v2306_v23 = vshrl.u32 %v9373_v49, %v2297_v36  ;;  %v2298_v34 = vshrl.u32 %v9374_v16, %v2297_v36 }
 0x2bc   :  { %v2309_v0 = vshrl.u32 %v9371_v45, %v2297_v36  ;;  %v2312_v55 = vshrl.u32 %v9372_v58, %v2297_v36  ;;  %v1985_v59 = vsub.s32 32, %v1984_v33  ;;  %vm2316_vm3 = vcmp.lt.s32.totalorder %v2295_v47, 3 }
 0x2bd   :  { %v2301_v25 = vor.u32 %v2300_v38, %v2299_v40  ;;  %v2304_v7 = vor.u32 %v2303_v54, %v2302_v44  ;;  %v2307_v29 = vor.u32 %v2306_v23, %v2305_v46  ;;  %vm2317_vm4 = vcmp.lt.s32.totalorder %v2295_v47, 4 }
 0x2be   :  { %v2310_v14 = vor.u32 %v2309_v0, %v2308_v18  ;;  %v2313_v5 = vor.u32 %v2312_v55, %v2311_v32  ;;  %v1987_v31 = vshll.u32 %v9374_v16, %v1984_v33  ;;  %v1988_v21 = vshrl.u32 %v9375_v22, %v1985_v59 }
 0x2bf   :  { %v2318_v11 = vsel %vm2314_vm1, %v2298_v34, %v2301_v25  ;;  %v2319_v62 = vsel %vm2317_vm4, %v2307_v29, 2102212464  ;;  %v2322_v4 = vsel %vm2314_vm1, %v2301_v25, %v2304_v7  ;;  %v2326_v30 = vsel %vm2314_vm1, %v2304_v7, %v2307_v29 }
 0x2c0   :  { %v2320_v28 = vsel %vm2316_vm3, %v2304_v7, %v2319_v62  ;;  %v2323_v19 = vsel %vm2317_vm4, %v2310_v14, 920167782  ;;  %v2327_v15 = vsel %vm2317_vm4, %v2313_v5, 1326507024  ;;  %v1990_v60 = vshll.u32 %v9375_v22, %v1984_v33 }
 0x2c1   :  { %v2324_v57 = vsel %vm2316_vm3, %v2307_v29, %v2323_v19  ;;  %v2328_v26 = vsel %vm2316_vm3, %v2310_v14, %v2327_v15  ;;  %v2321_v37 = vsel %vm2315_vm8, %v2318_v11, %v2320_v28  ;;  %v1991_v50 = vshrl.u32 %v9376_v41, %v1985_v59 }
 0x2c2   :  { %v2325_v1 = vsel %vm2315_vm8, %v2322_v4, %v2324_v57  ;;  %v2329_v20 = vsel %vm2315_vm8, %v2326_v30, %v2328_v26  ;;  %v1989_v48 = vor.u32 %v1988_v21, %v1987_v31  ;;  %v1993_v39 = vshll.u32 %v9376_v41, %v1984_v33 }
 0x2c3   :  { %v6902_v42 = vmul.u32.u64.low %v6871_v51, %v2329_v20  ;;  %v6903_v6 = vmul.u32.u64.high %v6871_v51, %v2329_v20, %v6902_v42  ;;  %v6906_v63 = vmul.u32.u64.low %v6871_v51, %v2325_v1  ;;  %v6907_v13 = vmul.u32.u64.high %v6871_v51, %v2325_v1, %v6906_v63 }
 0x2c4   :  { %v1992_v27 = vor.u32 %v1991_v50, %v1990_v60  ;;  %v1994_v36 = vshrl.u32 %v9373_v49, %v1985_v59  ;;  %v1996_v47 = vshll.u32 %v9373_v49, %v1984_v33  ;;  %v1997_v40 = vshrl.u32 %v9371_v45, %v1985_v59 }
 0x2c5   :  { %v2000_v44 = vshrl.u32 %v9372_v58, %v1985_v59  ;;  %v6915_v46 = vshll.u32 %v1978_v9, 8  ;;  %v2337_v18 = vmul.u32 %v6871_v51, %v2321_v37  ;;  %v1986_v32 = vshrl.u32 %v9374_v16, %v1985_v59 }
 0x2c6   :  { %v1995_v38 = vor.u32 %v1994_v36, %v1993_v39  ;;  %v1999_v54 = vshll.u32 %v9371_v45, %v1984_v33  ;;  %vm2339_vm2 = vc.u32 %v6903_v6, %v6906_v63  ;;  %v2340_v23 = vadd.s32 1, %v6907_v13 }
 0x2c7   :  { %v1998_v34 = vor.u32 %v1997_v40, %v1996_v47  ;;  %vm2002_vm6 = vcmp.lt.s32.totalorder %v6879_v53, 1  ;;  %vm2003_vm7 = vcmp.lt.s32.totalorder %v6879_v53, 2  ;;  %vm2005_vm9 = vcmp.lt.s32.totalorder %v6879_v53, 4  ;;  %v1606_v9 = vpop.f32.mrb[0].mxu0 }
 0x2c8   :  { %v2001_v0 = vor.u32 %v2000_v44, %v1999_v54  ;;  %v2010_v51 = vsel %vm2002_vm6, %v1989_v48, %v1992_v27  ;;  %v2341_v55 = vsel %vm2339_vm2, %v2340_v23, %v6907_v13  ;;  %vm2004_vm10 = vcmp.lt.s32.totalorder %v6879_v53, 3  ;;  %v1608_v59 = vpop.f32.mrb[1].mxu0 }
 0x2c9   :  { %v2007_v33 = vsel %vm2005_vm9, %v1995_v38, 2102212464  ;;  %v2011_v25 = vsel %vm2005_vm9, %v1998_v34, 920167782  ;;  %v1607_v7 = vadd.f32 %v1606_v9, %v6844_v12  ;;  %v2342_v29 = vadd.s32 %v2341_v55, %v2337_v18 }
 0x2ca   :  { %v2012_v14 = vsel %vm2004_vm10, %v1995_v38, %v2011_v25  ;;  %v2014_v5 = vsel %vm2002_vm6, %v1992_v27, %v1995_v38  ;;  %v1609_v11 = vadd.f32 %v1608_v59, %v6844_v12  ;;  %v2006_v62 = vsel %vm2002_vm6, %v1986_v32, %v1989_v48 }
 0x2cb   :  { %v2013_v4 = vsel %vm2003_vm7, %v2010_v51, %v2012_v14  ;;  %v2015_v30 = vsel %vm2005_vm9, %v2001_v0, 1326507024  ;;  %v1714_v28 = vand.u32 2147483647, %v1607_v7  ;;  %v2343_v19 = vadd.s32 536870912, %v2342_v29  ;;  %v1612_v12 = vpop.f32.mrb[2].mxu0 }
 0x2cc   :  { %v2008_v15 = vsel %vm2004_vm10, %v1992_v27, %v2007_v33  ;;  %v2016_v31 = vsel %vm2004_vm10, %v1998_v34, %v2015_v30  ;;  %v1715_v57 = vand.u32 2147483647, %v1609_v11  ;;  %v6951_v42 = vpop.f32.mrb[3].mxu0  ;;  %v6954_v48 = vadd.f32 %v1612_v12, %v6842_v61 }
 0x2cd   :  { %v2017_v26 = vsel %vm2003_vm7, %v2014_v5, %v2016_v31  ;;  %v6941_v21 = vmul.u32.u64.low %v6915_v46, %v2013_v4  ;;  %v6942_v60 = vmul.u32.u64.high %v6915_v46, %v2013_v4, %v6941_v21  ;;  %v1726_v37 = vadd.f32 1.0, %v1714_v28 }
 0x2ce   :  { %v6945_v1 = vshrl.u32 %v2343_v19, 30  ;;  %v6948_v20 = vmul.u32.u64.low %v6915_v46, %v2017_v26  ;;  %v6949_v50 = vmul.u32.u64.high %v6915_v46, %v2017_v26, %v6948_v20  ;;  %v1727_v13 = vadd.f32 1.0, %v1715_v57 }
 0x2cf   :  { %v1738_v27 = vmul.f32 30.0, %v1726_v37  ;;  %v2009_v36 = vsel %vm2003_vm7, %v2006_v62, %v2008_v15  ;;  %v2909_v47 = vand.u32 2139095040, %v6874_v43  ;;  %v2028_v44 = vadd.s32 1, %v6942_v60  ;;  %v6965_v32 = vpop.f32.mrb[4].mxu0 }
 0x2d0   :  { %9441 = vst [vmem:[#allocation17_spill] sm:$0xff] %v6945_v1  ;;  %v2345_v39 = vshll.u32 %v6945_v1, 30  ;;  %v1739_v40 = vmul.f32 30.0, %v1727_v13  ;;  %v6963_v18 = vmul.f32 %v6876_v52, %v6856_v10  ;;  %vm2027_vm13 = vc.u32 %v6949_v50, %v6941_v21  ;;  %v6974_v23 = vpop.f32.mrb[5].mxu0 }
 0x2d1   :  { %v6967_v38 = vmul.f32 %v1738_v27, %v1607_v7  ;;  %v9289_v53 = vand.u32 2147483647, %v6874_v43  ;;  %v2025_v0 = vmul.u32 %v6915_v46, %v2009_v36  ;;  %v2029_v10 = vsel %vm2027_vm13, %v2028_v44, %v6942_v60 }
 0x2d2   :  { %9442 = vst [vmem:[#allocation13_spill] sm:$0xff] %v6963_v18  ;;  %v6969_v54 = vsub.s32 %v2342_v29, %v2345_v39  ;;  %v6976_v34 = vmul.f32 %v1739_v40, %v1609_v11  ;;  %v1717_v52 = vand.u32 2147483647, %v6954_v48  ;;  %v2910_v33 = vshrl.u32 %v2909_v47, 23 }
 0x2d3   :  { %9443 = vst [vmem:[#allocation9_spill] sm:$0xff] %v6967_v38  ;;  %v9294_v51 = vand.u32 2147483647, %v6967_v38  ;;  %v1765_v9 = vand.u32 2139095040, %v6967_v38  ;;  %v2030_v7 = vadd.s32 %v2029_v10, %v2025_v0  ;;  %v6989_v46 = vand.u32 8388607, %v9289_v53 }
 0x2d4   :  { %v2348_v55 = vsub.s32 0, %v6969_v54  ;;  %v1869_v25 = vand.u32 2139095040, %v6976_v34  ;;  %v9291_v14 = vand.u32 2147483647, %v6976_v34  ;;  %v1729_v4 = vadd.f32 1.0, %v1717_v52 }
 0x2d5   :  { %v1766_v29 = vshrl.u32 %v1765_v9, 23  ;;  %v1769_v5 = vand.u32 8388607, %v9294_v51  ;;  %v2031_v62 = vadd.s32 536870912, %v2030_v7  ;;  %v4821_v19 = vadd.s32 4294967169, %v2910_v33 }
 0x2d6   :  { %v4798_v59 = vmin.u32 %v2348_v55, %v6969_v54  ;;  %v1870_v11 = vshrl.u32 %v1869_v25, 23  ;;  %v9290_v15 = vand.u32 2147483647, %v6963_v18  ;;  %v2597_v26 = vand.u32 2139095040, %v6963_v18 }
 0x2d7   :  { %v4777_v30 = vadd.s32 4294967169, %v1766_v29  ;;  %v6994_v57 = vshrl.u32 %v2031_v62, 30  ;;  %v6999_v37 = vand.u32 8388607, %v9291_v14  ;;  %v1770_v13 = vor.u32 8388608, %v1769_v5 }
 0x2d8   :  { %v2350_v28 = vclz %v4798_v59  ;;  %v4781_v31 = vadd.s32 4294967169, %v1870_v11  ;;  %v1741_v36 = vmul.f32 30.0, %v1729_v4  ;;  %v2916_v47 = vadd.s32 1, %v4821_v19  ;;  %v7017_v11 = vpop.f32.mrb[6].mxu0 }
 0x2d9   :  { %9444 = vst [vmem:[#allocation19_spill] sm:$0xff] %v6994_v57  ;;  %v1772_v60 = vadd.s32 1, %v4777_v30  ;;  %v2033_v39 = vshll.u32 %v6994_v57, 30  ;;  %v7005_v40 = vand.u32 8388607, %v9290_v15  ;;  %v2338_v9 = vadd.s32 %v6906_v63, %v6903_v6 }
 0x2da   :  { %v4799_v12 = vadd.s32 4294967294, %v2350_v28  ;;  %v1876_v27 = vadd.s32 1, %v4781_v31  ;;  %v1874_v55 = vor.u32 8388608, %v6999_v37  ;;  %v2598_v33 = vshrl.u32 %v2597_v26, 23 }
 0x2db   :  { %vm1773_vm14 = vcmp.gt.s32.totalorder %v1772_v60, 0  ;;  %v7007_v10 = vsub.s32 %v2030_v7, %v2033_v39  ;;  %v7012_v29 = vshll.u32 %v1770_v13, 8  ;;  %v7015_v5 = vmul.f32 %v1741_v36, %v6954_v48 }
 0x2dc   :  { %vm4800_vm0 = vcmp.lt.s32.totalorder %v4799_v12, 0  ;;  %v1774_v44 = vsel %vm1773_vm14, %v1772_v60, 0  ;;  %vm1877_vm11 = vcmp.gt.s32.totalorder %v1876_v27, 0  ;;  %vm2917_vm12 = vcmp.gt.s32.totalorder %v2916_v47, 0 }
 0x2dd   :  { %v2353_v0 = vsel %vm4800_vm0, 0, %v4799_v12  ;;  %v1776_v52 = vand.u32 31, %v1774_v44  ;;  %v1775_v25 = vshrl.u32 %v1774_v44, 5  ;;  %9445 = vst [vmem:[#allocation14_spill] sm:$0xff] %v7015_v5  ;;  %v1878_v30 = vsel %vm1877_vm11, %v1876_v27, 0 }
 0x2de   :  { %v2354_v59 = vsub.s32 32, %v2353_v0  ;;  %v2355_v7 = vshll.u32 %v6969_v54, %v2353_v0  ;;  %v2358_v4 = vsub.s32 4294967266, %v2353_v0  ;;  %v2036_v19 = vsub.s32 0, %v7007_v10 }
 0x2df   :  { %v1777_v62 = vsub.s32 32, %v1776_v52  ;;  %v1779_v6 = vshll.u32 %v9374_v16, %v1776_v52  ;;  %v1782_v63 = vshll.u32 %v9375_v22, %v1776_v52  ;;  %v1785_v28 = vshll.u32 %v9376_v41, %v1776_v52 }
 0x2e0   :  { %v1788_v60 = vshll.u32 %v9373_v49, %v1776_v52  ;;  %v1791_v12 = vshll.u32 %v9371_v45, %v1776_v52  ;;  %vm1794_vm15 = vcmp.lt.s32.totalorder %v1775_v25, 1  ;;  %vm1796_vm1 = vcmp.lt.s32.totalorder %v1775_v25, 3 }
 0x2e1   :  { %v1780_v31 = vshrl.u32 %v9375_v22, %v1777_v62  ;;  %v1783_v48 = vshrl.u32 %v9376_v41, %v1777_v62  ;;  %v1786_v26 = vshrl.u32 %v9373_v49, %v1777_v62  ;;  %v1789_v54 = vshrl.u32 %v9371_v45, %v1777_v62 }
 0x2e2   :  { %v1792_v37 = vshrl.u32 %v9372_v58, %v1777_v62  ;;  %v1778_v13 = vshrl.u32 %v9374_v16, %v1777_v62  ;;  %vm1797_vm8 = vcmp.lt.s32.totalorder %v1775_v25, 4  ;;  %vm1795_vm3 = vcmp.lt.s32.totalorder %v1775_v25, 2 }
 0x2e3   :  { %v1781_v27 = vor.u32 %v1780_v31, %v1779_v6  ;;  %v1784_v39 = vor.u32 %v1783_v48, %v1782_v63  ;;  %v1787_v36 = vor.u32 %v1786_v26, %v1785_v28  ;;  %v1790_v44 = vor.u32 %v1789_v54, %v1788_v60 }
 0x2e4   :  { %v1793_v0 = vor.u32 %v1792_v37, %v1791_v12  ;;  %v2356_v1 = vshrl.u32 %v2338_v9, %v2354_v59  ;;  %v2359_v18 = vadd.s32 127, %v2358_v4  ;;  %v7032_v28 = vshrl.u32 %v1878_v30, 5 }
 0x2e5   :  { %v1798_v2 = vsel %vm1794_vm15, %v1778_v13, %v1781_v27  ;;  %v1799_v53 = vsel %vm1797_vm8, %v1787_v36, 2102212464  ;;  %v1802_v15 = vsel %vm1794_vm15, %v1781_v27, %v1784_v39  ;;  %v1806_v14 = vsel %vm1794_vm15, %v1784_v39, %v1787_v36 }
 0x2e6   :  { %v1800_v35 = vsel %vm1796_vm1, %v1784_v39, %v1799_v53  ;;  %v1803_v17 = vsel %vm1797_vm8, %v1790_v44, 920167782  ;;  %v1807_v52 = vsel %vm1797_vm8, %v1793_v0, 1326507024  ;;  %v1880_v53 = vand.u32 31, %v1878_v30 }
 0x2e7   :  { %v1804_v51 = vsel %vm1796_vm1, %v1787_v36, %v1803_v17  ;;  %v1808_v20 = vsel %vm1796_vm1, %v1790_v44, %v1807_v52  ;;  %v1801_v62 = vsel %vm1795_vm3, %v1798_v2, %v1800_v35  ;;  %v7044_v17 = vsel %vm2917_vm12, %v2916_v47, 0  ;;  %v7060_v47 = vpop.f32.mrb[7].mxu0 }
 0x2e8   :  { %v1805_v6 = vsel %vm1795_vm3, %v1802_v15, %v1804_v51  ;;  %v1809_v63 = vsel %vm1795_vm3, %v1806_v14, %v1808_v20  ;;  %v9446_v9 = vor.u32 8388608, %v6989_v46  ;;  %v7050_v35 = vadd.s32 4294967169, %v2598_v33  ;;  %9447 = vst [vmem:[#allocation16_spill] sm:$0xff] %v7060_v47 }
 0x2e9   :  { %v7035_v31 = vmul.u32.u64.low %v7012_v29, %v1809_v63  ;;  %v7036_v48 = vmul.u32.u64.high %v7012_v29, %v1809_v63, %v7035_v31  ;;  %v7039_v26 = vmul.u32.u64.low %v7012_v29, %v1805_v6  ;;  %v7040_v60 = vmul.u32.u64.high %v7012_v29, %v1805_v6, %v7039_v26 }
 0x2ea   :  { %v7048_v2 = vshll.u32 %v9446_v9, 8  ;;  %v7052_v51 = vor.u32 %v2356_v1, %v2355_v7  ;;  %v2360_v14 = vshll.u32 %v2359_v18, 23  ;;  %v7054_v15 = vshll.u32 %v1874_v55, 8 }
 0x2eb   :  { %v2077_v20 = vand.u32 2139095040, %v7015_v5  ;;  %v1817_v25 = vmul.u32 %v7012_v29, %v1801_v62  ;;  %v1881_v59 = vsub.s32 32, %v1880_v53  ;;  %vm1898_vm4 = vcmp.lt.s32.totalorder %v7032_v28, 1 }
 0x2ec   :  { %vm1899_vm2 = vcmp.lt.s32.totalorder %v7032_v28, 2  ;;  %vm1819_vm6 = vc.u32 %v7036_v48, %v7039_v26  ;;  %v1820_v1 = vadd.s32 1, %v7040_v60  ;;  %v1883_v18 = vshll.u32 %v9374_v16, %v1880_v53 }
 0x2ed   :  { %v4786_v46 = vmin.u32 %v2036_v19, %v7007_v10  ;;  %v1884_v55 = vshrl.u32 %v9375_v22, %v1881_v59  ;;  %v1886_v33 = vshll.u32 %v9375_v22, %v1880_v53  ;;  %v1887_v29 = vshrl.u32 %v9376_v41, %v1881_v59 }
 0x2ee   :  { %v1889_v7 = vshll.u32 %v9376_v41, %v1880_v53  ;;  %v1821_v4 = vsel %vm1819_vm6, %v1820_v1, %v7040_v60  ;;  %v1890_v30 = vshrl.u32 %v9373_v49, %v1881_v59  ;;  %v1892_v54 = vshll.u32 %v9373_v49, %v1880_v53 }
 0x2ef   :  { %v1893_v12 = vshrl.u32 %v9371_v45, %v1881_v59  ;;  %v1822_v37 = vadd.s32 %v1821_v4, %v1817_v25  ;;  %v1885_v13 = vor.u32 %v1884_v55, %v1883_v18  ;;  %v1888_v27 = vor.u32 %v1887_v29, %v1886_v33 }
 0x2f0   :  { %v2078_v19 = vshrl.u32 %v2077_v20, 23  ;;  %v1891_v39 = vor.u32 %v1890_v30, %v1889_v7  ;;  %v1895_v44 = vshll.u32 %v9371_v45, %v1880_v53  ;;  %v1896_v0 = vshrl.u32 %v9372_v58, %v1881_v59 }
 0x2f1   :  { %v1894_v36 = vor.u32 %v1893_v12, %v1892_v54  ;;  %v1823_v52 = vadd.s32 536870912, %v1822_v37  ;;  %vm1900_vm7 = vcmp.lt.s32.totalorder %v7032_v28, 3  ;;  %vm1901_vm9 = vcmp.lt.s32.totalorder %v7032_v28, 4 }
 0x2f2   :  { %v1906_v62 = vsel %vm1898_vm4, %v1885_v13, %v1888_v27  ;;  %v1882_v6 = vshrl.u32 %v9374_v16, %v1881_v59  ;;  %v1897_v63 = vor.u32 %v1896_v0, %v1895_v44  ;;  %v1903_v31 = vsel %vm1901_vm9, %v1891_v39, 2102212464 }
 0x2f3   :  { %v1907_v60 = vsel %vm1901_vm9, %v1894_v36, 920167782  ;;  %v7082_v9 = vshrl.u32 %v1823_v52, 30  ;;  %v1910_v20 = vsel %vm1898_vm4, %v1888_v27, %v1891_v39  ;;  %v2038_v25 = vclz %v4786_v46 }
 0x2f4   :  { %v1908_v53 = vsel %vm1900_vm7, %v1891_v39, %v1907_v60  ;;  %v2361_v1 = vor.u32 4788187, %v2360_v14  ;;  %v1911_v55 = vsel %vm1901_vm9, %v1897_v63, 1326507024  ;;  %v4789_v33 = vadd.s32 4294967169, %v2078_v19 }
 0x2f5   :  { %v1909_v18 = vsel %vm1899_vm2, %v1906_v62, %v1908_v53  ;;  %v1825_v59 = vshll.u32 %v7082_v9, 30  ;;  %v1902_v29 = vsel %vm1898_vm4, %v1882_v6, %v1885_v13  ;;  %v1904_v7 = vsel %vm1900_vm7, %v1888_v27, %v1903_v31 }
 0x2f6   :  { %v1912_v4 = vsel %vm1900_vm7, %v1894_v36, %v1911_v55  ;;  %v7100_v14 = vmul.u32.u64.low %v7054_v15, %v1909_v18  ;;  %v7101_v30 = vmul.u32.u64.high %v7054_v15, %v1909_v18, %v7100_v14  ;;  %v4787_v54 = vadd.s32 4294967294, %v2038_v25 }
 0x2f7   :  { %v1913_v46 = vsel %vm1899_vm2, %v1910_v20, %v1912_v4  ;;  %v7104_v12 = vsub.s32 %v1822_v37, %v1825_v59  ;;  %v7111_v27 = vand.u32 31, %v7044_v17  ;;  %v2362_v39 = vand.u32 2147483647, %v2361_v1 }
 0x2f8   :  { %v7107_v19 = vmul.u32.u64.low %v7054_v15, %v1913_v46  ;;  %v7108_v13 = vmul.u32.u64.high %v7054_v15, %v1913_v46, %v7107_v19  ;;  %v1905_v36 = vsel %vm1899_vm2, %v1902_v29, %v1904_v7  ;;  %vm4788_vm10 = vcmp.lt.s32.totalorder %v4787_v54, 0 }
 0x2f9   :  { %v2084_v44 = vadd.s32 1, %v4789_v33  ;;  %v1828_v0 = vsub.s32 0, %v7104_v12  ;;  %v7116_v52 = vsel %vm4788_vm10, 0, %v4787_v54  ;;  %v7120_v37 = vadd.f32 %v6951_v42, %v6842_v61 }
 0x2fa   :  { %v2364_v6 = vcvt.s32.f32 %v7052_v51  ;;  %v1924_v63 = vadd.s32 1, %v7101_v30  ;;  %v2046_v31 = vsub.s32 4294967266, %v7116_v52  ;;  %v9299_v28 = vand.u32 2147483647, %v7015_v5 }
 0x2fb   :  { %v4778_v60 = vmin.u32 %v1828_v0, %v7104_v12  ;;  %v1921_v53 = vmul.u32 %v7054_v15, %v1905_v36  ;;  %vm1923_vm13 = vc.u32 %v7108_v13, %v7100_v14  ;;  %v7132_v61 = vsub.s32 32, %v7111_v27 }
 0x2fc   :  { %v7134_v42 = vmul.f32 %v2364_v6, %v2362_v39  ;;  %v1925_v51 = vsel %vm1923_vm13, %v1924_v63, %v7101_v30  ;;  %vm2085_vm14 = vcmp.gt.s32.totalorder %v2084_v44, 0  ;;  %v7138_v20 = vshrl.u32 %v7044_v17, 5 }
 0x2fd   :  { %v1830_v25 = vclz %v4778_v60  ;;  %v1926_v1 = vadd.s32 %v1925_v51, %v1921_v53  ;;  %v2026_v18 = vadd.s32 %v6941_v21, %v6949_v50  ;;  %v2086_v15 = vsel %vm2085_vm14, %v2084_v44, 0 }
 0x2fe   :  { %v2042_v55 = vsub.s32 32, %v7116_v52  ;;  %v2047_v33 = vadd.s32 127, %v2046_v31  ;;  %v2081_v59 = vand.u32 8388607, %v9299_v28  ;;  %v2088_v29 = vand.u32 31, %v2086_v15 }
 0x2ff   :  { %v1818_v7 = vadd.s32 %v7039_v26, %v7036_v48  ;;  %v4779_v4 = vadd.s32 4294967294, %v1830_v25  ;;  %v1927_v46 = vadd.s32 536870912, %v1926_v1  ;;  %v7149_v17 = vshrl.u32 %v9374_v16, %v7132_v61 }
 0x300   :  { %v2089_v21 = vsub.s32 32, %v2088_v29  ;;  %v7154_v50 = vshll.u32 %v9374_v16, %v7111_v27  ;;  %v7158_v54 = vshrl.u32 %v9375_v22, %v7132_v61  ;;  %v2043_v48 = vshll.u32 %v7007_v10, %v7116_v52 }
 0x301   :  { %vm4780_vm0 = vcmp.lt.s32.totalorder %v4779_v4, 0  ;;  %v7160_v19 = vshrl.u32 %v1927_v46, 30  ;;  %v7166_v26 = vshll.u32 %v9375_v22, %v7111_v27  ;;  %v2044_v36 = vshrl.u32 %v2026_v18, %v2042_v55 }
 0x302   :  { %v1833_v39 = vsel %vm4780_vm0, 0, %v4779_v4  ;;  %v2048_v44 = vshll.u32 %v2047_v33, 23  ;;  %v2082_v0 = vor.u32 8388608, %v2081_v59  ;;  %v2092_v60 = vshrl.u32 %v9375_v22, %v2089_v21 }
 0x303   :  { %9448 = vst [vmem:[#allocation10_spill] sm:$0xff] %v7160_v19  ;;  %v1834_v6 = vsub.s32 32, %v1833_v39  ;;  %v1838_v63 = vsub.s32 4294967266, %v1833_v39  ;;  %v1929_v31 = vshll.u32 %v7160_v19, 30  ;;  %v7170_v53 = vshrl.u32 %v2086_v15, 5 }
 0x304   :  { %v2091_v51 = vshll.u32 %v9374_v16, %v2088_v29  ;;  %v2095_v10 = vshrl.u32 %v9376_v41, %v2089_v21  ;;  %v2098_v52 = vshrl.u32 %v9373_v49, %v2089_v21  ;;  %v2094_v18 = vshll.u32 %v9375_v22, %v2088_v29 }
 0x305   :  { %v1839_v25 = vadd.s32 127, %v1838_v63  ;;  %v7175_v46 = vsub.s32 %v1926_v1, %v1929_v31  ;;  %v2097_v55 = vshll.u32 %v9376_v41, %v2088_v29  ;;  %v1835_v33 = vshll.u32 %v7104_v12, %v1833_v39 }
 0x306   :  { %v1836_v59 = vshrl.u32 %v1818_v7, %v1834_v6  ;;  %v2100_v4 = vshll.u32 %v9373_v49, %v2088_v29  ;;  %v2101_v15 = vshrl.u32 %v9371_v45, %v2089_v21  ;;  %v2093_v30 = vor.u32 %v2092_v60, %v2091_v51 }
 0x307   :  { %v1840_v28 = vshll.u32 %v1839_v25, 23  ;;  %v1932_v62 = vsub.s32 0, %v7175_v46  ;;  %v2096_v19 = vor.u32 %v2095_v10, %v2094_v18  ;;  %v2099_v57 = vor.u32 %v2098_v52, %v2097_v55 }
 0x308   :  { %v2102_v63 = vor.u32 %v2101_v15, %v2100_v4  ;;  %v2103_v1 = vshll.u32 %v9371_v45, %v2088_v29  ;;  %v2104_v31 = vshrl.u32 %v9372_v58, %v2089_v21  ;;  %v7186_v47 = vor.u32 %v2044_v36, %v2043_v48 }
 0x309   :  { %v4782_v43 = vmin.u32 %v1932_v62, %v7175_v46  ;;  %v7188_v12 = vshll.u32 %v2082_v0, 8  ;;  %v2927_v7 = vshrl.u32 %v9376_v41, %v7132_v61  ;;  %v1837_v39 = vor.u32 %v1836_v59, %v1835_v33 }
 0x30a   :  { %v1841_v6 = vor.u32 4788187, %v1840_v28  ;;  %v7192_v25 = vor.u32 4788187, %v2048_v44  ;;  %v2105_v60 = vor.u32 %v2104_v31, %v2103_v1  ;;  %vm2106_vm11 = vcmp.lt.s32.totalorder %v7170_v53, 1 }
 0x30b   :  { %v1934_v51 = vclz %v4782_v43  ;;  %vm2108_vm12 = vcmp.lt.s32.totalorder %v7170_v53, 3  ;;  %vm2109_vm15 = vcmp.lt.s32.totalorder %v7170_v53, 4  ;;  %v2114_v62 = vsel %vm2106_vm11, %v2093_v30, %v2096_v19 }
 0x30c   :  { %v2115_v29 = vsel %vm2109_vm15, %v2102_v63, 920167782  ;;  %v2118_v48 = vsel %vm2106_vm11, %v2096_v19, %v2099_v57  ;;  %v2119_v36 = vsel %vm2109_vm15, %v2105_v60, 1326507024  ;;  %v2090_v28 = vshrl.u32 %v9374_v16, %v2089_v21 }
 0x30d   :  { %v4783_v0 = vadd.s32 4294967294, %v1934_v51  ;;  %v2111_v44 = vsel %vm2109_vm15, %v2099_v57, 2102212464  ;;  %v2116_v43 = vsel %vm2108_vm12, %v2099_v57, %v2115_v29  ;;  %v1842_v10 = vand.u32 2147483647, %v1841_v6 }
 0x30e   :  { %v1844_v52 = vcvt.s32.f32 %v1837_v39  ;;  %vm2107_vm1 = vcmp.lt.s32.totalorder %v7170_v53, 2  ;;  %v2120_v18 = vsel %vm2108_vm12, %v2102_v63, %v2119_v36  ;;  %v2110_v55 = vsel %vm2106_vm11, %v2090_v28, %v2093_v30 }
 0x30f   :  { %vm4784_vm8 = vcmp.lt.s32.totalorder %v4783_v0, 0  ;;  %v2117_v33 = vsel %vm2107_vm1, %v2114_v62, %v2116_v43  ;;  %v2121_v21 = vsel %vm2107_vm1, %v2118_v48, %v2120_v18  ;;  %v2112_v57 = vsel %vm2108_vm12, %v2096_v19, %v2111_v44 }
 0x310   :  { %v1937_v59 = vsel %vm4784_vm8, 0, %v4783_v0  ;;  %v7216_v4 = vmul.u32.u64.low %v7188_v12, %v2121_v21  ;;  %v7217_v15 = vmul.u32.u64.high %v7188_v12, %v2121_v21, %v7216_v4  ;;  %v1922_v63 = vadd.s32 %v7100_v14, %v7108_v13 }
 0x311   :  { %v1942_v1 = vsub.s32 4294967266, %v1937_v59  ;;  %v2925_v30 = vor.u32 %v7158_v54, %v7154_v50  ;;  %v2930_v31 = vshrl.u32 %v9373_v49, %v7132_v61  ;;  %v1845_v39 = vmul.f32 %v1844_v52, %v1842_v10 }
 0x312   :  { %v2052_v6 = vcvt.s32.f32 %v7186_v47  ;;  %v7227_v60 = vmul.u32.u64.low %v7188_v12, %v2117_v33  ;;  %v7228_v19 = vmul.u32.u64.high %v7188_v12, %v2117_v33, %v7227_v60  ;;  %v2050_v62 = vand.u32 2147483647, %v7192_v25 }
 0x313   :  { %v1943_v51 = vadd.s32 127, %v1942_v1  ;;  %v2113_v14 = vsel %vm2107_vm1, %v2110_v55, %v2112_v57  ;;  %v2929_v13 = vshll.u32 %v9376_v41, %v7111_v27  ;;  %v1938_v50 = vsub.s32 32, %v1937_v59 }
 0x314   :  { %v2928_v54 = vor.u32 %v2927_v7, %v7166_v26  ;;  %v2932_v47 = vshll.u32 %v9373_v49, %v7111_v27  ;;  %v2933_v29 = vshrl.u32 %v9371_v45, %v7132_v61  ;;  %vm2131_vm3 = vc.u32 %v7217_v15, %v7227_v60 }
 0x315   :  { %v2931_v48 = vor.u32 %v2930_v31, %v2929_v13  ;;  %v2935_v53 = vshll.u32 %v9371_v45, %v7111_v27  ;;  %v2936_v25 = vshrl.u32 %v9372_v58, %v7132_v61  ;;  %vm1764_vm4 = vcmp.lt.s32.totalorder %v6967_v38, 0 }
 0x316   :  { %v1846_v36 = vxor.u32 2147483648, %v1845_v39  ;;  %v2129_v26 = vmul.u32 %v7188_v12, %v2113_v14  ;;  %v2132_v7 = vadd.s32 1, %v7228_v19  ;;  %v2934_v0 = vor.u32 %v2933_v29, %v2932_v47 }
 0x317   :  { %v1939_v28 = vshll.u32 %v7175_v46, %v1937_v59  ;;  %v1944_v44 = vshll.u32 %v1943_v51, 23  ;;  %v2937_v43 = vor.u32 %v2936_v25, %v2935_v53  ;;  %vm2938_vm2 = vcmp.lt.s32.totalorder %v7138_v20, 1 }
 0x318   :  { %v1940_v10 = vshrl.u32 %v1922_v63, %v1938_v50  ;;  %v2133_v27 = vsel %vm2131_vm3, %v2132_v7, %v7228_v19  ;;  %vm2941_vm6 = vcmp.lt.s32.totalorder %v7138_v20, 4  ;;  %v2946_v61 = vsel %vm2938_vm2, %v2925_v30, %v2928_v54 }
 0x319   :  { %v9449_v52 = vand.u32 2147483647, %v6967_v38  ;;  %v2134_v18 = vadd.s32 %v2133_v27, %v2129_v26  ;;  %vm2940_vm9 = vcmp.lt.s32.totalorder %v7138_v20, 3  ;;  %v2943_v46 = vsel %vm2941_vm6, %v2931_v48, 2102212464 }
 0x31a   :  { %v2947_v55 = vsel %vm2941_vm6, %v2934_v0, 920167782  ;;  %vm2939_vm10 = vcmp.lt.s32.totalorder %v7138_v20, 2  ;;  %v2950_v21 = vsel %vm2938_vm2, %v2928_v54, %v2931_v48  ;;  %v2951_v59 = vsel %vm2941_vm6, %v2937_v43, 1326507024 }
 0x31b   :  { %vm7258_vm7 = vcmp.le.f32.partialorder %v9449_v52, 0.7853982  ;;  %v2948_v33 = vsel %vm2940_vm9, %v2931_v48, %v2947_v55  ;;  %vm2284_vm13 = vcmp.lt.s32.totalorder %v6853_v56, 0  ;;  %v1945_v57 = vor.u32 4788187, %v1944_v44 }
 0x31c   :  { %v2135_v4 = vadd.s32 536870912, %v2134_v18  ;;  %v2942_v63 = vsel %vm2938_vm2, %v7149_v17, %v2925_v30  ;;  %v2949_v1 = vsel %vm2939_vm10, %v2946_v61, %v2948_v33  ;;  %vm1972_vm14 = vcmp.lt.s32.totalorder %v6858_v8, 0 }
 0x31d   :  { %v2944_v31 = vsel %vm2940_vm9, %v2928_v54, %v2943_v46  ;;  %v2952_v19 = vsel %vm2940_vm9, %v2934_v0, %v2951_v59  ;;  %v7274_v51 = vmul.u32.u64.low %v7048_v2, %v2949_v1  ;;  %v7275_v14 = vmul.u32.u64.high %v7048_v2, %v2949_v1, %v7274_v51 }
 0x31e   :  { %v2053_v13 = vmul.f32 %v2052_v6, %v2050_v62  ;;  %v7277_v50 = vshrl.u32 %v2135_v4, 30  ;;  %v2953_v47 = vsel %vm2939_vm10, %v2950_v21, %v2952_v19  ;;  %v1718_v29 = vand.u32 2147483647, %v7120_v37 }
 0x31f   :  { %v1941_v17 = vor.u32 %v1940_v10, %v1939_v28  ;;  %v7283_v30 = vmul.u32.u64.low %v7048_v2, %v2953_v47  ;;  %v7284_v48 = vmul.u32.u64.high %v7048_v2, %v2953_v47, %v7283_v30  ;;  %v2604_v54 = vadd.s32 1, %v7050_v35 }
 0x320   :  { %v1847_v53 = vsel %vm1764_vm4, %v1846_v36, %v1845_v39  ;;  %v2137_v25 = vshll.u32 %v7277_v50, 30  ;;  %v2945_v6 = vsel %vm2939_vm10, %v2942_v63, %v2944_v31  ;;  %v1730_v62 = vadd.f32 1.0, %v1718_v29 }
 0x321   :  { %v1848_v26 = vsub.s32 4, %v7082_v9  ;;  %v1946_v7 = vand.u32 2147483647, %v1945_v57  ;;  %v2964_v0 = vadd.s32 1, %v7275_v14  ;;  %vm2605_vm0 = vcmp.gt.s32.totalorder %v2604_v54, 0 }
 0x322   :  { %v2054_v28 = vxor.u32 2147483648, %v2053_v13  ;;  %v7294_v44 = vsub.s32 %v2134_v18, %v2137_v25  ;;  %v1742_v43 = vmul.f32 30.0, %v1730_v62  ;;  %v2606_v35 = vsel %vm2605_vm0, %v2604_v54, 0 }
 0x323   :  { %v1850_v39 = vsel %vm7258_vm7, %v6967_v38, %v1847_v53  ;;  %v1948_v36 = vcvt.s32.f32 %v1941_v17  ;;  %v2961_v20 = vmul.u32 %v7048_v2, %v2945_v6  ;;  %vm2963_vm11 = vc.u32 %v7284_v48, %v7274_v51 }
 0x324   :  { %v2140_v10 = vsub.s32 0, %v7294_v44  ;;  %v2965_v27 = vsel %vm2963_vm11, %v2964_v0, %v7275_v14  ;;  %v7304_v61 = vmul.f32 %v1742_v43, %v7120_v37  ;;  %v2608_v52 = vand.u32 31, %v2606_v35 }
 0x325   :  { %v7309_v18 = vsel %vm1764_vm4, %v1848_v26, %v7082_v9  ;;  %v9452_v46 = vxor.u32 2147483648, %v7134_v42  ;;  %v7318_v55 = vmul.f32 %v1948_v36, %v1946_v7  ;;  %v2966_v33 = vadd.s32 %v2965_v27, %v2961_v20 }
 0x326   :  { %5200 = vcosq.f32 %v1850_v39  ;;  %v7322_v37 = vsel %vm1972_vm14, %v2054_v28, %v2053_v13  ;;  %v4790_v21 = vmin.u32 %v2140_v10, %v7294_v44  ;;  %v2181_v9 = vand.u32 2139095040, %v7304_v61 }
 0x327   :  { %v7316_v2 = vsel %vm2284_vm13, %v9452_v46, %v7134_v42  ;;  %5202 = vsinq.f32 %v1850_v39  ;;  %v2967_v59 = vadd.s32 536870912, %v2966_v33  ;;  %v9306_v57 = vand.u32 2147483647, %v7304_v61 }
 0x328   :  { %v7329_v42 = vadd.f32 %v6965_v32, %v6851_v24  ;;  %v2130_v4 = vadd.s32 %v7227_v60, %v7217_v15  ;;  %v2142_v63 = vclz %v4790_v21  ;;  %v2182_v1 = vshrl.u32 %v2181_v9, 23 }
 0x329   :  { %v2609_v31 = vsub.s32 32, %v2608_v52  ;;  %v7334_v14 = vshrl.u32 %v2967_v59, 30  ;;  %v9453_v13 = vor.u32 8388608, %v7005_v40  ;;  %v7342_v29 = vadd.f32 %v6974_v23, %v6851_v24 }
 0x32a   :  { %v4791_v32 = vadd.s32 4294967294, %v2142_v63  ;;  %v7345_v17 = vadd.s32 %v7274_v51, %v7284_v48  ;;  %v4793_v15 = vadd.s32 4294967169, %v2182_v1  ;;  %v7347_v60 = vshrl.u32 %v2606_v35, 5 }
 0x32b   :  { %v7338_v47 = vshll.u32 %v9453_v13, 8  ;;  %v2969_v30 = vshll.u32 %v7334_v14, 30  ;;  %v2185_v54 = vand.u32 8388607, %v9306_v57  ;;  %v2611_v40 = vshll.u32 %v9374_v16, %v2608_v52 }
 0x32c   :  { %vm4792_vm12 = vcmp.lt.s32.totalorder %v4791_v32, 0  ;;  %v2188_v25 = vadd.s32 1, %v4793_v15  ;;  %v2612_v24 = vshrl.u32 %v9375_v22, %v2609_v31  ;;  %v2614_v23 = vshll.u32 %v9375_v22, %v2608_v52 }
 0x32d   :  { %v2145_v51 = vsel %vm4792_vm12, 0, %v4791_v32  ;;  %v7356_v48 = vsub.s32 %v2966_v33, %v2969_v30  ;;  %v2615_v6 = vshrl.u32 %v9376_v41, %v2609_v31  ;;  %v2618_v62 = vshrl.u32 %v9373_v49, %v2609_v31 }
 0x32e   :  { %v2146_v26 = vsub.s32 32, %v2145_v51  ;;  %v2150_v7 = vsub.s32 4294967266, %v2145_v51  ;;  %vm2189_vm15 = vcmp.gt.s32.totalorder %v2188_v25, 0  ;;  %v2610_v0 = vshrl.u32 %v9374_v16, %v2609_v31 }
 0x32f   :  { %v2972_v28 = vsub.s32 0, %v7356_v48  ;;  %v2186_v43 = vor.u32 8388608, %v2185_v54  ;;  %v2190_v35 = vsel %vm2189_vm15, %v2188_v25, 0  ;;  %v2617_v39 = vshll.u32 %v9376_v41, %v2608_v52 }
 0x330   :  { %v7363_v36 = vpop.eup %5200  ;;  %v2148_v20 = vshrl.u32 %v2130_v4, %v2146_v26  ;;  %v2151_v10 = vadd.s32 127, %v2150_v7  ;;  %v2192_v27 = vand.u32 31, %v2190_v35  ;;  %v7365_v46 = vor.u32 %v2612_v24, %v2611_v40 }
 0x331   :  { %9454 = vst [vmem:[#allocation22_spill] sm:$0xff] %v7363_v36  ;;  %v7367_v33 = vpop.eup %5202  ;;  %v4822_v21 = vmin.u32 %v2972_v28, %v7356_v48  ;;  %v7370_v9 = vor.u32 %v2615_v6, %v2614_v23  ;;  %v7372_v59 = vor.u32 %v2618_v62, %v2617_v39  ;;  %v2620_v63 = vshll.u32 %v9373_v49, %v2608_v52 }
 0x332   :  { %v2147_v1 = vshll.u32 %v7294_v44, %v2145_v51  ;;  %v2152_v13 = vshll.u32 %v2151_v10, 23  ;;  %v2193_v32 = vsub.s32 32, %v2192_v27  ;;  %v2621_v4 = vshrl.u32 %v9371_v45, %v2609_v31 }
 0x333   :  { %v2974_v15 = vclz %v4822_v21  ;;  %v7377_v30 = vshll.u32 %v2186_v43, 8  ;;  %v7380_v54 = vshll.u32 %v9371_v45, %v2608_v52  ;;  %v7383_v40 = vshrl.u32 %v9372_v58, %v2609_v31 }
 0x334   :  { %v2149_v25 = vor.u32 %v2148_v20, %v2147_v1  ;;  %v2153_v24 = vor.u32 4788187, %v2152_v13  ;;  %v2195_v23 = vshll.u32 %v9374_v16, %v2192_v27  ;;  %v2196_v6 = vshrl.u32 %v9375_v22, %v2193_v32 }
 0x335   :  { %v4823_v44 = vadd.s32 4294967294, %v2974_v15  ;;  %v2199_v51 = vshrl.u32 %v9376_v41, %v2193_v32  ;;  %v2202_v62 = vshrl.u32 %v9373_v49, %v2193_v32  ;;  %v2205_v26 = vshrl.u32 %v9371_v45, %v2193_v32 }
 0x336   :  { %v2191_v7 = vshrl.u32 %v2190_v35, 5  ;;  %v2198_v52 = vshll.u32 %v9375_v22, %v2192_v27  ;;  %v2204_v28 = vshll.u32 %v9373_v49, %v2192_v27  ;;  %v2208_v31 = vshrl.u32 %v9372_v58, %v2193_v32 }
 0x337   :  { %v2154_v43 = vand.u32 2147483647, %v2153_v24  ;;  %vm4824_vm1 = vcmp.lt.s32.totalorder %v4823_v44, 0  ;;  %v2197_v39 = vor.u32 %v2196_v6, %v2195_v23  ;;  %v2201_v20 = vshll.u32 %v9376_v41, %v2192_v27 }
 0x338   :  { %v7394_v10 = vsel %vm4824_vm1, 0, %v4823_v44  ;;  %v2200_v21 = vor.u32 %v2199_v51, %v2198_v52  ;;  %v2206_v1 = vor.u32 %v2205_v26, %v2204_v28  ;;  %v2207_v13 = vshll.u32 %v9371_v45, %v2192_v27 }
 0x339   :  { %v2156_v15 = vcvt.s32.f32 %v2149_v25  ;;  %v2982_v35 = vsub.s32 4294967266, %v7394_v10  ;;  %v2203_v57 = vor.u32 %v2202_v62, %v2201_v20  ;;  %v2622_v19 = vor.u32 %v2621_v4, %v2620_v63 }
 0x33a   :  { %v2209_v53 = vor.u32 %v2208_v31, %v2207_v13  ;;  %v2625_v38 = vor.u32 %v7383_v40, %v7380_v54  ;;  %vm2626_vm8 = vcmp.lt.s32.totalorder %v7347_v60, 1  ;;  %vm2628_vm3 = vcmp.lt.s32.totalorder %v7347_v60, 3 }
 0x33b   :  { %v2157_v24 = vmul.f32 %v2156_v15, %v2154_v43  ;;  %vm2210_vm4 = vcmp.lt.s32.totalorder %v2191_v7, 1  ;;  %vm2213_vm2 = vcmp.lt.s32.totalorder %v2191_v7, 4  ;;  %vm2627_vm6 = vcmp.lt.s32.totalorder %v7347_v60, 2 }
 0x33c   :  { %vm2629_vm9 = vcmp.lt.s32.totalorder %v7347_v60, 4  ;;  %v2194_v27 = vshrl.u32 %v9374_v16, %v2193_v32  ;;  %v2218_v25 = vsel %vm2210_vm4, %v2197_v39, %v2200_v21  ;;  %v2219_v63 = vsel %vm2213_vm2, %v2206_v1, 920167782 }
 0x33d   :  { %v2630_v4 = vsel %vm2626_vm8, %v2610_v0, %v7365_v46  ;;  %v2978_v54 = vsub.s32 32, %v7394_v10  ;;  %v2983_v40 = vadd.s32 127, %v2982_v35  ;;  %vm2212_vm10 = vcmp.lt.s32.totalorder %v2191_v7, 3 }
 0x33e   :  { %v2215_v23 = vsel %vm2213_vm2, %v2203_v57, 2102212464  ;;  %vm2211_vm0 = vcmp.lt.s32.totalorder %v2191_v7, 2  ;;  %v2220_v6 = vsel %vm2212_vm10, %v2203_v57, %v2219_v63  ;;  %v2222_v44 = vsel %vm2210_vm4, %v2200_v21, %v2203_v57 }
 0x33f   :  { %v2223_v51 = vsel %vm2213_vm2, %v2209_v53, 1326507024  ;;  %vm2076_vm11 = vcmp.lt.s32.totalorder %v7015_v5, 0  ;;  %v2158_v32 = vxor.u32 2147483648, %v2157_v24  ;;  %v2979_v62 = vshll.u32 %v7356_v48, %v7394_v10 }
 0x340   :  { %v2214_v26 = vsel %vm2210_vm4, %v2194_v27, %v2197_v39  ;;  %v2221_v0 = vsel %vm2211_vm0, %v2218_v25, %v2220_v6  ;;  %v2216_v52 = vsel %vm2212_vm10, %v2200_v21, %v2215_v23  ;;  %v2224_v28 = vsel %vm2212_vm10, %v2206_v1, %v2223_v51 }
 0x341   :  { %v7417_v31 = vmul.u32.u64.low %v7377_v30, %v2221_v0  ;;  %v7418_v43 = vmul.u32.u64.high %v7377_v30, %v2221_v0, %v7417_v31  ;;  %v2984_v20 = vshll.u32 %v2983_v40, 23  ;;  %v2225_v57 = vsel %vm2211_vm0, %v2222_v44, %v2224_v28 }
 0x342   :  { %v2631_v53 = vsel %vm2629_vm9, %v7372_v59, 2102212464  ;;  %v2634_v48 = vsel %vm2626_vm8, %v7365_v46, %v7370_v9  ;;  %v2980_v39 = vshrl.u32 %v7345_v17, %v2978_v54  ;;  %v2635_v1 = vsel %vm2629_vm9, %v2622_v19, 920167782 }
 0x343   :  { %v7431_v10 = vmul.u32.u64.low %v7377_v30, %v2225_v57  ;;  %v7432_v21 = vmul.u32.u64.high %v7377_v30, %v2225_v57, %v7431_v10  ;;  %v2217_v13 = vsel %vm2211_vm0, %v2214_v26, %v2216_v52  ;;  %v2636_v15 = vsel %vm2628_vm3, %v7372_v59, %v2635_v1 }
 0x344   :  { %v2638_v46 = vsel %vm2626_vm8, %v7370_v9, %v7372_v59  ;;  %v2639_v17 = vsel %vm2629_vm9, %v2625_v38, 1326507024  ;;  %v2236_v35 = vadd.s32 1, %v7418_v43  ;;  %v2632_v27 = vsel %vm2628_vm3, %v7370_v9, %v2631_v53 }
 0x345   :  { %v2637_v7 = vsel %vm2627_vm6, %v2634_v48, %v2636_v15  ;;  %v2640_v25 = vsel %vm2628_vm3, %v2622_v19, %v2639_v17  ;;  %v9455_v63 = vand.u32 2147483647, %v7015_v5  ;;  %v2985_v59 = vor.u32 4788187, %v2984_v20 }
 0x346   :  { %v2641_v38 = vsel %vm2627_vm6, %v2638_v46, %v2640_v25  ;;  %v7463_v40 = vmul.u32.u64.low %v7338_v47, %v2637_v7  ;;  %v7464_v23 = vmul.u32.u64.high %v7338_v47, %v2637_v7, %v7463_v40  ;;  %vm1868_vm15 = vcmp.lt.s32.totalorder %v6976_v34, 0 }
 0x347   :  { %vm7456_vm12 = vcmp.le.f32.partialorder %v9455_v63, 0.7853982  ;;  %v2233_v9 = vmul.u32 %v7377_v30, %v2217_v13  ;;  %vm2235_vm1 = vc.u32 %v7432_v21, %v7417_v31  ;;  %v2633_v51 = vsel %vm2627_vm6, %v2630_v4, %v2632_v27 }
 0x348   :  { %v7472_v19 = vmul.u32.u64.low %v7338_v47, %v2641_v38  ;;  %v7473_v6 = vmul.u32.u64.high %v7338_v47, %v2641_v38, %v7472_v19  ;;  %v2237_v44 = vsel %vm2235_vm1, %v2236_v35, %v7418_v43  ;;  %v9458_v26 = vand.u32 2147483647, %v7329_v42  ;;  %v9460_v35 = vld [vmem:[#allocation11_spill] sm:$0xff] }
 0x349   :  { %v1721_v52 = vand.u32 2147483647, %v7342_v29  ;;  %v2159_v30 = vsel %vm2076_vm11, %v2158_v32, %v2157_v24  ;;  %v2981_v28 = vor.u32 %v2980_v39, %v2979_v62  ;;  %v2238_v20 = vadd.s32 %v2237_v44, %v2233_v9 }
 0x34a   :  { %v1732_v0 = vadd.f32 1.0, %v9458_v26  ;;  %v1625_v57 = vadd.f32 %v7017_v11, %v6848_v3  ;;  %v2986_v53 = vand.u32 2147483647, %v2985_v59  ;;  %v2652_v48 = vadd.s32 1, %v7464_v23  ;;  %v9459_v11 = vld [vmem:[#allocation16_spill] sm:$0xff] }
 0x34b   :  { %v1733_v10 = vadd.f32 1.0, %v1721_v52  ;;  %v2239_v60 = vadd.s32 536870912, %v2238_v20  ;;  %v2649_v4 = vmul.u32 %v7338_v47, %v2633_v51  ;;  %vm2651_vm8 = vc.u32 %v7473_v6, %v7463_v40 }
 0x34c   :  { %v1744_v43 = vmul.f32 30.0, %v1732_v0  ;;  %v1723_v1 = vand.u32 2147483647, %v1625_v57  ;;  %v2653_v13 = vsel %vm2651_vm8, %v2652_v48, %v7464_v23  ;;  %v7495_v62 = vadd.f32 %v9459_v11, %v6848_v3 }
 0x34d   :  { %v1745_v32 = vmul.f32 30.0, %v1733_v10  ;;  %v2988_v39 = vcvt.s32.f32 %v2981_v28  ;;  %v7497_v15 = vshrl.u32 %v2239_v60, 30  ;;  %v2654_v46 = vadd.s32 %v2653_v13, %v2649_v4  ;;  %v9462_v60 = vld [vmem:[#allocation19_spill] sm:$0xff] }
 0x34e   :  { %v7491_v24 = vmul.f32 %v1744_v43, %v7329_v42  ;;  %v1735_v17 = vadd.f32 1.0, %v1723_v1  ;;  %v2160_v47 = vsub.s32 4, %v7277_v50  ;;  %vm9322_vm3 = vcmp.lt.s32.totalorder %v9460_v35, 0 }
 0x34f   :  { %v7504_v42 = vmul.f32 %v1745_v32, %v7342_v29  ;;  %v2162_v3 = vsel %vm7456_vm12, %v7015_v5, %v2159_v30  ;;  %v2989_v25 = vmul.f32 %v2988_v39, %v2986_v53  ;;  %v2241_v63 = vshll.u32 %v7497_v15, 30 }
 0x350   :  { %v9310_v27 = vand.u32 2147483647, %v7491_v24  ;;  %v2389_v7 = vand.u32 2139095040, %v7491_v24  ;;  %v2655_v59 = vadd.s32 536870912, %v2654_v46  ;;  %v9461_v38 = vxor.u32 2147483648, %v7318_v55 }
 0x351   :  { %v1747_v19 = vmul.f32 30.0, %v1735_v17  ;;  %v1724_v29 = vand.u32 2147483647, %v7495_v62  ;;  %v7518_v44 = vsub.s32 %v2238_v20, %v2241_v63  ;;  %v2493_v0 = vand.u32 2139095040, %v7504_v42 }
 0x352   :  { %v7515_v23 = vsel %vm1868_vm15, %v9461_v38, %v7318_v55  ;;  %v2390_v9 = vshrl.u32 %v2389_v7, 23  ;;  %v7520_v51 = vshrl.u32 %v2655_v59, 30  ;;  %v2393_v26 = vand.u32 8388607, %v9310_v27 }
 0x353   :  { %v7528_v52 = vsel %vm2076_vm11, %v2160_v47, %v7277_v50  ;;  %5204 = vcosq.f32 %v2162_v3  ;;  %v9309_v30 = vand.u32 2147483647, %v7504_v42  ;;  %v2990_v28 = vxor.u32 2147483648, %v2989_v25 }
 0x354   :  { %v4801_v55 = vadd.s32 4294967169, %v2390_v9  ;;  %v2244_v20 = vsub.s32 0, %v7518_v44  ;;  %v2657_v53 = vshll.u32 %v7520_v51, 30  ;;  %v2494_v48 = vshrl.u32 %v2493_v0, 23 }
 0x355   :  { %5206 = vsinq.f32 %v2162_v3  ;;  %v1736_v10 = vadd.f32 1.0, %v1724_v29  ;;  %v2056_v4 = vsub.s32 4, %v9462_v60  ;;  %v2394_v50 = vor.u32 8388608, %v2393_v26 }
 0x356   :  { %v2396_v43 = vadd.s32 1, %v4801_v55  ;;  %v4794_v1 = vmin.u32 %v2244_v20, %v7518_v44  ;;  %v7535_v13 = vsub.s32 %v2654_v46, %v2657_v53  ;;  %v7537_v32 = vmul.f32 %v1747_v19, %v1625_v57  ;;  %v3010_v57 = vld [vmem:[%s9226_s5] sm:$0xff] }
 0x357   :  { %v2234_v11 = vadd.s32 %v7417_v31, %v7432_v21  ;;  %v4805_v39 = vadd.s32 4294967169, %v2494_v48  ;;  %v7543_v17 = vand.u32 8388607, %v9309_v30  ;;  %v7547_v47 = vsel %vm9322_vm3, %v2990_v28, %v2989_v25  ;;  %4926 = vmatprep.mubr.msk.f32.mxu0 %vm9320_vm5, %v3010_v57 }
 0x358   :  { %vm2397_vm4 = vcmp.gt.s32.totalorder %v2396_v43, 0  ;;  %v2246_v7 = vclz %v4794_v1  ;;  %v2660_v46 = vsub.s32 0, %v7535_v13  ;;  %v2650_v31 = vadd.s32 %v7463_v40, %v7473_v6 }
 0x359   :  { %v2398_v3 = vsel %vm2397_vm4, %v2396_v43, 0  ;;  %v7555_v63 = vmul.f32 30.0, %v1736_v10  ;;  %v7560_v59 = vsel %vm1972_vm14, %v2056_v4, %v9462_v60  ;;  %v7564_v9 = vshll.u32 %v2394_v50, 8 }
 0x35a   :  { %v2400_v21 = vand.u32 31, %v2398_v3  ;;  %v4795_v25 = vadd.s32 4294967294, %v2246_v7  ;;  %v4810_v38 = vmin.u32 %v2660_v46, %v7535_v13  ;;  %v2500_v6 = vadd.s32 1, %v4805_v39 }
 0x35b   :  { %v2701_v26 = vand.u32 2139095040, %v7537_v32  ;;  %v2399_v55 = vshrl.u32 %v2398_v3, 5  ;;  %vm2270_vm5 = vweird.f32 %v7304_v61  ;;  %v2163_v12 = vsel %vm7456_vm12, 0, %v7528_v52 }
 0x35c   :  { %v2401_v29 = vsub.s32 32, %v2400_v21  ;;  %vm4796_vm2 = vcmp.lt.s32.totalorder %v4795_v25, 0  ;;  %v2662_v0 = vclz %v4810_v38  ;;  %v2403_v28 = vshll.u32 %v9374_v16, %v2400_v21 }
 0x35d   :  { %v7570_v20 = vpop.eup %5204  ;;  %v2249_v53 = vsel %vm4796_vm2, 0, %v4795_v25  ;;  %v2406_v43 = vshll.u32 %v9375_v22, %v2400_v21  ;;  %v2409_v50 = vshll.u32 %v9376_v41, %v2400_v21  ;;  %v2412_v3 = vshll.u32 %v9373_v49, %v2400_v21 }
 0x35e   :  { %9463 = vst [vmem:[#allocation20_spill] sm:$0xff] %v7570_v20  ;;  %v2404_v48 = vshrl.u32 %v9375_v22, %v2401_v29  ;;  %v2407_v10 = vshrl.u32 %v9376_v41, %v2401_v29  ;;  %v2250_v60 = vsub.s32 32, %v2249_v53  ;;  %v2254_v4 = vsub.s32 4294967266, %v2249_v53 }
 0x35f   :  { %v4811_v1 = vadd.s32 4294967294, %v2662_v0  ;;  %v7576_v39 = vpop.eup %5206  ;;  %v2251_v7 = vshll.u32 %v7518_v44, %v2249_v53  ;;  %v2410_v46 = vshrl.u32 %v9373_v49, %v2401_v29  ;;  %v2413_v57 = vshrl.u32 %v9371_v45, %v2401_v29 }
 0x360   :  { %9464 = vst [vmem:[#allocation23_spill] sm:$0xff] %v7576_v39  ;;  %v2252_v25 = vshrl.u32 %v2234_v11, %v2250_v60  ;;  %v2255_v38 = vadd.s32 127, %v2254_v4  ;;  %v2416_v30 = vshrl.u32 %v9372_v58, %v2401_v29  ;;  %v2405_v40 = vor.u32 %v2404_v48, %v2403_v28 }
 0x361   :  { %vm4812_vm14 = vcmp.lt.s32.totalorder %v4811_v1, 0  ;;  %v2408_v0 = vor.u32 %v2407_v10, %v2406_v43  ;;  %v2411_v19 = vor.u32 %v2410_v46, %v2409_v50  ;;  %v2414_v5 = vor.u32 %v2413_v57, %v2412_v3 }
 0x362   :  { %v2665_v27 = vsel %vm4812_vm14, 0, %v4811_v1  ;;  %v2415_v39 = vshll.u32 %v9371_v45, %v2400_v21  ;;  %vm2501_vm6 = vcmp.gt.s32.totalorder %v2500_v6, 0  ;;  %v7584_v44 = vor.u32 %v2252_v25, %v2251_v7 }
 0x363   :  { %v2666_v20 = vsub.s32 32, %v2665_v27  ;;  %v2670_v53 = vsub.s32 4294967266, %v2665_v27  ;;  %v2402_v36 = vshrl.u32 %v9374_v16, %v2401_v29  ;;  %vm2418_vm9 = vcmp.lt.s32.totalorder %v2399_v55, 1 }
 0x364   :  { %v2256_v11 = vshll.u32 %v2255_v38, 23  ;;  %v2417_v4 = vor.u32 %v2416_v30, %v2415_v39  ;;  %vm2421_vm10 = vcmp.lt.s32.totalorder %v2399_v55, 4  ;;  %v2667_v1 = vshll.u32 %v7535_v13, %v2665_v27 }
 0x365   :  { %v2668_v60 = vshrl.u32 %v2650_v31, %v2666_v20  ;;  %v2671_v28 = vadd.s32 127, %v2670_v53  ;;  %v2423_v48 = vsel %vm2421_vm10, %v2411_v19, 2102212464  ;;  %v2426_v43 = vsel %vm2418_vm9, %v2405_v40, %v2408_v0 }
 0x366   :  { %vm2419_vm0 = vcmp.lt.s32.totalorder %v2399_v55, 2  ;;  %vm2420_vm11 = vcmp.lt.s32.totalorder %v2399_v55, 3  ;;  %v2422_v21 = vsel %vm2418_vm9, %v2402_v36, %v2405_v40  ;;  %v2427_v10 = vsel %vm2421_vm10, %v2414_v5, 920167782 }
 0x367   :  { %v2672_v50 = vshll.u32 %v2671_v28, 23  ;;  %v2424_v29 = vsel %vm2420_vm11, %v2408_v0, %v2423_v48  ;;  %v2428_v7 = vsel %vm2420_vm11, %v2411_v19, %v2427_v10  ;;  %v2430_v31 = vsel %vm2418_vm9, %v2408_v0, %v2411_v19 }
 0x368   :  { %v2257_v30 = vor.u32 4788187, %v2256_v11  ;;  %v7593_v20 = vor.u32 %v2668_v60, %v2667_v1  ;;  %v2429_v27 = vsel %vm2419_vm0, %v2426_v43, %v2428_v7  ;;  %v2431_v13 = vsel %vm2421_vm10, %v2417_v4, 1326507024 }
 0x369   :  { %v2673_v39 = vor.u32 4788187, %v2672_v50  ;;  %v2432_v46 = vsel %vm2420_vm11, %v2414_v5, %v2431_v13  ;;  %v7598_v3 = vmul.u32.u64.low %v7564_v9, %v2429_v27  ;;  %v7599_v57 = vmul.u32.u64.high %v7564_v9, %v2429_v27, %v7598_v3 }
 0x36a   :  { %v2425_v36 = vsel %vm2419_vm0, %v2422_v21, %v2424_v29  ;;  %v2433_v40 = vsel %vm2419_vm0, %v2430_v31, %v2432_v46  ;;  %v2502_v19 = vsel %vm2501_vm6, %v2500_v6, 0  ;;  %v2702_v25 = vshrl.u32 %v2701_v26, 23 }
 0x36b   :  { %v7606_v38 = vmul.u32.u64.low %v7564_v9, %v2433_v40  ;;  %v7607_v0 = vmul.u32.u64.high %v7564_v9, %v2433_v40, %v7606_v38  ;;  %v2503_v53 = vshrl.u32 %v2502_v19, 5  ;;  %v9465_v11 = vand.u32 2147483647, %v7537_v32 }
 0x36c   :  { %v2258_v60 = vand.u32 2147483647, %v2257_v30  ;;  %v2260_v4 = vcvt.s32.f32 %v7584_v44  ;;  %v2504_v1 = vand.u32 31, %v2502_v19  ;;  %v9466_v28 = vor.u32 8388608, %v7543_v17 }
 0x36d   :  { %v7611_v5 = vand.u32 8388607, %v9465_v11  ;;  %v2674_v48 = vand.u32 2147483647, %v2673_v39  ;;  %v2676_v6 = vcvt.s32.f32 %v7593_v20  ;;  %v2441_v26 = vmul.u32 %v7564_v9, %v2425_v36 }
 0x36e   :  { %v7616_v55 = vshll.u32 %v9466_v28, 8  ;;  %v2444_v43 = vadd.s32 1, %v7599_v57  ;;  %v2505_v21 = vsub.s32 32, %v2504_v1  ;;  %vm2522_vm1 = vcmp.lt.s32.totalorder %v2503_v53, 1 }
 0x36f   :  { %vm2523_vm8 = vcmp.lt.s32.totalorder %v2503_v53, 2  ;;  %v4813_v10 = vadd.s32 4294967169, %v2702_v25  ;;  %vm2443_vm4 = vc.u32 %v7607_v0, %v7598_v3  ;;  %v2507_v44 = vshll.u32 %v9374_v16, %v2504_v1 }
 0x370   :  { %v2510_v17 = vshll.u32 %v9375_v22, %v2504_v1  ;;  %v2513_v50 = vshll.u32 %v9376_v41, %v2504_v1  ;;  %v2445_v29 = vsel %vm2443_vm4, %v2444_v43, %v7599_v57  ;;  %v2508_v7 = vshrl.u32 %v9375_v22, %v2505_v21 }
 0x371   :  { %v2511_v9 = vshrl.u32 %v9376_v41, %v2505_v21  ;;  %v2516_v31 = vshll.u32 %v9373_v49, %v2504_v1  ;;  %v2446_v30 = vadd.s32 %v2445_v29, %v2441_v26  ;;  %v2506_v20 = vshrl.u32 %v9374_v16, %v2505_v21 }
 0x372   :  { %v2514_v27 = vshrl.u32 %v9373_v49, %v2505_v21  ;;  %v2517_v13 = vshrl.u32 %v9371_v45, %v2505_v21  ;;  %v2509_v39 = vor.u32 %v2508_v7, %v2507_v44  ;;  %v2519_v36 = vshll.u32 %v9371_v45, %v2504_v1 }
 0x373   :  { %v2512_v46 = vor.u32 %v2511_v9, %v2510_v17  ;;  %v2520_v40 = vshrl.u32 %v9372_v58, %v2505_v21  ;;  %v2447_v57 = vadd.s32 536870912, %v2446_v30  ;;  %vm2524_vm2 = vcmp.lt.s32.totalorder %v2503_v53, 3 }
 0x374   :  { %v2515_v19 = vor.u32 %v2514_v27, %v2513_v50  ;;  %v2518_v25 = vor.u32 %v2517_v13, %v2516_v31  ;;  %vm2525_vm14 = vcmp.lt.s32.totalorder %v2503_v53, 4  ;;  %v2526_v11 = vsel %vm2522_vm1, %v2506_v20, %v2509_v39 }
 0x375   :  { %v2521_v38 = vor.u32 %v2520_v40, %v2519_v36  ;;  %v2530_v28 = vsel %vm2522_vm1, %v2509_v39, %v2512_v46  ;;  %v7637_v26 = vshrl.u32 %v2447_v57, 30  ;;  %v2708_v50 = vadd.s32 1, %v4813_v10 }
 0x376   :  { %v2527_v43 = vsel %vm2525_vm14, %v2515_v19, 2102212464  ;;  %v2531_v29 = vsel %vm2525_vm14, %v2518_v25, 920167782  ;;  %v2534_v44 = vsel %vm2522_vm1, %v2512_v46, %v2515_v19  ;;  %v7642_v7 = vmul.f32 %v2260_v4, %v2258_v60 }
 0x377   :  { %v2528_v1 = vsel %vm2524_vm2, %v2512_v46, %v2527_v43  ;;  %v2532_v21 = vsel %vm2524_vm2, %v2515_v19, %v2531_v29  ;;  %v2535_v17 = vsel %vm2525_vm14, %v2521_v38, 1326507024  ;;  %v2449_v9 = vshll.u32 %v7637_v26, 30 }
 0x378   :  { %v2533_v31 = vsel %vm2523_vm8, %v2530_v28, %v2532_v21  ;;  %v2706_v20 = vor.u32 8388608, %v7611_v5  ;;  %v7647_v27 = vmul.f32 %v2676_v6, %v2674_v48  ;;  %v2536_v13 = vsel %vm2524_vm2, %v2518_v25, %v2535_v17 }
 0x379   :  { %v7651_v39 = vmul.u32.u64.low %v7616_v55, %v2533_v31  ;;  %v7652_v36 = vmul.u32.u64.high %v7616_v55, %v2533_v31, %v7651_v39  ;;  %v7655_v46 = vsub.s32 %v2446_v30, %v2449_v9  ;;  %v2529_v60 = vsel %vm2523_vm8, %v2526_v11, %v2528_v1 }
 0x37a   :  { %v2537_v4 = vsel %vm2523_vm8, %v2534_v44, %v2536_v13  ;;  %vm2709_vm6 = vcmp.gt.s32.totalorder %v2708_v50, 0  ;;  %v7665_v48 = vmul.f32 %v7555_v63, %v7495_v62  ;;  %v7669_v19 = vshll.u32 %v2706_v20, 8 }
 0x37b   :  { %v7660_v10 = vmul.u32.u64.low %v7616_v55, %v2537_v4  ;;  %v7661_v40 = vmul.u32.u64.high %v7616_v55, %v2537_v4, %v7660_v10  ;;  %v2710_v5 = vsel %vm2709_vm6, %v2708_v50, 0  ;;  %v2452_v57 = vsub.s32 0, %v7655_v46 }
 0x37c   :  { %v2712_v30 = vand.u32 31, %v2710_v5  ;;  %v2442_v25 = vadd.s32 %v7598_v3, %v7607_v0  ;;  %v2545_v38 = vmul.u32 %v7616_v55, %v2529_v60  ;;  %v2548_v11 = vadd.s32 1, %v7652_v36 }
 0x37d   :  { %v4802_v28 = vmin.u32 %v2452_v57, %v7655_v46  ;;  %v7677_v62 = vshrl.u32 %v2710_v5, 5  ;;  %vm2547_vm9 = vc.u32 %v7661_v40, %v7651_v39  ;;  %vm2180_vm1 = vcmp.lt.s32.totalorder %v7304_v61, 0 }
 0x37e   :  { %v2713_v63 = vsub.s32 32, %v2712_v30  ;;  %v2715_v29 = vshll.u32 %v9374_v16, %v2712_v30  ;;  %v2718_v44 = vshll.u32 %v9375_v22, %v2712_v30  ;;  %v2721_v3 = vshll.u32 %v9376_v41, %v2712_v30 }
 0x37f   :  { %v2454_v0 = vclz %v4802_v28  ;;  %v2549_v55 = vsel %vm2547_vm9, %v2548_v11, %v7652_v36  ;;  %v2724_v21 = vshll.u32 %v9373_v49, %v2712_v30  ;;  %v2727_v60 = vshll.u32 %v9371_v45, %v2712_v30  ;;  %v9468_v30 = vld [vmem:[#allocation13_spill] sm:$0xff] }
 0x380   :  { %v2716_v1 = vshrl.u32 %v9375_v22, %v2713_v63  ;;  %v2550_v17 = vadd.s32 %v2549_v55, %v2545_v38  ;;  %v2719_v50 = vshrl.u32 %v9376_v41, %v2713_v63  ;;  %v2722_v9 = vshrl.u32 %v9373_v49, %v2713_v63 }
 0x381   :  { %v2725_v31 = vshrl.u32 %v9371_v45, %v2713_v63  ;;  %v4803_v20 = vadd.s32 4294967294, %v2454_v0  ;;  %v2728_v4 = vshrl.u32 %v9372_v58, %v2713_v63  ;;  %v2714_v11 = vshrl.u32 %v9374_v16, %v2713_v63 }
 0x382   :  { %v2717_v13 = vor.u32 %v2716_v1, %v2715_v29  ;;  %v2551_v10 = vadd.s32 536870912, %v2550_v17  ;;  %v2720_v5 = vor.u32 %v2719_v50, %v2718_v44  ;;  %v2723_v36 = vor.u32 %v2722_v9, %v2721_v3 }
 0x383   :  { %v2726_v57 = vor.u32 %v2725_v31, %v2724_v21  ;;  %vm4804_vm10 = vcmp.lt.s32.totalorder %v4803_v20, 0  ;;  %v2729_v38 = vor.u32 %v2728_v4, %v2727_v60  ;;  %v2805_v28 = vand.u32 2139095040, %v7665_v48 }
 0x384   :  { %v2457_v55 = vsel %vm4804_vm10, 0, %v4803_v20  ;;  %v7695_v53 = vshrl.u32 %v2551_v10, 30  ;;  %vm2730_vm0 = vcmp.lt.s32.totalorder %v7677_v62, 1  ;;  %vm2731_vm11 = vcmp.lt.s32.totalorder %v7677_v62, 2 }
 0x385   :  { %vm2596_vm8 = vcmp.lt.s32.totalorder %v9468_v30, 0  ;;  %v2458_v29 = vsub.s32 32, %v2457_v55  ;;  %v2462_v44 = vsub.s32 4294967266, %v2457_v55  ;;  %vm2732_vm4 = vcmp.lt.s32.totalorder %v7677_v62, 3 }
 0x386   :  { %9467 = vst [vmem:[#allocation30_spill] sm:$0xff] %v7695_v53  ;;  %vm2733_vm2 = vcmp.lt.s32.totalorder %v7677_v62, 4  ;;  %v2553_v63 = vshll.u32 %v7695_v53, 30  ;;  %v2738_v0 = vsel %vm2730_vm0, %v2717_v13, %v2720_v5  ;;  %v9469_v21 = vand.u32 2147483647, %v6858_v8 }
 0x387   :  { %v2735_v3 = vsel %vm2733_vm2, %v2723_v36, 2102212464  ;;  %v2739_v1 = vsel %vm2733_vm2, %v2726_v57, 920167782  ;;  %v2459_v9 = vshll.u32 %v7655_v46, %v2457_v55  ;;  %v2460_v31 = vshrl.u32 %v2442_v25, %v2458_v29 }
 0x388   :  { %vm7712_vm14 = vcmp.le.f32.partialorder %v9469_v21, 0.7853982  ;;  %v2463_v20 = vadd.s32 127, %v2462_v44  ;;  %v2740_v60 = vsel %vm2732_vm4, %v2723_v36, %v2739_v1  ;;  %v7719_v4 = vsub.s32 %v2550_v17, %v2553_v63 }
 0x389   :  { %v2734_v10 = vsel %vm2730_vm0, %v2714_v11, %v2717_v13  ;;  %v2741_v6 = vsel %vm2731_vm11, %v2738_v0, %v2740_v60  ;;  %v2742_v21 = vsel %vm2730_vm0, %v2720_v5, %v2723_v36  ;;  %v2461_v43 = vor.u32 %v2460_v31, %v2459_v9 }
 0x38a   :  { %v2464_v53 = vshll.u32 %v2463_v20, 23  ;;  %v2736_v46 = vsel %vm2732_vm4, %v2720_v5, %v2735_v3  ;;  %v2743_v25 = vsel %vm2733_vm2, %v2729_v38, 1326507024  ;;  %v2556_v17 = vsub.s32 0, %v7719_v4 }
 0x38b   :  { %v2744_v55 = vsel %vm2732_vm4, %v2726_v57, %v2743_v25  ;;  %v7735_v13 = vmul.u32.u64.low %v7669_v19, %v2741_v6  ;;  %v7736_v11 = vmul.u32.u64.high %v7669_v19, %v2741_v6, %v7735_v13  ;;  %vm2388_vm6 = vcmp.lt.s32.totalorder %v7491_v24, 0 }
 0x38c   :  { %v2465_v36 = vor.u32 4788187, %v2464_v53  ;;  %v2745_v29 = vsel %vm2731_vm11, %v2742_v21, %v2744_v55  ;;  %v2806_v44 = vshrl.u32 %v2805_v28, 23  ;;  %v4806_v5 = vmin.u32 %v2556_v17, %v7719_v4 }
 0x38d   :  { %v2737_v38 = vsel %vm2731_vm11, %v2734_v10, %v2736_v46  ;;  %v7745_v63 = vmul.u32.u64.low %v7669_v19, %v2745_v29  ;;  %v7746_v3 = vmul.u32.u64.high %v7669_v19, %v2745_v29, %v7745_v63  ;;  %v9472_v57 = vand.u32 2147483647, %v7491_v24 }
 0x38e   :  { %v2466_v53 = vand.u32 2147483647, %v2465_v36  ;;  %v2468_v0 = vcvt.s32.f32 %v2461_v43  ;;  %v4817_v1 = vadd.s32 4294967169, %v2806_v44  ;;  %v9475_v28 = vand.u32 2147483647, %v7665_v48 }
 0x38f   :  { %vm7750_vm9 = vcmp.le.f32.partialorder %v9472_v57, 0.7853982  ;;  %v9476_v62 = vxor.u32 2147483648, %v7642_v7  ;;  %v9477_v20 = vxor.u32 2147483648, %v7647_v27  ;;  %v2558_v10 = vclz %v4806_v5 }
 0x390   :  { %v2809_v9 = vand.u32 8388607, %v9475_v28  ;;  %v2756_v43 = vadd.s32 1, %v7736_v11  ;;  %v2469_v21 = vmul.f32 %v2468_v0, %v2466_v53  ;;  %v2472_v46 = vsub.s32 4, %v7637_v26 }
 0x391   :  { %v7761_v31 = vsel %vm2180_vm1, %v9476_v62, %v7642_v7  ;;  %v7768_v60 = vsel %vm2596_vm8, %v9477_v20, %v7647_v27  ;;  %v2812_v25 = vadd.s32 1, %v4817_v1  ;;  %v2059_v17 = vsel %vm7712_vm14, 0, %v7560_v59 }
 0x392   :  { %v4807_v7 = vadd.s32 4294967294, %v2558_v10  ;;  %v2753_v55 = vmul.u32 %v7669_v19, %v2737_v38  ;;  %vm2755_vm10 = vc.u32 %v7746_v3, %v7735_v13  ;;  %v2058_v27 = vsel %vm7712_vm14, %v6858_v8, %v7322_v37 }
 0x393   :  { %v2470_v36 = vxor.u32 2147483648, %v2469_v21  ;;  %v2757_v29 = vsel %vm2755_vm10, %v2756_v43, %v7736_v11  ;;  %v2810_v44 = vor.u32 8388608, %v2809_v9  ;;  %vm2813_vm0 = vcmp.gt.s32.totalorder %v2812_v25, 0 }
 0x394   :  { %vm4808_vm11 = vcmp.lt.s32.totalorder %v4807_v7, 0  ;;  %v2758_v5 = vadd.s32 %v2757_v29, %v2753_v55  ;;  %v2814_v63 = vsel %vm2813_vm0, %v2812_v25, 0  ;;  %v2063_v57 = vadd.s32 3, %v2059_v17 }
 0x395   :  { %v2471_v59 = vsel %vm2388_vm6, %v2470_v36, %v2469_v21  ;;  %v7787_v19 = vsel %vm2388_vm6, %v2472_v46, %v7637_v26  ;;  %v2561_v38 = vsel %vm4808_vm11, 0, %v4807_v7  ;;  %v2816_v50 = vand.u32 31, %v2814_v63 }
 0x396   :  { %v2546_v37 = vadd.s32 %v7651_v39, %v7661_v40  ;;  %v2562_v11 = vsub.s32 32, %v2561_v38  ;;  %v2566_v53 = vsub.s32 4294967266, %v2561_v38  ;;  %5208 = vcosq.f32 %v2058_v27 }
 0x397   :  { %v7792_v0 = vadd.s32 %v7735_v13, %v7746_v3  ;;  %v2759_v1 = vadd.s32 536870912, %v2758_v5  ;;  %v2817_v28 = vsub.s32 32, %v2816_v50  ;;  %5210 = vsinq.f32 %v2058_v27 }
 0x398   :  { %v2474_v9 = vsel %vm7750_vm9, %v7491_v24, %v2471_v59  ;;  %v2567_v26 = vadd.s32 127, %v2566_v53  ;;  %v7797_v62 = vshll.u32 %v2810_v44, 8  ;;  %v7799_v20 = vand.u32 3, %v2063_v57 }
 0x399   :  { %v7801_v10 = vshrl.u32 %v2759_v1, 30  ;;  %v2819_v39 = vshll.u32 %v9374_v16, %v2816_v50  ;;  %v2820_v40 = vshrl.u32 %v9375_v22, %v2817_v28  ;;  %v2823_v13 = vshrl.u32 %v9376_v41, %v2817_v28 }
 0x39a   :  { %v2564_v3 = vshrl.u32 %v2546_v37, %v2562_v11  ;;  %v2568_v43 = vshll.u32 %v2567_v26, 23  ;;  %v2825_v21 = vshll.u32 %v9376_v41, %v2816_v50  ;;  %v2826_v46 = vshrl.u32 %v9373_v49, %v2817_v28 }
 0x39b   :  { %v2563_v25 = vshll.u32 %v7719_v4, %v2561_v38  ;;  %v2761_v17 = vshll.u32 %v7801_v10, 30  ;;  %v2815_v7 = vshrl.u32 %v2814_v63, 5  ;;  %v2822_v55 = vshll.u32 %v9375_v22, %v2816_v50 }
 0x39c   :  { %5212 = vcosq.f32 %v2474_v9  ;;  %v2569_v27 = vor.u32 4788187, %v2568_v43  ;;  %v2821_v36 = vor.u32 %v2820_v40, %v2819_v39  ;;  %v2827_v29 = vor.u32 %v2826_v46, %v2825_v21 }
 0x39d   :  { %v7811_v44 = vsub.s32 %v2758_v5, %v2761_v17  ;;  %v2824_v57 = vor.u32 %v2823_v13, %v2822_v55  ;;  %v2828_v59 = vshll.u32 %v9373_v49, %v2816_v50  ;;  %v2829_v37 = vshrl.u32 %v9371_v45, %v2817_v28 }
 0x39e   :  { %v2565_v11 = vor.u32 %v2564_v3, %v2563_v25  ;;  %v2818_v53 = vshrl.u32 %v9374_v16, %v2817_v28  ;;  %v2831_v4 = vshll.u32 %v9371_v45, %v2816_v50  ;;  %v2832_v63 = vshrl.u32 %v9372_v58, %v2817_v28 }
 0x39f   :  { %v9478_v38 = vand.u32 2147483647, %v6853_v56  ;;  %v2570_v5 = vand.u32 2147483647, %v2569_v27  ;;  %v2764_v26 = vsub.s32 0, %v7811_v44  ;;  %v2830_v39 = vor.u32 %v2829_v37, %v2828_v59 }
 0x3a0   :  { %vm2837_vm2 = vcmp.lt.s32.totalorder %v2815_v7, 4  ;;  %v5209_v40 = vpop.eup %5208  ;;  %v2833_v13 = vor.u32 %v2832_v63, %v2831_v4  ;;  %vm2834_vm14 = vcmp.lt.s32.totalorder %v2815_v7, 1  ;;  %vm2835_vm6 = vcmp.lt.s32.totalorder %v2815_v7, 2 }
 0x3a1   :  { %vm7820_vm4 = vcmp.le.f32.partialorder %v9478_v38, 0.7853982  ;;  %v2839_v3 = vsel %vm2837_vm2, %v2827_v29, 2102212464  ;;  %v5211_v50 = vpop.eup %5210  ;;  %v4814_v28 = vmin.u32 %v2764_v26, %v7811_v44  ;;  %vm2836_vm10 = vcmp.lt.s32.totalorder %v2815_v7, 3 }
 0x3a2   :  { %v2842_v43 = vsel %vm2834_vm14, %v2821_v36, %v2824_v57  ;;  %v2843_v21 = vsel %vm2837_vm2, %v2830_v39, 920167782  ;;  %v2838_v46 = vsel %vm2834_vm14, %v2818_v53, %v2821_v36  ;;  %v2840_v25 = vsel %vm2836_vm10, %v2824_v57, %v2839_v3 }
 0x3a3   :  { %v2844_v17 = vsel %vm2836_vm10, %v2827_v29, %v2843_v21  ;;  %v2846_v55 = vsel %vm2834_vm14, %v2824_v57, %v2827_v29  ;;  %v2572_v27 = vcvt.s32.f32 %v2565_v11  ;;  %v2766_v59 = vclz %v4814_v28 }
 0x3a4   :  { %v2845_v37 = vsel %vm2835_vm6, %v2842_v43, %v2844_v17  ;;  %v2847_v4 = vsel %vm2837_vm2, %v2833_v13, 1326507024  ;;  %5214 = vsinq.f32 %v2474_v9  ;;  %v2841_v36 = vsel %vm2835_vm6, %v2838_v46, %v2840_v25 }
 0x3a5   :  { %v2848_v63 = vsel %vm2836_vm10, %v2830_v39, %v2847_v4  ;;  %v7831_v38 = vmul.u32.u64.low %v7797_v62, %v2845_v37  ;;  %v7832_v58 = vmul.u32.u64.high %v7797_v62, %v2845_v37, %v7831_v38  ;;  %v7834_v26 = vmul.f32 %v2572_v27, %v2570_v5  ;;  %v9481_v5 = vld [vmem:[#allocation17_spill] sm:$0xff] }
 0x3a6   :  { %v4815_v45 = vadd.s32 4294967294, %v2766_v59  ;;  %v2849_v53 = vsel %vm2835_vm6, %v2846_v55, %v2848_v63  ;;  %v7838_v29 = vpop.eup %5212  ;;  %vm2066_vm0 = vcmp.eq.s32.totalorder %v7799_v20, 0  ;;  %v2067_v9 = vxor.u32 2147483648, %v5211_v50 }
 0x3a7   :  { %v7841_v57 = vmul.u32.u64.low %v7797_v62, %v2849_v53  ;;  %v7842_v11 = vmul.u32.u64.high %v7797_v62, %v2849_v53, %v7841_v57  ;;  %vm2062_vm2 = vweird.f32 %v6858_v8  ;;  %v2070_v39 = vxor.u32 2147483648, %v5209_v40  ;;  %v9485_v53 = vld [vmem:[#allocation10_spill] sm:$0xff] }
 0x3a8   :  { %vm4816_vm11 = vcmp.lt.s32.totalorder %v4815_v45, 0  ;;  %v2368_v13 = vsub.s32 4, %v9481_v5  ;;  %v2370_v7 = vsel %vm7820_vm4, %v6853_v56, %v7316_v2  ;;  %v2860_v28 = vadd.s32 1, %v7832_v58 }
 0x3a9   :  { %v2769_v3 = vsel %vm4816_vm11, 0, %v4815_v45  ;;  %vm2069_vm14 = vcmp.eq.s32.totalorder %v7799_v20, 2  ;;  %5216 = vcosq.f32 %v2370_v7  ;;  %v2068_v46 = vsel %vm2066_vm0, %v5209_v40, %v2067_v9 }
 0x3aa   :  { %v2770_v43 = vsub.s32 32, %v2769_v3  ;;  %v2774_v21 = vsub.s32 4294967266, %v2769_v3  ;;  %v2071_v25 = vsel %vm2069_vm14, %v2070_v39, %v5211_v50  ;;  %v2857_v17 = vmul.u32 %v7797_v62, %v2841_v36 }
 0x3ab   :  { %vm2859_vm6 = vc.u32 %v7842_v11, %v7831_v38  ;;  %vm2065_vm10 = vcmp.lt.s32.totalorder %v7799_v20, 2  ;;  %v2369_v2 = vsel %vm2284_vm13, %v2368_v13, %v9481_v5  ;;  %v2771_v45 = vshll.u32 %v7811_v44, %v2769_v3 }
 0x3ac   :  { %v2772_v55 = vshrl.u32 %v7792_v0, %v2770_v43  ;;  %v2775_v27 = vadd.s32 127, %v2774_v21  ;;  %v2861_v59 = vsel %vm2859_vm6, %v2860_v28, %v7832_v58  ;;  %v2072_v40 = vsel %vm2065_vm10, %v2068_v46, %v2071_v25 }
 0x3ad   :  { %v2862_v37 = vadd.s32 %v2861_v59, %v2857_v17  ;;  %v2371_v62 = vsel %vm7820_vm4, 0, %v2369_v2  ;;  %5218 = vsinq.f32 %v2370_v7  ;;  %v9482_v63 = vand.u32 2147483647, %v6976_v34 }
 0x3ae   :  { %v2773_v50 = vor.u32 %v2772_v55, %v2771_v45  ;;  %v2776_v4 = vshll.u32 %v2775_v27, 23  ;;  %v2375_v20 = vadd.s32 3, %v2371_v62  ;;  %v7870_v44 = vpop.eup %5214  ;;  %vm9321_vm13 = vcmp.lt.s32.totalorder %v7537_v32, 0 }
 0x3af   :  { %vm7866_vm0 = vcmp.le.f32.partialorder %v9482_v63, 0.7853982  ;;  %v2784_v58 = vsub.s32 4, %v7801_v10  ;;  %v2863_v0 = vadd.s32 536870912, %v2862_v37  ;;  %v1952_v1 = vsub.s32 4, %v9485_v53 }
 0x3b0   :  { %v1954_v57 = vsel %vm7866_vm0, %v6976_v34, %v7515_v23  ;;  %v2574_v9 = vxor.u32 2147483648, %v7834_v26  ;;  %v9486_v39 = vand.u32 2147483647, %v7537_v32  ;;  %v2777_v13 = vor.u32 4788187, %v2776_v4 }
 0x3b1   :  { %v7887_v7 = vadd.s32 %v7831_v38, %v7842_v11  ;;  %5220 = vcosq.f32 %v1954_v57  ;;  %v7889_v3 = vshrl.u32 %v2863_v0, 30  ;;  %v2073_v28 = vsel %vm2062_vm2, nan, %v2072_v40 }
 0x3b2   :  { %vm7882_vm4 = vcmp.le.f32.partialorder %v9486_v39, 0.7853982  ;;  %v1953_v23 = vsel %vm1868_vm15, %v1952_v1, %v9485_v53  ;;  %5222 = vsinq.f32 %v1954_v57  ;;  %v2778_v43 = vand.u32 2147483647, %v2777_v13 }
 0x3b3   :  { %v2780_v21 = vcvt.s32.f32 %v2773_v50  ;;  %v2376_v46 = vand.u32 3, %v2375_v20  ;;  %v9489_v25 = vand.u32 2147483647, %v7304_v61  ;;  %v5217_v38 = vpop.eup %5216  ;;  %v2865_v11 = vshll.u32 %v7889_v3, 30 }
 0x3b4   :  { %v1955_v8 = vsel %vm7866_vm0, 0, %v1953_v23  ;;  %v2264_v2 = vsub.s32 4, %v7497_v15  ;;  %v2382_v27 = vxor.u32 2147483648, %v5217_v38  ;;  %vm2374_vm15 = vweird.f32 %v6853_v56 }
 0x3b5   :  { %vm7898_vm11 = vcmp.le.f32.partialorder %v9489_v25, 0.7853982  ;;  %v2781_v55 = vmul.f32 %v2780_v21, %v2778_v43  ;;  %v1959_v59 = vadd.s32 3, %v1955_v8  ;;  %v7910_v40 = vsub.s32 %v2862_v37, %v2865_v11 }
 0x3b6   :  { %v2266_v45 = vsel %vm7898_vm11, %v7304_v61, %v7761_v31  ;;  %v2265_v62 = vsel %vm2180_vm1, %v2264_v2, %v7497_v15  ;;  %vm2377_vm2 = vcmp.lt.s32.totalorder %v2376_v46, 2  ;;  %vm2381_vm14 = vcmp.eq.s32.totalorder %v2376_v46, 2 }
 0x3b7   :  { %5224 = vcosq.f32 %v2266_v45  ;;  %v2782_v50 = vxor.u32 2147483648, %v2781_v55  ;;  %v1960_v4 = vand.u32 3, %v1959_v59  ;;  %v2267_v20 = vsel %vm7898_vm11, 0, %v2265_v62  ;;  %v5219_v31 = vpop.eup %5218 }
 0x3b8   :  { %5226 = vsinq.f32 %v2266_v45  ;;  %v2868_v63 = vsub.s32 0, %v7910_v40  ;;  %v2271_v36 = vadd.s32 3, %v2267_v20  ;;  %v2680_v37 = vsub.s32 4, %v7520_v51 }
 0x3b9   :  { %v2783_v0 = vsel %vm9321_vm13, %v2782_v50, %v2781_v55  ;;  %v2379_v53 = vxor.u32 2147483648, %v5219_v31  ;;  %v2383_v1 = vsel %vm2381_vm14, %v2382_v27, %v5219_v31  ;;  %v9492_v15 = vand.u32 2147483647, %v9468_v30 }
 0x3ba   :  { %v2786_v39 = vsel %vm7882_vm4, %v7537_v32, %v2783_v0  ;;  %v4818_v13 = vmin.u32 %v2868_v63, %v7910_v40  ;;  %vm2378_vm6 = vcmp.eq.s32.totalorder %v2376_v46, 0  ;;  %vm1961_vm10 = vcmp.lt.s32.totalorder %v1960_v4, 2 }
 0x3bb   :  { %vm7924_vm1 = vcmp.le.f32.partialorder %v9492_v15, 0.7853982  ;;  %v5221_v43 = vpop.eup %5220  ;;  %v2380_v21 = vsel %vm2378_vm6, %v5217_v38, %v2379_v53  ;;  %vm1962_vm0 = vcmp.eq.s32.totalorder %v1960_v4, 0  ;;  %v2272_v25 = vand.u32 3, %v2271_v36 }
 0x3bc   :  { %v2682_v23 = vsel %vm7924_vm1, %v9468_v30, %v7768_v60  ;;  %v5223_v17 = vpop.eup %5222  ;;  %vm2492_vm11 = vcmp.lt.s32.totalorder %v7504_v42, 0  ;;  %v2870_v11 = vclz %v4818_v13  ;;  %v2384_v8 = vsel %vm2377_vm2, %v2380_v21, %v2383_v1 }
 0x3bd   :  { %vm1958_vm14 = vweird.f32 %v6976_v34  ;;  %v1966_v2 = vxor.u32 2147483648, %v5221_v43  ;;  %v2681_v60 = vsel %vm2596_vm8, %v2680_v37, %v7520_v51  ;;  %5228 = vcosq.f32 %v2786_v39 }
 0x3be   :  { %v2385_v38 = vsel %vm2374_vm15, nan, %v2384_v8  ;;  %v1963_v45 = vxor.u32 2147483648, %v5223_v17  ;;  %vm1965_vm6 = vcmp.eq.s32.totalorder %v1960_v4, 2  ;;  %v4819_v55 = vadd.s32 4294967294, %v2870_v11 }
 0x3bf   :  { %v4967_v27 = vpack.c.bf16 %v2385_v38, %v2073_v28  ;;  %v1967_v59 = vsel %vm1965_vm6, %v1966_v2, %v5223_v17  ;;  %vm2273_vm13 = vcmp.lt.s32.totalorder %v2272_v25, 2  ;;  %vm2274_vm2 = vcmp.eq.s32.totalorder %v2272_v25, 0 }
 0x3c0   :  { %v1964_v62 = vsel %vm1962_vm0, %v5221_v43, %v1963_v45  ;;  %v2683_v50 = vsel %vm7924_vm1, 0, %v2681_v60  ;;  %5230 = vcosq.f32 %v2682_v23  ;;  %vm4820_vm8 = vcmp.lt.s32.totalorder %v4819_v55, 0 }
 0x3c1   :  { %v5225_v46 = vpop.eup %5224  ;;  %4968 = vmatprep.subr.bf16.mxu0 %v4967_v27  ;;  %vm2277_vm3 = vcmp.eq.s32.totalorder %v2272_v25, 2  ;;  %5232 = vsinq.f32 %v2682_v23  ;;  %v2873_v51 = vsel %vm4820_vm8, 0, %v4819_v55  ;;  %v1968_v28 = vsel %vm1961_vm10, %v1964_v62, %v1967_v59 }
 0x3c2   :  { %v5227_v20 = vpop.eup %5226  ;;  %v2278_v56 = vxor.u32 2147483648, %v5225_v46  ;;  %4970 = vmatpush3.bf16.msra.mxu0 %v4967_v27  ;;  %v2687_v63 = vadd.s32 3, %v2683_v50  ;;  %v2874_v36 = vsub.s32 32, %v2873_v51  ;;  %v2875_v37 = vshll.u32 %v7910_v40, %v2873_v51  ;;  %v9499_v50 = vld [vmem:[#allocation22_spill] sm:$0xff] }
 0x3c3   :  { %v2275_v31 = vxor.u32 2147483648, %v5227_v20  ;;  %v2878_v0 = vsub.s32 4294967266, %v2873_v51  ;;  %v9495_v57 = vand.u32 2147483647, %v9460_v35  ;;  %v2992_v23 = vsub.s32 4, %v7334_v14 }
 0x3c4   :  { %v2279_v53 = vsel %vm2277_vm3, %v2278_v56, %v5227_v20  ;;  %v2688_v15 = vand.u32 3, %v2687_v63  ;;  %v2876_v4 = vshrl.u32 %v7887_v7, %v2874_v36  ;;  %v7969_v17 = vsel %vm2492_vm11, %v2574_v9, %v7834_v26  ;;  %v9501_v63 = vld [vmem:[#allocation14_spill] sm:$0xff] }
 0x3c5   :  { %v2276_v1 = vsel %vm2274_vm2, %v5225_v46, %v2275_v31  ;;  %vm7953_vm15 = vcmp.le.f32.partialorder %v9495_v57, 0.7853982  ;;  %v2879_v43 = vadd.s32 127, %v2878_v0  ;;  %5234 = vsinq.f32 %v2786_v39  ;;  %v9500_v31 = vld [vmem:[#allocation9_spill] sm:$0xff]  ;;  %v9502_v57 = vld [vmem:[#allocation23_spill] sm:$0xff] }
 0x3c6   :  { %v2280_v21 = vsel %vm2273_vm13, %v2276_v1, %v2279_v53  ;;  %v2994_v40 = vsel %vm7953_vm15, %v9460_v35, %v7547_v47  ;;  %v1969_v11 = vsel %vm1958_vm14, nan, %v1968_v28  ;;  %v2877_v25 = vor.u32 %v2876_v4, %v2875_v37 }
 0x3c7   :  { %v2281_v7 = vsel %vm2270_vm5, nan, %v2280_v21  ;;  %v2880_v8 = vshll.u32 %v2879_v43, 23  ;;  %vm9498_vm3 = vcmp.lt.s32.totalorder %v9460_v35, 0  ;;  %v7978_v60 = vpop.eup %5228  ;;  %vm2804_vm13 = vcmp.lt.s32.totalorder %v7665_v48, 0 }
 0x3c8   :  { %v4959_v2 = vpack.c.bf16 %v2281_v7, %v1969_v11  ;;  %v2993_v47 = vsel %vm9498_vm3, %v2992_v23, %v7334_v14  ;;  %vm2686_vm1 = vweird.f32 %v9468_v30  ;;  %vm2689_vm10 = vcmp.lt.s32.totalorder %v2688_v15, 2 }
 0x3c9   :  { %v2995_v34 = vsel %vm7953_vm15, 0, %v2993_v47  ;;  %5236 = vcosq.f32 %v2994_v40  ;;  %v1851_v61 = vsel %vm7258_vm7, 0, %v7309_v18  ;;  %v2881_v26 = vor.u32 4788187, %v2880_v8 }
 0x3ca   :  { %4960 = vmatprep.subr.bf16.mxu1 %v4959_v2  ;;  %vm2690_vm5 = vcmp.eq.s32.totalorder %v2688_v15, 0  ;;  %5238 = vsinq.f32 %v2994_v40  ;;  %v2999_v14 = vadd.s32 3, %v2995_v34  ;;  %v5231_v9 = vpop.eup %5230  ;;  %v2884_v39 = vcvt.s32.f32 %v2877_v25  ;;  %v9507_v2 = vld [vmem:[#allocation30_spill] sm:$0xff] }
 0x3cb   :  { %vm2693_vm0 = vcmp.eq.s32.totalorder %v2688_v15, 2  ;;  %v1855_v38 = vadd.s32 3, %v1851_v61  ;;  %v1859_v45 = vxor.u32 2147483648, %v7367_v33  ;;  %v5233_v55 = vpop.eup %5232  ;;  %v2882_v27 = vand.u32 2147483647, %v2881_v26  ;;  %v9503_v15 = vld [vmem:[#allocation20_spill] sm:$0xff] }
 0x3cc   :  { %v2694_v59 = vxor.u32 2147483648, %v5231_v9  ;;  %v3000_v46 = vand.u32 3, %v2999_v14  ;;  %v2691_v18 = vxor.u32 2147483648, %v5233_v55  ;;  %v1862_v20 = vxor.u32 2147483648, %v9499_v50 }
 0x3cd   :  { %v1856_v62 = vand.u32 3, %v1855_v38  ;;  %v2167_v56 = vadd.s32 3, %v2163_v12  ;;  %v2885_v51 = vmul.f32 %v2884_v39, %v2882_v27  ;;  %vm1854_vm7 = vweird.f32 %v9500_v31 }
 0x3ce   :  { %v2695_v28 = vsel %vm2693_vm0, %v2694_v59, %v5233_v55  ;;  %vm2166_vm14 = vweird.f32 %v9501_v63  ;;  %v2692_v36 = vsel %vm2690_vm5, %v5231_v9, %v2691_v18  ;;  %vm3001_vm6 = vcmp.lt.s32.totalorder %v3000_v46, 2 }
 0x3cf   :  { %vm3002_vm2 = vcmp.eq.s32.totalorder %v3000_v46, 0  ;;  %vm3005_vm8 = vcmp.eq.s32.totalorder %v3000_v46, 2  ;;  %vm1858_vm15 = vcmp.eq.s32.totalorder %v1856_v62, 0  ;;  %v2886_v37 = vxor.u32 2147483648, %v2885_v51  ;;  %v7997_v0 = vpop.eup %5234 }
 0x3d0   :  { %v2696_v54 = vsel %vm2689_vm10, %v2692_v36, %v2695_v28  ;;  %v1860_v52 = vsel %vm1858_vm15, %v9499_v50, %v1859_v45  ;;  %vm1861_vm12 = vcmp.eq.s32.totalorder %v1856_v62, 2  ;;  %vm1857_vm3 = vcmp.lt.s32.totalorder %v1856_v62, 2  ;;  %v8058_v28 = vld [vmem:[%s9226_s5 + $0x8] sm:$0xff] }
 0x3d1   :  { %v1863_v53 = vsel %vm1861_vm12, %v1862_v20, %v7367_v33  ;;  %v2168_v1 = vand.u32 3, %v2167_v56  ;;  %v2171_v13 = vxor.u32 2147483648, %v9502_v57  ;;  %v2887_v23 = vsel %vm2804_vm13, %v2886_v37, %v2885_v51 }
 0x3d2   :  { %v2697_v4 = vsel %vm2686_vm1, nan, %v2696_v54  ;;  %v1864_v43 = vsel %vm1857_vm3, %v1860_v52, %v1863_v53  ;;  %v2174_v21 = vxor.u32 2147483648, %v9503_v15  ;;  %v9504_v11 = vand.u32 2147483647, %v7504_v42 }
 0x3d3   :  { %v5237_v40 = vpop.eup %5236  ;;  %vm2169_vm10 = vcmp.lt.s32.totalorder %v2168_v1, 2  ;;  %vm2170_vm5 = vcmp.eq.s32.totalorder %v2168_v1, 0  ;;  %vm2173_vm0 = vcmp.eq.s32.totalorder %v2168_v1, 2  ;;  %v2576_v47 = vsub.s32 4, %v9507_v2  ;;  %v3013_v1 = vld [vmem:[%s9226_s5 + $0x18] sm:$0xff] }
 0x3d4   :  { %vm8008_vm15 = vcmp.le.f32.partialorder %v9504_v11, 0.7853982  ;;  %v5239_v7 = vpop.eup %5238  ;;  %v3006_v25 = vxor.u32 2147483648, %v5237_v40  ;;  %v2172_v8 = vsel %vm2170_vm5, %v9503_v15, %v2171_v13  ;;  %v2175_v30 = vsel %vm2173_vm0, %v2174_v21, %v9502_v57 }
 0x3d5   :  { %v3003_v34 = vxor.u32 2147483648, %v5239_v7  ;;  %v1865_v61 = vsel %vm1854_vm7, nan, %v1864_v43  ;;  %v2176_v26 = vsel %vm2169_vm10, %v2172_v8, %v2175_v30  ;;  %v2578_v14 = vsel %vm8008_vm15, %v7504_v42, %v7969_v17 }
 0x3d6   :  { %v3007_v9 = vsel %vm3005_vm8, %v3006_v25, %v5239_v7  ;;  %v2177_v39 = vsel %vm2166_vm14, nan, %v2176_v26  ;;  %v2577_v38 = vsel %vm2492_vm11, %v2576_v47, %v9507_v2  ;;  %5240 = vcosq.f32 %v2578_v14 }
 0x3d7   :  { %v3004_v45 = vsel %vm3002_vm2, %v5237_v40, %v3003_v34  ;;  %v4961_v55 = vpack.c.bf16 %v2177_v39, %v1865_v61  ;;  %v2579_v27 = vsel %vm8008_vm15, 0, %v2577_v38  ;;  %5242 = vsinq.f32 %v2578_v14 }
 0x3d8   :  { %vm2998_vm1 = vweird.f32 %v9460_v35  ;;  %v3008_v17 = vsel %vm3001_vm6, %v3004_v45, %v3007_v9  ;;  %v9508_v59 = vand.u32 2147483647, %v7665_v48  ;;  %v2888_v18 = vsub.s32 4, %v7889_v3 }
 0x3d9   :  { %vm9511_vm11 = vcmp.lt.s32.totalorder %v7537_v32, 0  ;;  %v3009_v50 = vsel %vm2998_vm1, nan, %v3008_v17  ;;  %4962 = vmatpush1.bf16.msra.mxu1 %v4961_v55  ;;  %v2475_v46 = vsel %vm7750_vm9, 0, %v7787_v19  ;;  %v2583_v56 = vadd.s32 3, %v2579_v27  ;;  %v8065_v19 = vld [vmem:[%s9226_s5 + $0x10] sm:$0xff]  ;;  %v5296_v55 = vld [vmem:[%s9226_s5] sm:$0xff] }
 0x3da   :  { %vm8034_vm7 = vcmp.le.f32.partialorder %v9508_v59, 0.7853982  ;;  %v2785_v62 = vsel %vm9511_vm11, %v2784_v58, %v7801_v10  ;;  %v4971_v20 = vpack.c.bf16 %v3009_v50, %v2697_v4  ;;  %v2889_v51 = vsel %vm2804_vm13, %v2888_v18, %v7889_v3 }
 0x3db   :  { %v2890_v35 = vsel %vm8034_vm7, %v7665_v48, %v2887_v23  ;;  %v2891_v10 = vsel %vm8034_vm7, 0, %v2889_v51  ;;  %v2479_v58 = vadd.s32 3, %v2475_v46  ;;  %v2787_v6 = vsel %vm7882_vm4, 0, %v2785_v62 }
 0x3dc   :  { %5244 = vcosq.f32 %v2890_v35  ;;  %4972 = vmatprep.subr.bf16.mxu0 %v4971_v20  ;;  %v2584_v3 = vand.u32 3, %v2583_v56  ;;  %v2895_v31 = vadd.s32 3, %v2891_v10  ;;  %v2791_v36 = vadd.s32 3, %v2787_v6 }
 0x3dd   :  { %5246 = vsinq.f32 %v2890_v35  ;;  %4974 = vmatpush3.bf16.msra.mxu0 %v4971_v20  ;;  %v2480_v63 = vand.u32 3, %v2479_v58  ;;  %v2483_v37 = vxor.u32 2147483648, %v7870_v44  ;;  %vm9512_vm9 = vcmask 261120  }
 0x3de   :  { %v2795_v52 = vxor.u32 2147483648, %v7997_v0  ;;  %vm9513_vm4 = vmmov %vm9512_vm9  ;;  %v2486_v57 = vxor.u32 2147483648, %v7838_v29  ;;  %v2792_v13 = vand.u32 3, %v2791_v36  ;;  %v2798_v23 = vxor.u32 2147483648, %v7978_v60 }
 0x3df   :  { %vm2586_vm13 = vcmp.eq.s32.totalorder %v2584_v3, 0  ;;  %v2896_v43 = vand.u32 3, %v2895_v31  ;;  %vm2482_vm14 = vcmp.eq.s32.totalorder %v2480_v63, 0  ;;  %vm2589_vm6 = vcmp.eq.s32.totalorder %v2584_v3, 2  ;;  %vm9514_vm12 = vmmov %vm9513_vm4 }
 0x3e0   :  { %v5241_v54 = vpop.eup %5240  ;;  %4927 = vmatmul.mubr.msk.f32.vlgmr.msra.gmra.mrb[8].mxu0 %vm9512_vm9, %v8058_v28  ;;  %v2484_v15 = vsel %vm2482_vm14, %v7838_v29, %v2483_v37  ;;  %vm2485_vm2 = vcmp.eq.s32.totalorder %v2480_v63, 2  ;;  %vm2794_vm8 = vcmp.eq.s32.totalorder %v2792_v13, 0  ;;  %vm2797_vm3 = vcmp.eq.s32.totalorder %v2792_v13, 2  ;;  %vm9516_vm14 = vmmov %vm9514_vm12 }
 0x3e1   :  { %v5243_v53 = vpop.eup %5242  ;;  %4929 = vmatprep.mubr.msk.f32.mxu0 %vm9513_vm4, %v8065_v19  ;;  %v2590_v5 = vxor.u32 2147483648, %v5241_v54  ;;  %v2796_v33 = vsel %vm2794_vm8, %v7978_v60, %v2795_v52  ;;  %v2487_v8 = vsel %vm2485_vm2, %v2486_v57, %v7870_v44  ;;  %vm2793_vm10 = vcmp.lt.s32.totalorder %v2792_v13, 2 }
 0x3e2   :  { %v2587_v4 = vxor.u32 2147483648, %v5243_v53  ;;  %v2799_v30 = vsel %vm2797_vm3, %v2798_v23, %v7997_v0  ;;  %v9515_v2 = vmov 0.0   ;;  %vm2585_vm5 = vcmp.lt.s32.totalorder %v2584_v3, 2 }
 0x3e3   :  { %v2591_v11 = vsel %vm2589_vm6, %v2590_v5, %v5243_v53  ;;  %vm2901_vm0 = vcmp.eq.s32.totalorder %v2896_v43, 2  ;;  %v2800_v47 = vsel %vm2793_vm10, %v2796_v33, %v2799_v30  ;;  %vm2898_vm15 = vcmp.eq.s32.totalorder %v2896_v43, 0  ;;  %vm9517_vm6 = vmmov %vm9514_vm12 }
 0x3e4   :  { %v2588_v40 = vsel %vm2586_vm13, %v5241_v54, %v2587_v4  ;;  %4930 = vmatmul.mubr.msk.f32.gmra.mrb[10].mxu0 %vm9514_vm12, %v3013_v1  ;;  %vm2481_vm1 = vcmp.lt.s32.totalorder %v2480_v63, 2  ;;  %vm2897_vm7 = vcmp.lt.s32.totalorder %v2896_v43, 2  ;;  %vm2790_vm11 = vweird.f32 %v7537_v32  ;;  %vm9518_vm2 = vmmov %vm9517_vm6 }
 0x3e5   :  { %4598 = vmatprep.mubr.f32.mxu0 %v9515_v2  ;;  %v2592_v34 = vsel %vm2585_vm5, %v2588_v40, %v2591_v11  ;;  %v2488_v26 = vsel %vm2481_vm1, %v2484_v15, %v2487_v8  ;;  %vm2582_vm9 = vweird.f32 %v7504_v42  ;;  %vm2894_vm4 = vweird.f32 %v7665_v48  ;;  %vm9519_vm8 = vmmov %vm9518_vm2  ;;  %v8102_v42 = vpop.permute.xlu0 %3020 }
 0x3e6   :  { %v5245_v21 = vpop.eup %5244  ;;  %v2801_v0 = vsel %vm2790_vm11, nan, %v2800_v47  ;;  %v2593_v14 = vsel %vm2582_vm9, nan, %v2592_v34  ;;  %vm2478_vm13 = vweird.f32 %v7491_v24  ;;  %v8100_v24 = vpop.permute.xlu1 %3025 }
 0x3e7   :  { %v5247_v7 = vpop.eup %5246  ;;  %v2902_v25 = vxor.u32 2147483648, %v5245_v21  ;;  %v2489_v38 = vsel %vm2478_vm13, nan, %v2488_v26 }
 0x3e8   :  { %v2899_v29 = vxor.u32 2147483648, %v5247_v7  ;;  %v4965_v45 = vpack.c.bf16 %v2801_v0, %v2489_v38 }
 0x3e9   :  { %v2903_v61 = vsel %vm2901_vm0, %v2902_v25, %v5247_v7  ;;  %v8108_v50 = vpop.permute.xlu0 %3030 }
 0x3ea   :  { %v2900_v60 = vsel %vm2898_vm15, %v5245_v21, %v2899_v29  ;;  %v8106_v12 = vpop.permute.xlu1 %3035 }
 0x3eb   :  { %v2904_v44 = vsel %vm2897_vm7, %v2900_v60, %v2903_v61 }
 0x3ec   :  { %v2905_v9 = vsel %vm2894_vm4, nan, %v2904_v44 }
 0x3ed   :  { %v4963_v39 = vpack.c.bf16 %v2905_v9, %v2593_v14 }
 0x3ef   :  { %4964 = vmatprep.subr.bf16.mxu1 %v4963_v39 }
 0x3f0   :  { %4966 = vmatpush1.bf16.msra.mxu1 %v4965_v45 }
 0x3f3   :  { %4825 = vmatmul.mubr.msk.f32.vlgmr.msra.gmra.mrb[4].mxu1 %vm9516_vm14, %v5296_v55 }
 0x3f4   :  { %3120 = vmatprep.mubr.f32.mxu1 %v9515_v2 }
 0x3f7   :  { %4826 = vmatmul.mubr.msk.f32.gmra.mrb[6].mxu1 %vm9517_vm6, %v8058_v28 }
 0x3f8   :  { %3126 = vmatprep.mubr.f32.mxu1 %v9515_v2 }
 0x3fb   :  { %4827 = vmatmul.mubr.msk.f32.gmra.mrb[8].mxu1 %vm9518_vm2, %v8065_v19 }
 0x3fc   :  { %3132 = vmatprep.mubr.f32.mxu1 %v9515_v2 }
 0x3ff   :  { %4828 = vmatmul.mubr.msk.f32.gmra.mrb[10].mxu1 %vm9519_vm8, %v3013_v1 }
 0x4b3   :  { %v4928_v32 = vpop.f32.mrb[8].mxu0 }
 0x4b4   :  { %v3211_v48 = vadd.f32 %v4928_v32, %v8100_v24  ;;  %v3205_v27 = vpop.f32.mrb[9].mxu0 }
 0x4b5   :  { %v3206_v17 = vadd.f32 %v3205_v27, %v8102_v42 }
 0x4b6   :  { %v3229_v59 = vand.u32 2147483647, %v3211_v48 }
 0x4b7   :  { %v3226_v18 = vand.u32 2147483647, %v3206_v17  ;;  %v4931_v62 = vpop.f32.mrb[10].mxu0 }
 0x4b8   :  { %v3241_v35 = vadd.f32 1.0, %v3229_v59  ;;  %v3221_v46 = vadd.f32 %v4931_v62, %v8106_v12  ;;  %v3215_v20 = vpop.f32.mrb[11].mxu0  ;;  %v9522_v62 = vmov 920167782  }
 0x4b9   :  { %v3238_v56 = vadd.f32 1.0, %v3226_v18  ;;  %v3216_v51 = vadd.f32 %v3215_v20, %v8108_v50 }
 0x4ba   :  { %v3253_v10 = vmul.f32 30.0, %v3241_v35  ;;  %v3235_v58 = vand.u32 2147483647, %v3221_v46 }
 0x4bb   :  { %v3250_v28 = vmul.f32 30.0, %v3238_v56  ;;  %v3232_v3 = vand.u32 2147483647, %v3216_v51 }
 0x4bc   :  { %v8112_v6 = vmul.f32 %v3253_v10, %v3211_v48  ;;  %v3247_v19 = vadd.f32 1.0, %v3235_v58 }
 0x4bd   :  { %v8114_v31 = vmul.f32 %v3250_v28, %v3206_v17  ;;  %v3244_v57 = vadd.f32 1.0, %v3232_v3  ;;  %v9523_v28 = vmov 1326507024  }
 0x4be   :  { %9520 = vst [vmem:[#allocation31_spill] sm:$0xff] %v8112_v6  ;;  %v3792_v63 = vand.u32 2147483647, %v8112_v6  ;;  %v3795_v36 = vand.u32 2139095040, %v8112_v6  ;;  %v3259_v37 = vmul.f32 30.0, %v3247_v19 }
 0x4bf   :  { %v3480_v54 = vand.u32 2147483647, %v8114_v31  ;;  %v3483_v52 = vand.u32 2139095040, %v8114_v31  ;;  %v3256_v11 = vmul.f32 30.0, %v3244_v57 }
 0x4c0   :  { %v3796_v53 = vshrl.u32 %v3795_v36, 23  ;;  %v3799_v5 = vand.u32 8388607, %v3792_v63  ;;  %v8122_v1 = vmul.f32 %v3259_v37, %v3221_v46 }
 0x4c1   :  { %v3484_v13 = vshrl.u32 %v3483_v52, 23  ;;  %v3487_v23 = vand.u32 8388607, %v3480_v54  ;;  %v8132_v44 = vmul.f32 %v3256_v11, %v3216_v51 }
 0x4c2   :  { %9521 = vst [vmem:[#allocation8_spill] sm:$0xff] %v8122_v1  ;;  %v4853_v4 = vadd.s32 4294967169, %v3796_v53  ;;  %v4419_v15 = vand.u32 2139095040, %v8122_v1  ;;  %v3800_v21 = vor.u32 8388608, %v3799_v5  ;;  %v9325_v25 = vand.u32 2147483647, %v8122_v1 }
 0x4c3   :  { %v4841_v43 = vadd.s32 4294967169, %v3484_v13  ;;  %v3488_v33 = vor.u32 8388608, %v3487_v23 }
 0x4c4   :  { %v3802_v40 = vadd.s32 1, %v4853_v4  ;;  %v4420_v8 = vshrl.u32 %v4419_v15, 23  ;;  %v8136_v14 = vshll.u32 %v3800_v21, 8  ;;  %v8144_v38 = vand.u32 8388607, %v9325_v25 }
 0x4c5   :  { %v3490_v7 = vadd.s32 1, %v4841_v43  ;;  %v8140_v39 = vshll.u32 %v3488_v33, 8 }
 0x4c6   :  { %v8128_v30 = vpop.f32.mrb[4].mxu1  ;;  %vm3803_vm12 = vcmp.gt.s32.totalorder %v3802_v40, 0  ;;  %v4877_v34 = vadd.s32 4294967169, %v4420_v8 }
 0x4c7   :  { %v8130_v29 = vpop.f32.mrb[5].mxu1  ;;  %v3804_v47 = vsel %vm3803_vm12, %v3802_v40, 0  ;;  %vm3491_vm3 = vcmp.gt.s32.totalorder %v3490_v7, 0 }
 0x4c8   :  { %v3805_v61 = vshrl.u32 %v3804_v47, 5  ;;  %v3806_v60 = vand.u32 31, %v3804_v47  ;;  %v3492_v26 = vsel %vm3491_vm3, %v3490_v7, 0  ;;  %v8149_v27 = vadd.s32 1, %v4877_v34 }
 0x4c9   :  { %v8138_v9 = vshrl.u32 %v3492_v26, 5  ;;  %v3494_v48 = vand.u32 31, %v3492_v26 }
 0x4ca   :  { %v8134_v0 = vpop.f32.mrb[6].mxu1  ;;  %v3807_v55 = vsub.s32 32, %v3806_v60  ;;  %v3809_v32 = vshll.u32 %v9374_v16, %v3806_v60  ;;  %v3812_v17 = vshll.u32 %v9375_v22, %v3806_v60  ;;  %v3815_v59 = vshll.u32 %v9376_v41, %v3806_v60 }
 0x4cb   :  { %v8146_v45 = vpop.f32.mrb[7].mxu1  ;;  %v3818_v18 = vshll.u32 %v9373_v49, %v3806_v60  ;;  %v3821_v35 = vshll.u32 %v9522_v62, %v3806_v60  ;;  %vm3824_vm10 = vcmp.lt.s32.totalorder %v3805_v61, 1  ;;  %vm3825_vm5 = vcmp.lt.s32.totalorder %v3805_v61, 2 }
 0x4cc   :  { %v3810_v46 = vshrl.u32 %v9375_v22, %v3807_v55  ;;  %v3813_v20 = vshrl.u32 %v9376_v41, %v3807_v55  ;;  %v3816_v56 = vshrl.u32 %v9373_v49, %v3807_v55  ;;  %v3808_v10 = vshrl.u32 %v9374_v16, %v3807_v55 }
 0x4cd   :  { %v3819_v58 = vshrl.u32 %v9522_v62, %v3807_v55  ;;  %v3822_v19 = vshrl.u32 %v9523_v28, %v3807_v55  ;;  %v3495_v52 = vsub.s32 32, %v3494_v48  ;;  %vm3826_vm0 = vcmp.lt.s32.totalorder %v3805_v61, 3 }
 0x4ce   :  { %v8158_v51 = vpop.f32.mrb[8].mxu1  ;;  %v3811_v3 = vor.u32 %v3810_v46, %v3809_v32  ;;  %v3814_v36 = vor.u32 %v3813_v20, %v3812_v17  ;;  %v3817_v37 = vor.u32 %v3816_v56, %v3815_v59  ;;  %vm3827_vm15 = vcmp.lt.s32.totalorder %v3805_v61, 4 }
 0x4cf   :  { %v3820_v53 = vor.u32 %v3819_v58, %v3818_v18  ;;  %v3823_v5 = vor.u32 %v3822_v19, %v3821_v35  ;;  %v3497_v40 = vshll.u32 %v9374_v16, %v3494_v48  ;;  %v3498_v7 = vshrl.u32 %v9375_v22, %v3495_v52 }
 0x4d0   :  { %v3828_v57 = vsel %vm3824_vm10, %v3808_v10, %v3811_v3  ;;  %v3829_v13 = vsel %vm3827_vm15, %v3817_v37, 2102212464  ;;  %v3832_v23 = vsel %vm3824_vm10, %v3811_v3, %v3814_v36  ;;  %v3836_v4 = vsel %vm3824_vm10, %v3814_v36, %v3817_v37 }
 0x4d1   :  { %v3830_v43 = vsel %vm3826_vm0, %v3814_v36, %v3829_v13  ;;  %v3833_v15 = vsel %vm3827_vm15, %v3820_v53, 920167782  ;;  %v3837_v21 = vsel %vm3827_vm15, %v3823_v5, 1326507024  ;;  %v3500_v8 = vshll.u32 %v9375_v22, %v3494_v48 }
 0x4d2   :  { %v3834_v11 = vsel %vm3826_vm0, %v3817_v37, %v3833_v15  ;;  %v3838_v33 = vsel %vm3826_vm0, %v3820_v53, %v3837_v21  ;;  %v3831_v47 = vsel %vm3825_vm5, %v3828_v57, %v3830_v43  ;;  %v3501_v26 = vshrl.u32 %v9376_v41, %v3495_v52 }
 0x4d3   :  { %v3835_v34 = vsel %vm3825_vm5, %v3832_v23, %v3834_v11  ;;  %v3839_v60 = vsel %vm3825_vm5, %v3836_v4, %v3838_v33  ;;  %v3499_v18 = vor.u32 %v3498_v7, %v3497_v40  ;;  %v3503_v46 = vshll.u32 %v9376_v41, %v3494_v48 }
 0x4d4   :  { %v8174_v55 = vmul.u32.u64.low %v8136_v14, %v3839_v60  ;;  %v8175_v32 = vmul.u32.u64.high %v8136_v14, %v3839_v60, %v8174_v55  ;;  %v8178_v17 = vmul.u32.u64.low %v8136_v14, %v3835_v34  ;;  %v8179_v59 = vmul.u32.u64.high %v8136_v14, %v3835_v34, %v8178_v17  ;;  %v8208_v34 = vpop.f32.mrb[9].mxu1 }
 0x4d5   :  { %v3502_v35 = vor.u32 %v3501_v26, %v3500_v8  ;;  %v3504_v20 = vshrl.u32 %v9373_v49, %v3495_v52  ;;  %v3496_v61 = vshrl.u32 %v9374_v16, %v3495_v52  ;;  %v3506_v56 = vshll.u32 %v9373_v49, %v3494_v48 }
 0x4d6   :  { %v3507_v10 = vshrl.u32 %v9522_v62, %v3495_v52  ;;  %v3510_v58 = vshrl.u32 %v9523_v28, %v3495_v52  ;;  %v3847_v19 = vmul.u32 %v8136_v14, %v3831_v47  ;;  %v3509_v36 = vshll.u32 %v9522_v62, %v3494_v48 }
 0x4d7   :  { %v3505_v3 = vor.u32 %v3504_v20, %v3503_v46  ;;  %vm3512_vm1 = vcmp.lt.s32.totalorder %v8138_v9, 1  ;;  %vm3849_vm7 = vc.u32 %v8175_v32, %v8178_v17  ;;  %v3850_v37 = vadd.s32 1, %v8179_v59 }
 0x4d8   :  { %v3508_v53 = vor.u32 %v3507_v10, %v3506_v56  ;;  %vm3513_vm11 = vcmp.lt.s32.totalorder %v8138_v9, 2  ;;  %v3511_v5 = vor.u32 %v3510_v58, %v3509_v36  ;;  %vm3514_vm9 = vcmp.lt.s32.totalorder %v8138_v9, 3 }
 0x4d9   :  { %vm3515_vm4 = vcmp.lt.s32.totalorder %v8138_v9, 4  ;;  %v3520_v52 = vsel %vm3512_vm1, %v3499_v18, %v3502_v35  ;;  %v3851_v14 = vsel %vm3849_vm7, %v3850_v37, %v8179_v59  ;;  %v3524_v13 = vsel %vm3512_vm1, %v3502_v35, %v3505_v3 }
 0x4da   :  { %v3517_v57 = vsel %vm3515_vm4, %v3505_v3, 2102212464  ;;  %v3521_v48 = vsel %vm3515_vm4, %v3508_v53, 920167782  ;;  %v3852_v23 = vadd.s32 %v3851_v14, %v3847_v19  ;;  %v3516_v4 = vsel %vm3512_vm1, %v3496_v61, %v3499_v18 }
 0x4db   :  { %v3522_v43 = vsel %vm3514_vm9, %v3505_v3, %v3521_v48  ;;  %v3525_v15 = vsel %vm3515_vm4, %v3511_v5, 1326507024  ;;  %v3518_v21 = vsel %vm3514_vm9, %v3502_v35, %v3517_v57  ;;  %vm4427_vm13 = vcmp.gt.s32.totalorder %v8149_v27, 0 }
 0x4dc   :  { %v3523_v40 = vsel %vm3513_vm11, %v3520_v52, %v3522_v43  ;;  %v3526_v11 = vsel %vm3514_vm9, %v3508_v53, %v3525_v15  ;;  %v3853_v33 = vadd.s32 536870912, %v3852_v23  ;;  %v4428_v55 = vsel %vm4427_vm13, %v8149_v27, 0 }
 0x4dd   :  { %v3527_v7 = vsel %vm3513_vm11, %v3524_v13, %v3526_v11  ;;  %v8204_v8 = vmul.u32.u64.low %v8140_v39, %v3523_v40  ;;  %v8205_v47 = vmul.u32.u64.high %v8140_v39, %v3523_v40, %v8204_v8  ;;  %v4107_v59 = vand.u32 2139095040, %v8132_v44 }
 0x4de   :  { %v8211_v60 = vmul.u32.u64.low %v8140_v39, %v3527_v7  ;;  %v8212_v26 = vmul.u32.u64.high %v8140_v39, %v3527_v7, %v8211_v60  ;;  %v8216_v18 = vshrl.u32 %v3853_v33, 30  ;;  %v3519_v35 = vsel %vm3513_vm11, %v3516_v4, %v3518_v21 }
 0x4df   :  { %v4430_v46 = vand.u32 31, %v4428_v55  ;;  %v3538_v61 = vadd.s32 1, %v8205_v47  ;;  %v9323_v10 = vand.u32 2147483647, %v8132_v44  ;;  %v3535_v58 = vmul.u32 %v8140_v39, %v3519_v35 }
 0x4e0   :  { %v3855_v20 = vshll.u32 %v8216_v18, 30  ;;  %vm3537_vm14 = vc.u32 %v8212_v26, %v8204_v8  ;;  %v4424_v27 = vor.u32 8388608, %v8144_v38  ;;  %v4108_v19 = vshrl.u32 %v4107_v59, 23 }
 0x4e1   :  { %v4431_v56 = vsub.s32 32, %v4430_v46  ;;  %v3539_v9 = vsel %vm3537_vm14, %v3538_v61, %v8205_v47  ;;  %v8230_v36 = vshrl.u32 %v4428_v55, 5  ;;  %v4433_v37 = vshll.u32 %v9374_v16, %v4430_v46 }
 0x4e2   :  { %v8227_v3 = vsub.s32 %v3852_v23, %v3855_v20  ;;  %v3540_v53 = vadd.s32 %v3539_v9, %v3535_v58  ;;  %v4436_v52 = vshll.u32 %v9375_v22, %v4430_v46  ;;  %v4442_v57 = vshll.u32 %v9373_v49, %v4430_v46 }
 0x4e3   :  { %v4434_v5 = vshrl.u32 %v9375_v22, %v4431_v56  ;;  %v4437_v39 = vshrl.u32 %v9376_v41, %v4431_v56  ;;  %v4440_v38 = vshrl.u32 %v9373_v49, %v4431_v56  ;;  %v4443_v48 = vshrl.u32 %v9522_v62, %v4431_v56 }
 0x4e4   :  { %v3858_v14 = vsub.s32 0, %v8227_v3  ;;  %v3541_v13 = vadd.s32 536870912, %v3540_v53  ;;  %v4439_v43 = vshll.u32 %v9376_v41, %v4430_v46  ;;  %v4445_v40 = vshll.u32 %v9522_v62, %v4430_v46 }
 0x4e5   :  { %v4435_v23 = vor.u32 %v4434_v5, %v4433_v37  ;;  %v4438_v4 = vor.u32 %v4437_v39, %v4436_v52  ;;  %v4444_v21 = vor.u32 %v4443_v48, %v4442_v57  ;;  %v4446_v11 = vshrl.u32 %v9523_v28, %v4431_v56 }
 0x4e6   :  { %v4854_v15 = vmin.u32 %v3858_v14, %v8227_v3  ;;  %v3848_v33 = vadd.s32 %v8178_v17, %v8175_v32  ;;  %v8246_v7 = vshrl.u32 %v3541_v13, 30  ;;  %v4441_v47 = vor.u32 %v4440_v38, %v4439_v43 }
 0x4e7   :  { %v4464_v60 = vshll.u32 %v4424_v27, 8  ;;  %v4447_v59 = vor.u32 %v4446_v11, %v4445_v40  ;;  %vm4448_vm6 = vcmp.lt.s32.totalorder %v8230_v36, 1  ;;  %v4865_v35 = vadd.s32 4294967169, %v4108_v19 }
 0x4e8   :  { %v3860_v55 = vclz %v4854_v15  ;;  %v3543_v20 = vshll.u32 %v8246_v7, 30  ;;  %v4432_v61 = vshrl.u32 %v9374_v16, %v4431_v56  ;;  %vm4451_vm2 = vcmp.lt.s32.totalorder %v8230_v36, 4 }
 0x4e9   :  { %v4456_v46 = vsel %vm4448_vm6, %v4435_v23, %v4438_v4  ;;  %vm4449_vm8 = vcmp.lt.s32.totalorder %v8230_v36, 2  ;;  %vm4450_vm12 = vcmp.lt.s32.totalorder %v8230_v36, 3  ;;  %v4457_v32 = vsel %vm4451_vm2, %v4444_v21, 920167782 }
 0x4ea   :  { %v4855_v58 = vadd.s32 4294967294, %v3860_v55  ;;  %v8254_v17 = vsub.s32 %v3540_v53, %v3543_v20  ;;  %v4453_v27 = vsel %vm4451_vm2, %v4441_v47, 2102212464  ;;  %v4458_v9 = vsel %vm4450_vm12, %v4441_v47, %v4457_v32 }
 0x4eb   :  { %v4460_v19 = vsel %vm4448_vm6, %v4438_v4, %v4441_v47  ;;  %v4452_v37 = vsel %vm4448_vm6, %v4432_v61, %v4435_v23  ;;  %v4459_v56 = vsel %vm4449_vm8, %v4456_v46, %v4458_v9  ;;  %v4461_v5 = vsel %vm4451_vm2, %v4447_v59, 1326507024 }
 0x4ec   :  { %vm4856_vm3 = vcmp.lt.s32.totalorder %v4855_v58, 0  ;;  %v3546_v39 = vsub.s32 0, %v8254_v17  ;;  %v4462_v14 = vsel %vm4450_vm12, %v4444_v21, %v4461_v5  ;;  %v4114_v38 = vadd.s32 1, %v4865_v35 }
 0x4ed   :  { %v3863_v52 = vsel %vm4856_vm3, 0, %v4855_v58  ;;  %v4454_v48 = vsel %vm4450_vm12, %v4438_v4, %v4453_v27  ;;  %v4463_v13 = vsel %vm4449_vm8, %v4460_v19, %v4462_v14  ;;  %v8285_v9 = vadd.f32 %v8128_v30, %v8102_v42  ;;  %v8287_v19 = vpop.f32.mrb[10].mxu1 }
 0x4ee   :  { %v3864_v53 = vsub.s32 32, %v3863_v52  ;;  %v3868_v57 = vsub.s32 4294967266, %v3863_v52  ;;  %v4842_v23 = vmin.u32 %v3546_v39, %v8254_v17  ;;  %vm4115_vm10 = vcmp.gt.s32.totalorder %v4114_v38, 0 }
 0x4ef   :  { %v8268_v43 = vmul.u32.u64.low %v4464_v60, %v4463_v13  ;;  %v8269_v15 = vmul.u32.u64.high %v4464_v60, %v4463_v13, %v8268_v43  ;;  %v8271_v47 = vmul.u32.u64.low %v4464_v60, %v4459_v56  ;;  %v8272_v55 = vmul.u32.u64.high %v4464_v60, %v4459_v56, %v8271_v47 }
 0x4f0   :  { %v3866_v40 = vshrl.u32 %v3848_v33, %v3864_v53  ;;  %v3869_v11 = vadd.s32 127, %v3868_v57  ;;  %v3548_v21 = vclz %v4842_v23  ;;  %v4116_v59 = vsel %vm4115_vm10, %v4114_v38, 0 }
 0x4f1   :  { %v3865_v35 = vshll.u32 %v8227_v3, %v3863_v52  ;;  %v4455_v20 = vsel %vm4449_vm8, %v4452_v37, %v4454_v48  ;;  %v4118_v61 = vand.u32 31, %v4116_v59  ;;  %vm4473_vm5 = vc.u32 %v8269_v15, %v8271_v47 }
 0x4f2   :  { %v3870_v4 = vshll.u32 %v3869_v11, 23  ;;  %v4843_v46 = vadd.s32 4294967294, %v3548_v21  ;;  %v4111_v33 = vand.u32 8388607, %v9323_v10  ;;  %v4474_v27 = vadd.s32 1, %v8272_v55 }
 0x4f3   :  { %v3867_v58 = vor.u32 %v3866_v40, %v3865_v35  ;;  %v4471_v3 = vmul.u32 %v4464_v60, %v4455_v20  ;;  %v4119_v36 = vsub.s32 32, %v4118_v61  ;;  %v3536_v53 = vadd.s32 %v8204_v8, %v8212_v26 }
 0x4f4   :  { %v3871_v32 = vor.u32 4788187, %v3870_v4  ;;  %vm4844_vm0 = vcmp.lt.s32.totalorder %v4843_v46, 0  ;;  %v4475_v56 = vsel %vm4473_vm5, %v4474_v27, %v8272_v55  ;;  %v4112_v14 = vor.u32 8388608, %v4111_v33 }
 0x4f5   :  { %v3551_v37 = vsel %vm4844_vm0, 0, %v4843_v46  ;;  %v4476_v39 = vadd.s32 %v4475_v56, %v4471_v3  ;;  %v3874_v38 = vcvt.s32.f32 %v3867_v58  ;;  %v3224_v30 = vand.u32 2147483647, %v8285_v9 }
 0x4f6   :  { %v3872_v5 = vand.u32 2147483647, %v3871_v32  ;;  %v3556_v52 = vsub.s32 4294967266, %v3551_v37  ;;  %v3552_v57 = vsub.s32 32, %v3551_v37  ;;  %v4122_v60 = vshrl.u32 %v9375_v22, %v4119_v36 }
 0x4f7   :  { %v4477_v13 = vadd.s32 536870912, %v4476_v39  ;;  %v4125_v23 = vshrl.u32 %v9376_v41, %v4119_v36  ;;  %v8295_v43 = vshrl.u32 %v4116_v59, 5  ;;  %v4121_v40 = vshll.u32 %v9374_v16, %v4118_v61 }
 0x4f8   :  { %v3557_v48 = vadd.s32 127, %v3556_v52  ;;  %v4124_v11 = vshll.u32 %v9375_v22, %v4118_v61  ;;  %v4128_v55 = vshrl.u32 %v9373_v49, %v4119_v36  ;;  %v8300_v21 = vmul.f32 %v3874_v38, %v3872_v5 }
 0x4f9   :  { %v8302_v8 = vshrl.u32 %v4477_v13, 30  ;;  %v4127_v26 = vshll.u32 %v9376_v41, %v4118_v61  ;;  %v4131_v35 = vshrl.u32 %v9522_v62, %v4119_v36  ;;  %v4130_v20 = vshll.u32 %v9373_v49, %v4118_v61 }
 0x4fa   :  { %v3558_v4 = vshll.u32 %v3557_v48, 23  ;;  %v4133_v59 = vshll.u32 %v9522_v62, %v4118_v61  ;;  %v4134_v46 = vshrl.u32 %v9523_v28, %v4119_v36  ;;  %v3554_v33 = vshrl.u32 %v3536_v53, %v3552_v57 }
 0x4fb   :  { %v4479_v58 = vshll.u32 %v8302_v8, 30  ;;  %v4123_v32 = vor.u32 %v4122_v60, %v4121_v40  ;;  %v4126_v27 = vor.u32 %v4125_v23, %v4124_v11  ;;  %v4129_v3 = vor.u32 %v4128_v55, %v4127_v26 }
 0x4fc   :  { %v4132_v56 = vor.u32 %v4131_v35, %v4130_v20  ;;  %v4135_v5 = vor.u32 %v4134_v46, %v4133_v59  ;;  %v8312_v52 = vadd.f32 %v8130_v29, %v8102_v42  ;;  %v3553_v38 = vshll.u32 %v8254_v17, %v3551_v37  ;;  %v8341_v59 = vpop.f32.mrb[11].mxu1 }
 0x4fd   :  { %v8315_v48 = vsub.s32 %v4476_v39, %v4479_v58  ;;  %v4152_v13 = vshll.u32 %v4112_v14, 8  ;;  %v3236_v61 = vadd.f32 1.0, %v3224_v30  ;;  %v3876_v10 = vxor.u32 2147483648, %v8300_v21 }
 0x4fe   :  { %v3559_v53 = vor.u32 4788187, %v3558_v4  ;;  %v4120_v57 = vshrl.u32 %v9374_v16, %v4119_v36  ;;  %vm4136_vm15 = vcmp.lt.s32.totalorder %v8295_v43, 1  ;;  %vm3794_vm1 = vcmp.lt.s32.totalorder %v8112_v6, 0 }
 0x4ff   :  { %v3555_v60 = vor.u32 %v3554_v33, %v3553_v38  ;;  %v4482_v23 = vsub.s32 0, %v8315_v48  ;;  %vm4139_vm7 = vcmp.lt.s32.totalorder %v8295_v43, 4  ;;  %v4144_v42 = vsel %vm4136_vm15, %v4123_v32, %v4126_v27 }
 0x500   :  { %vm4138_vm11 = vcmp.lt.s32.totalorder %v8295_v43, 3  ;;  %v4145_v29 = vsel %vm4139_vm7, %v4132_v56, 920167782  ;;  %v4148_v17 = vsel %vm4136_vm15, %v4126_v27, %v4129_v3  ;;  %v4149_v37 = vsel %vm4139_vm7, %v4135_v5, 1326507024 }
 0x501   :  { %v4878_v36 = vmin.u32 %v4482_v23, %v8315_v48  ;;  %vm4137_vm9 = vcmp.lt.s32.totalorder %v8295_v43, 2  ;;  %v4141_v39 = vsel %vm4139_vm7, %v4129_v3, 2102212464  ;;  %v4146_v14 = vsel %vm4138_vm11, %v4129_v3, %v4145_v29 }
 0x502   :  { %v3560_v30 = vand.u32 2147483647, %v3559_v53  ;;  %v4147_v40 = vsel %vm4137_vm9, %v4144_v42, %v4146_v14  ;;  %v4150_v11 = vsel %vm4138_vm11, %v4132_v56, %v4149_v37  ;;  %v3248_v55 = vmul.f32 30.0, %v3236_v61 }
 0x503   :  { %v4484_v26 = vclz %v4878_v36  ;;  %v4140_v35 = vsel %vm4136_vm15, %v4120_v57, %v4123_v32  ;;  %v4151_v4 = vsel %vm4137_vm9, %v4148_v17, %v4150_v11  ;;  %v3225_v20 = vand.u32 2147483647, %v8312_v52 }
 0x504   :  { %v4142_v46 = vsel %vm4138_vm11, %v4126_v27, %v4141_v39  ;;  %v8345_v33 = vmul.u32.u64.low %v4152_v13, %v4151_v4  ;;  %v8346_v58 = vmul.u32.u64.high %v4152_v13, %v4151_v4, %v8345_v33  ;;  %v8349_v3 = vmul.f32 %v3248_v55, %v8285_v9 }
 0x505   :  { %v3562_v56 = vcvt.s32.f32 %v3555_v60  ;;  %v4879_v5 = vadd.s32 4294967294, %v4484_v26  ;;  %v8351_v38 = vmul.u32.u64.low %v4152_v13, %v4147_v40  ;;  %v8352_v32 = vmul.u32.u64.high %v4152_v13, %v4147_v40, %v8351_v38 }
 0x506   :  { %9524 = vst [vmem:[#allocation18_spill] sm:$0xff] %v8349_v3  ;;  %vm8356_vm4 = vcmp.le.f32.partialorder %v3792_v63, 0.7853982  ;;  %vm3482_vm13 = vcmp.lt.s32.totalorder %v8114_v31, 0  ;;  %v3275_v27 = vand.u32 2139095040, %v8349_v3  ;;  %v8364_v53 = vadd.f32 %v8134_v0, %v8100_v24 }
 0x507   :  { %v3563_v9 = vmul.f32 %v3562_v56, %v3560_v30  ;;  %vm4880_vm14 = vcmp.lt.s32.totalorder %v4879_v5, 0  ;;  %v4143_v57 = vsel %vm4137_vm9, %v4140_v35, %v4142_v46  ;;  %v3237_v60 = vadd.f32 1.0, %v3225_v20 }
 0x508   :  { %v3877_v63 = vsel %vm3794_vm1, %v3876_v10, %v8300_v21  ;;  %v8371_v23 = vsel %vm4880_vm14, 0, %v4879_v5  ;;  %vm4161_vm6 = vc.u32 %v8346_v58, %v8351_v38  ;;  %v9324_v42 = vand.u32 2147483647, %v8349_v3 }
 0x509   :  { %v3878_v29 = vsub.s32 4, %v8216_v18  ;;  %vm8378_vm2 = vcmp.le.f32.partialorder %v3480_v54, 0.7853982  ;;  %v3566_v43 = vsub.s32 4, %v8246_v7  ;;  %v4162_v17 = vadd.s32 1, %v8352_v32 }
 0x50a   :  { %vm4418_vm8 = vcmp.lt.s32.totalorder %v8122_v1, 0  ;;  %v4159_v10 = vmul.u32 %v4152_v13, %v4143_v57  ;;  %v3276_v21 = vshrl.u32 %v3275_v27, 23  ;;  %v3249_v37 = vmul.f32 30.0, %v3237_v60 }
 0x50b   :  { %v3880_v36 = vsel %vm8356_vm4, %v8112_v6, %v3877_v63  ;;  %v3564_v39 = vxor.u32 2147483648, %v3563_v9  ;;  %v4492_v14 = vsub.s32 4294967266, %v8371_v23  ;;  %v4163_v54 = vsel %vm4161_vm6, %v4162_v17, %v8352_v32 }
 0x50c   :  { %v4164_v30 = vadd.s32 %v4163_v54, %v4159_v10  ;;  %v4833_v40 = vadd.s32 4294967169, %v3276_v21  ;;  %v3279_v11 = vand.u32 8388607, %v9324_v42  ;;  %v3227_v55 = vand.u32 2147483647, %v8364_v53 }
 0x50d   :  { %v8396_v13 = vsel %vm3794_vm1, %v3878_v29, %v8216_v18  ;;  %v8401_v26 = vsel %vm3482_vm13, %v3566_v43, %v8246_v7  ;;  %v4502_v35 = vsub.s32 4, %v8302_v8  ;;  %v8405_v4 = vmul.f32 %v3249_v37, %v8312_v52 }
 0x50e   :  { %5248 = vcosq.f32 %v3880_v36  ;;  %v4472_v20 = vadd.s32 %v8271_v47, %v8269_v15  ;;  %v4165_v46 = vadd.s32 536870912, %v4164_v30  ;;  %v3282_v33 = vadd.s32 1, %v4833_v40 }
 0x50f   :  { %v3565_v18 = vsel %vm3482_vm13, %v3564_v39, %v3563_v9  ;;  %v4488_v56 = vsub.s32 32, %v8371_v23  ;;  %v4493_v5 = vadd.s32 127, %v4492_v14  ;;  %v8414_v7 = vadd.f32 %v8146_v45, %v8100_v24 }
 0x510   :  { %v8416_v32 = vshrl.u32 %v4165_v46, 30  ;;  %v3280_v52 = vor.u32 8388608, %v3279_v11  ;;  %vm3283_vm12 = vcmp.gt.s32.totalorder %v3282_v33, 0  ;;  %v3239_v27 = vadd.f32 1.0, %v3227_v55 }
 0x511   :  { %5250 = vsinq.f32 %v3880_v36  ;;  %v8421_v15 = vsel %vm4418_vm8, %v4502_v35, %v8302_v8  ;;  %v3284_v47 = vsel %vm3283_vm12, %v3282_v33, 0  ;;  %v3379_v9 = vand.u32 2139095040, %v8405_v4 }
 0x512   :  { %9529 = vst [vmem:[#allocation12_spill] sm:$0xff] %v8421_v15  ;;  %v8427_v57 = vsel %vm8378_vm2, %v8114_v31, %v3565_v18  ;;  %v8430_v24 = vadd.s32 %v8351_v38, %v8346_v58  ;;  %v4167_v45 = vshll.u32 %v8416_v32, 30  ;;  %v3286_v60 = vand.u32 31, %v3284_v47 }
 0x513   :  { %v4489_v63 = vshll.u32 %v8315_v48, %v8371_v23  ;;  %v4490_v29 = vshrl.u32 %v4472_v20, %v4488_v56  ;;  %v4494_v8 = vshll.u32 %v4493_v5, 23  ;;  %v3228_v43 = vand.u32 2147483647, %v8414_v7 }
 0x514   :  { %v8436_v17 = vsub.s32 %v4164_v30, %v4167_v45  ;;  %v3287_v10 = vsub.s32 32, %v3286_v60  ;;  %v8438_v21 = vshll.u32 %v3280_v52, 8  ;;  %v3251_v37 = vmul.f32 30.0, %v3239_v27 }
 0x515   :  { %v3285_v36 = vshrl.u32 %v3284_v47, 5  ;;  %v3289_v58 = vshll.u32 %v9374_v16, %v3286_v60  ;;  %v3380_v39 = vshrl.u32 %v3379_v9, 23  ;;  %v3292_v23 = vshll.u32 %v9375_v22, %v3286_v60 }
 0x516   :  { %v4170_v14 = vsub.s32 0, %v8436_v17  ;;  %v3290_v48 = vshrl.u32 %v9375_v22, %v3287_v10  ;;  %v3293_v54 = vshrl.u32 %v9376_v41, %v3287_v10  ;;  %v3295_v30 = vshll.u32 %v9376_v41, %v3286_v60 }
 0x517   :  { %v3296_v40 = vshrl.u32 %v9373_v49, %v3287_v10  ;;  %v3298_v11 = vshll.u32 %v9373_v49, %v3286_v60  ;;  %v3299_v55 = vshrl.u32 %v9522_v62, %v3287_v10  ;;  %v4495_v20 = vor.u32 4788187, %v4494_v8 }
 0x518   :  { %v8450_v35 = vpop.eup %5248  ;;  %v4866_v46 = vmin.u32 %v4170_v14, %v8436_v17  ;;  %v3291_v33 = vor.u32 %v3290_v48, %v3289_v58  ;;  %v3294_v18 = vor.u32 %v3293_v54, %v3292_v23  ;;  %v3301_v52 = vshll.u32 %v9522_v62, %v3286_v60 }
 0x519   :  { %v3297_v56 = vor.u32 %v3296_v40, %v3295_v30  ;;  %v3300_v5 = vor.u32 %v3299_v55, %v3298_v11  ;;  %v3302_v27 = vshrl.u32 %v9523_v28, %v3287_v10  ;;  %v3288_v9 = vshrl.u32 %v9374_v16, %v3287_v10 }
 0x51a   :  { %v4172_v47 = vclz %v4866_v46  ;;  %vm3304_vm3 = vcmp.lt.s32.totalorder %v3285_v36, 1  ;;  %v4837_v45 = vadd.s32 4294967169, %v3380_v39  ;;  %vm3305_vm10 = vcmp.lt.s32.totalorder %v3285_v36, 2 }
 0x51b   :  { %v8456_v42 = vpop.eup %5250  ;;  %v3303_v25 = vor.u32 %v3302_v27, %v3301_v52  ;;  %vm3306_vm5 = vcmp.lt.s32.totalorder %v3285_v36, 3  ;;  %vm3307_vm0 = vcmp.lt.s32.totalorder %v3285_v36, 4  ;;  %v3312_v14 = vsel %vm3304_vm3, %v3291_v33, %v3294_v18 }
 0x51c   :  { %v4867_v8 = vadd.s32 4294967294, %v4172_v47  ;;  %v3309_v58 = vsel %vm3307_vm0, %v3297_v56, 2102212464  ;;  %v3313_v48 = vsel %vm3307_vm0, %v3300_v5, 920167782  ;;  %v3308_v23 = vsel %vm3304_vm3, %v3288_v9, %v3291_v33 }
 0x51d   :  { %v3314_v54 = vsel %vm3306_vm5, %v3297_v56, %v3313_v48  ;;  %v3316_v60 = vsel %vm3304_vm3, %v3294_v18, %v3297_v56  ;;  %v3317_v30 = vsel %vm3307_vm0, %v3303_v25, 1326507024  ;;  %v3310_v40 = vsel %vm3306_vm5, %v3294_v18, %v3309_v58 }
 0x51e   :  { %vm4868_vm15 = vcmp.lt.s32.totalorder %v4867_v8, 0  ;;  %v3315_v10 = vsel %vm3305_vm10, %v3312_v14, %v3314_v54  ;;  %v3318_v11 = vsel %vm3306_vm5, %v3300_v5, %v3317_v30  ;;  %v4491_v27 = vor.u32 %v4490_v29, %v4489_v63 }
 0x51f   :  { %v4175_v39 = vsel %vm4868_vm15, 0, %v4867_v8  ;;  %v3319_v55 = vsel %vm3305_vm10, %v3316_v60, %v3318_v11  ;;  %v8461_v46 = vmul.u32.u64.low %v8438_v21, %v3315_v10  ;;  %v8462_v52 = vmul.u32.u64.high %v8438_v21, %v3315_v10, %v8461_v46 }
 0x520   :  { %v4176_v47 = vsub.s32 32, %v4175_v39  ;;  %v4180_v38 = vsub.s32 4294967266, %v4175_v39  ;;  %v3240_v33 = vadd.f32 1.0, %v3228_v43  ;;  %v9530_v18 = vand.u32 2147483647, %v8405_v4 }
 0x521   :  { %v8466_v56 = vmul.u32.u64.low %v8438_v21, %v3319_v55  ;;  %v8467_v25 = vmul.u32.u64.high %v8438_v21, %v3319_v55, %v8466_v56  ;;  %v3386_v5 = vadd.s32 1, %v4837_v45  ;;  %v4496_v8 = vand.u32 2147483647, %v4495_v20 }
 0x522   :  { %v3383_v9 = vand.u32 8388607, %v9530_v18  ;;  %v4181_v58 = vadd.s32 127, %v4180_v38  ;;  %v3311_v14 = vsel %vm3305_vm10, %v3308_v23, %v3310_v40  ;;  %v8473_v48 = vmul.f32 %v3251_v37, %v8364_v53 }
 0x523   :  { %5252 = vcosq.f32 %v8427_v57  ;;  %v4178_v63 = vshrl.u32 %v8430_v24, %v4176_v47  ;;  %v3330_v29 = vadd.s32 1, %v8462_v52  ;;  %vm3387_vm1 = vcmp.gt.s32.totalorder %v3386_v5, 0 }
 0x524   :  { %9531 = vst [vmem:[#allocation21_spill] sm:$0xff] %v8473_v48  ;;  %v4498_v43 = vcvt.s32.f32 %v4491_v27  ;;  %v4182_v54 = vshll.u32 %v4181_v58, 23  ;;  %v3388_v60 = vsel %vm3387_vm1, %v3386_v5, 0  ;;  %v8478_v30 = vmul.f32 30.0, %v3240_v33 }
 0x525   :  { %v4177_v20 = vshll.u32 %v8436_v17, %v4175_v39  ;;  %v3327_v36 = vmul.u32 %v8438_v21, %v3311_v14  ;;  %vm3329_vm7 = vc.u32 %v8467_v25, %v8461_v46  ;;  %v3390_v53 = vand.u32 31, %v3388_v60 }
 0x526   :  { %v4499_v37 = vmul.f32 %v4498_v43, %v4496_v8  ;;  %v3331_v38 = vsel %vm3329_vm7, %v3330_v29, %v8462_v52  ;;  %v3384_v24 = vor.u32 8388608, %v3383_v9  ;;  %v3587_v11 = vand.u32 2139095040, %v8473_v48 }
 0x527   :  { %v4179_v23 = vor.u32 %v4178_v63, %v4177_v20  ;;  %v3332_v40 = vadd.s32 %v3331_v38, %v3327_v36  ;;  %v3391_v10 = vsub.s32 32, %v3390_v53  ;;  %v4183_v55 = vor.u32 4788187, %v4182_v54 }
 0x528   :  { %v3389_v27 = vshrl.u32 %v3388_v60, 5  ;;  %v3393_v17 = vshll.u32 %v9374_v16, %v3390_v53  ;;  %v3396_v21 = vshll.u32 %v9375_v22, %v3390_v53  ;;  %v3399_v52 = vshll.u32 %v9376_v41, %v3390_v53 }
 0x529   :  { %v3333_v39 = vadd.s32 536870912, %v3332_v40  ;;  %v3394_v47 = vshrl.u32 %v9375_v22, %v3391_v10  ;;  %v3397_v33 = vshrl.u32 %v9376_v41, %v3391_v10  ;;  %v3400_v56 = vshrl.u32 %v9373_v49, %v3391_v10 }
 0x52a   :  { %v3402_v18 = vshll.u32 %v9373_v49, %v3390_v53  ;;  %v3403_v9 = vshrl.u32 %v9522_v62, %v3391_v10  ;;  %v3406_v5 = vshrl.u32 %v9523_v28, %v3391_v10  ;;  %v4500_v8 = vxor.u32 2147483648, %v4499_v37 }
 0x52b   :  { %v8496_v58 = vshrl.u32 %v3333_v39, 30  ;;  %v3395_v14 = vor.u32 %v3394_v47, %v3393_v17  ;;  %v3398_v63 = vor.u32 %v3397_v33, %v3396_v21  ;;  %v4184_v29 = vand.u32 2147483647, %v4183_v55 }
 0x52c   :  { %v3401_v43 = vor.u32 %v3400_v56, %v3399_v52  ;;  %v3404_v54 = vor.u32 %v3403_v9, %v3402_v18  ;;  %v3405_v60 = vshll.u32 %v9522_v62, %v3390_v53  ;;  %v4186_v36 = vcvt.s32.f32 %v4179_v23 }
 0x52d   :  { %v8499_v20 = vpop.eup %5252  ;;  %v3335_v38 = vshll.u32 %v8496_v58, 30  ;;  %v3424_v45 = vshll.u32 %v3384_v24, 8  ;;  %v9532_v2 = vand.u32 2147483647, %v8473_v48  ;;  %vm3408_vm11 = vcmp.lt.s32.totalorder %v3389_v27, 1 }
 0x52e   :  { %v3407_v6 = vor.u32 %v3406_v5, %v3405_v60  ;;  %vm3411_vm9 = vcmp.lt.s32.totalorder %v3389_v27, 4  ;;  %v3588_v39 = vshrl.u32 %v3587_v11, 23  ;;  %v9533_v17 = vand.u32 2147483647, %v8122_v1 }
 0x52f   :  { %v3591_v15 = vand.u32 8388607, %v9532_v2  ;;  %v9534_v55 = vmov 0  ;;  %vm4106_vm14 = vcmp.lt.s32.totalorder %v8132_v44, 0  ;;  %v8511_v53 = vsub.s32 %v3332_v40, %v3335_v38 }
 0x530   :  { %vm8506_vm13 = vcmp.le.f32.partialorder %v9533_v17, 0.7853982  ;;  %v3392_v23 = vshrl.u32 %v9374_v16, %v3391_v10  ;;  %v3413_v24 = vsel %vm3411_vm9, %v3401_v43, 2102212464  ;;  %v3416_v2 = vsel %vm3408_vm11, %v3395_v14, %v3398_v63 }
 0x531   :  { %v9535_v55 = vsel %vm8506_vm13, 4294967295, %v9534_v55  ;;  %v4187_v21 = vmul.f32 %v4186_v36, %v4184_v29  ;;  %vm3409_vm6 = vcmp.lt.s32.totalorder %v3389_v27, 2  ;;  %vm3410_vm12 = vcmp.lt.s32.totalorder %v3389_v27, 3 }
 0x532   :  { %9536 = vst [vmem:[#allocation26_spill] sm:$0xff] %v9535_v55  ;;  %v3417_v11 = vsel %vm3411_vm9, %v3404_v54, 920167782  ;;  %v3338_v47 = vsub.s32 0, %v8511_v53  ;;  %v3412_v33 = vsel %vm3408_vm11, %v3392_v23, %v3395_v14  ;;  %v3420_v56 = vsel %vm3408_vm11, %v3398_v63, %v3401_v43 }
 0x533   :  { %v3418_v52 = vsel %vm3410_vm12, %v3401_v43, %v3417_v11  ;;  %v3414_v40 = vsel %vm3410_vm12, %v3398_v63, %v3413_v24  ;;  %v3421_v10 = vsel %vm3411_vm9, %v3407_v6, 1326507024  ;;  %v4845_v9 = vadd.s32 4294967169, %v3588_v39 }
 0x534   :  { %v3419_v18 = vsel %vm3409_vm6, %v3416_v2, %v3418_v52  ;;  %v4834_v5 = vmin.u32 %v3338_v47, %v8511_v53  ;;  %v3422_v29 = vsel %vm3410_vm12, %v3404_v54, %v3421_v10  ;;  %v4501_v38 = vsel %vm4418_vm8, %v4500_v8, %v4499_v37 }
 0x535   :  { %v8523_v60 = vmul.u32.u64.low %v3424_v45, %v3419_v18  ;;  %v8524_v36 = vmul.u32.u64.high %v3424_v45, %v3419_v18, %v8523_v60  ;;  %v4190_v14 = vsub.s32 4, %v8416_v32  ;;  %v3423_v43 = vsel %vm3409_vm6, %v3420_v56, %v3422_v29 }
 0x536   :  { %v3594_v63 = vadd.s32 1, %v4845_v9  ;;  %v4188_v17 = vxor.u32 2147483648, %v4187_v21  ;;  %v3340_v23 = vclz %v4834_v5  ;;  %5254 = vsinq.f32 %v8427_v57 }
 0x537   :  { %v8531_v24 = vmul.u32.u64.low %v3424_v45, %v3423_v43  ;;  %v8532_v6 = vmul.u32.u64.high %v3424_v45, %v3423_v43, %v8531_v24  ;;  %v3415_v54 = vsel %vm3409_vm6, %v3412_v33, %v3414_v40  ;;  %v8538_v39 = vmul.f32 %v8478_v30, %v8414_v7 }
 0x538   :  { %vm3595_vm3 = vcmp.gt.s32.totalorder %v3594_v63, 0  ;;  %v4835_v37 = vadd.s32 4294967294, %v3340_v23  ;;  %v3434_v8 = vadd.s32 1, %v8524_v36  ;;  %v3592_v2 = vor.u32 8388608, %v3591_v15 }
 0x539   :  { %v3596_v11 = vsel %vm3595_vm3, %v3594_v63, 0  ;;  %v8544_v47 = vsel %vm8506_vm13, %v8122_v1, %v4501_v38  ;;  %v8549_v57 = vsel %vm4106_vm14, %v4190_v14, %v8416_v32  ;;  %v3328_v27 = vadd.s32 %v8461_v46, %v8467_v25 }
 0x53a   :  { %v3598_v7 = vand.u32 31, %v3596_v11  ;;  %v8555_v30 = vsel %vm4106_vm14, %v4188_v17, %v4187_v21  ;;  %vm4836_vm8 = vcmp.lt.s32.totalorder %v4835_v37, 0  ;;  %v3431_v15 = vmul.u32 %v3424_v45, %v3415_v54 }
 0x53b   :  { %vm3433_vm10 = vc.u32 %v8532_v6, %v8523_v60  ;;  %v3343_v33 = vsel %vm4836_vm8, 0, %v4835_v37  ;;  %v9329_v32 = vand.u32 2147483647, %v8538_v39  ;;  %v8561_v46 = vshll.u32 %v3592_v2, 8 }
 0x53c   :  { %v3435_v52 = vsel %vm3433_vm10, %v3434_v8, %v8524_v36  ;;  %v3599_v56 = vsub.s32 32, %v3598_v7  ;;  %v3344_v40 = vsub.s32 32, %v3343_v33  ;;  %v3348_v18 = vsub.s32 4294967266, %v3343_v33 }
 0x53d   :  { %v3436_v10 = vadd.s32 %v3435_v52, %v3431_v15  ;;  %v3601_v25 = vshll.u32 %v9374_v16, %v3598_v7  ;;  %v3691_v9 = vand.u32 2139095040, %v8538_v39  ;;  %v3597_v38 = vshrl.u32 %v3596_v11, 5 }
 0x53e   :  { %v3602_v21 = vshrl.u32 %v9375_v22, %v3599_v56  ;;  %v3605_v45 = vshrl.u32 %v9376_v41, %v3599_v56  ;;  %v3349_v5 = vadd.s32 127, %v3348_v18  ;;  %v3604_v36 = vshll.u32 %v9375_v22, %v3598_v7 }
 0x53f   :  { %v3437_v29 = vadd.s32 536870912, %v3436_v10  ;;  %v3346_v14 = vshrl.u32 %v3328_v27, %v3344_v40  ;;  %v3607_v63 = vshll.u32 %v9376_v41, %v3598_v7  ;;  %v3608_v17 = vshrl.u32 %v9373_v49, %v3599_v56 }
 0x540   :  { %v3603_v43 = vor.u32 %v3602_v21, %v3601_v25  ;;  %v3350_v23 = vshll.u32 %v3349_v5, 23  ;;  %v3610_v54 = vshll.u32 %v9373_v49, %v3598_v7  ;;  %v3611_v37 = vshrl.u32 %v9522_v62, %v3599_v56  ;;  %v8574_v8 = vpop.eup %5254 }
 0x541   :  { %v8570_v24 = vshrl.u32 %v3437_v29, 30  ;;  %v3606_v2 = vor.u32 %v3605_v45, %v3604_v36  ;;  %v3609_v15 = vor.u32 %v3608_v17, %v3607_v63  ;;  %v3613_v11 = vshll.u32 %v9522_v62, %v3598_v7 }
 0x542   :  { %v3614_v27 = vshrl.u32 %v9523_v28, %v3599_v56  ;;  %v3345_v52 = vshll.u32 %v8511_v53, %v3343_v33  ;;  %v3612_v18 = vor.u32 %v3611_v37, %v3610_v54  ;;  %v3695_v25 = vand.u32 8388607, %v9329_v32 }
 0x543   :  { %9537 = vst [vmem:[#allocation24_spill] sm:$0xff] %v8570_v24  ;;  %v3439_v40 = vshll.u32 %v8570_v24, 30  ;;  %v9538_v21 = vand.u32 2147483647, %v8132_v44  ;;  %v3351_v45 = vor.u32 4788187, %v3350_v23  ;;  %v3600_v29 = vshrl.u32 %v9374_v16, %v3599_v56 }
 0x544   :  { %v3615_v7 = vor.u32 %v3614_v27, %v3613_v11  ;;  %v3692_v36 = vshrl.u32 %v3691_v9, 23  ;;  %v3347_v63 = vor.u32 %v3346_v14, %v3345_v52  ;;  %vm3616_vm0 = vcmp.lt.s32.totalorder %v3597_v38, 1 }
 0x545   :  { %vm8584_vm5 = vcmp.le.f32.partialorder %v9538_v21, 0.7853982  ;;  %v8589_v17 = vsub.s32 %v3436_v10, %v3439_v40  ;;  %vm3619_vm15 = vcmp.lt.s32.totalorder %v3597_v38, 4  ;;  %vm3618_vm1 = vcmp.lt.s32.totalorder %v3597_v38, 3 }
 0x546   :  { %v3621_v53 = vsel %vm3619_vm15, %v3609_v15, 2102212464  ;;  %v3624_v33 = vsel %vm3616_vm0, %v3603_v43, %v3606_v2  ;;  %v3625_v54 = vsel %vm3619_vm15, %v3612_v18, 920167782  ;;  %vm3274_vm7 = vcmp.lt.s32.totalorder %v8349_v3, 0 }
 0x547   :  { %v3442_v37 = vsub.s32 0, %v8589_v17  ;;  %vm3617_vm11 = vcmp.lt.s32.totalorder %v3597_v38, 2  ;;  %v3626_v23 = vsel %vm3618_vm1, %v3609_v15, %v3625_v54  ;;  %v3628_v56 = vsel %vm3616_vm0, %v3606_v2, %v3609_v15 }
 0x548   :  { %v3352_v9 = vand.u32 2147483647, %v3351_v45  ;;  %v3627_v10 = vsel %vm3617_vm11, %v3624_v33, %v3626_v23  ;;  %v3629_v14 = vsel %vm3619_vm15, %v3615_v7, 1326507024  ;;  %v4849_v11 = vadd.s32 4294967169, %v3692_v36 }
 0x549   :  { %v4838_v27 = vmin.u32 %v3442_v37, %v8589_v17  ;;  %v3620_v52 = vsel %vm3616_vm0, %v3600_v29, %v3603_v43  ;;  %v3622_v40 = vsel %vm3618_vm1, %v3606_v2, %v3621_v53  ;;  %v3630_v21 = vsel %vm3618_vm1, %v3612_v18, %v3629_v14 }
 0x54a   :  { %v3631_v32 = vsel %vm3617_vm11, %v3628_v56, %v3630_v21  ;;  %v8603_v1 = vmul.u32.u64.low %v8561_v46, %v3627_v10  ;;  %v8604_v54 = vmul.u32.u64.high %v8561_v46, %v3627_v10, %v8603_v1  ;;  %v3698_v15 = vadd.s32 1, %v4849_v11 }
 0x54b   :  { %v3444_v45 = vclz %v4838_v27  ;;  %v8608_v7 = vmul.u32.u64.low %v8561_v46, %v3631_v32  ;;  %v8609_v36 = vmul.u32.u64.high %v8561_v46, %v3631_v32, %v8608_v7  ;;  %v8613_v43 = vadd.f32 %v8158_v51, %v8108_v50 }
 0x54c   :  { %v3354_v2 = vcvt.s32.f32 %v3347_v63  ;;  %v3358_v18 = vsub.s32 4, %v8496_v58  ;;  %v3623_v29 = vsel %vm3617_vm11, %v3620_v52, %v3622_v40  ;;  %vm3699_vm9 = vcmp.gt.s32.totalorder %v3698_v15, 0 }
 0x54d   :  { %5256 = vcosq.f32 %v8544_v47  ;;  %v8622_v53 = vsel %vm8584_vm5, %v8132_v44, %v8555_v30  ;;  %v4839_v32 = vadd.s32 4294967294, %v3444_v45  ;;  %v3700_v33 = vsel %vm3699_vm9, %v3698_v15, 0 }
 0x54e   :  { %v3355_v37 = vmul.f32 %v3354_v2, %v3352_v9  ;;  %v3642_v51 = vadd.s32 1, %v8604_v54  ;;  %v3696_v23 = vor.u32 8388608, %v3695_v25  ;;  %v3702_v63 = vand.u32 31, %v3700_v33 }
 0x54f   :  { %vm4840_vm14 = vcmp.lt.s32.totalorder %v4839_v32, 0  ;;  %v3639_v38 = vmul.u32 %v8561_v46, %v3623_v29  ;;  %vm3641_vm6 = vc.u32 %v8609_v36, %v8603_v1  ;;  %v3230_v56 = vand.u32 2147483647, %v8613_v43 }
 0x550   :  { %5258 = vsinq.f32 %v8544_v47  ;;  %v8633_v30 = vsel %vm3274_vm7, %v3358_v18, %v8496_v58  ;;  %v3643_v9 = vsel %vm3641_vm6, %v3642_v51, %v8604_v54  ;;  %v3703_v10 = vsub.s32 32, %v3702_v63 }
 0x551   :  { %9541 = vst [vmem:[#allocation25_spill] sm:$0xff] %v8633_v30  ;;  %5260 = vcosq.f32 %v8622_v53  ;;  %v3432_v46 = vadd.s32 %v8523_v60, %v8532_v6  ;;  %v8639_v25 = vsel %vm4840_vm14, 0, %v4839_v32  ;;  %v3644_v14 = vadd.s32 %v3643_v9, %v3639_v38 }
 0x552   :  { %v3356_v11 = vxor.u32 2147483648, %v3355_v37  ;;  %v3706_v27 = vshrl.u32 %v9375_v22, %v3703_v10  ;;  %v3709_v47 = vshrl.u32 %v9376_v41, %v3703_v10  ;;  %v8643_v52 = vshll.u32 %v3696_v23, 8 }
 0x553   :  { %v3645_v58 = vadd.s32 536870912, %v3644_v14  ;;  %v3705_v40 = vshll.u32 %v9374_v16, %v3702_v63  ;;  %v3708_v21 = vshll.u32 %v9375_v22, %v3702_v63  ;;  %v3242_v54 = vadd.f32 1.0, %v3230_v56 }
 0x554   :  { %v3452_v15 = vsub.s32 4294967266, %v8639_v25  ;;  %v3701_v45 = vshrl.u32 %v3700_v33, 5  ;;  %v3711_v60 = vshll.u32 %v9376_v41, %v3702_v63  ;;  %v3712_v6 = vshrl.u32 %v9373_v49, %v3703_v10 }
 0x555   :  { %v8650_v7 = vshrl.u32 %v3645_v58, 30  ;;  %v3707_v2 = vor.u32 %v3706_v27, %v3705_v40  ;;  %v3710_v18 = vor.u32 %v3709_v47, %v3708_v21  ;;  %v3715_v29 = vshrl.u32 %v9522_v62, %v3703_v10 }
 0x556   :  { %v3713_v32 = vor.u32 %v3712_v6, %v3711_v60  ;;  %v3714_v51 = vshll.u32 %v9373_v49, %v3702_v63  ;;  %v3717_v23 = vshll.u32 %v9522_v62, %v3702_v63  ;;  %v3718_v38 = vshrl.u32 %v9523_v28, %v3703_v10 }
 0x557   :  { %v8656_v56 = vpop.eup %5256  ;;  %v3357_v33 = vsel %vm3274_vm7, %v3356_v11, %v3355_v37  ;;  %v3448_v9 = vsub.s32 32, %v8639_v25  ;;  %v3647_v58 = vshll.u32 %v8650_v7, 30  ;;  %v8664_v27 = vadd.f32 %v8208_v34, %v8108_v50 }
 0x558   :  { %9542 = vst [vmem:[#allocation27_spill] sm:$0xff] %v8656_v56  ;;  %v9543_v47 = vand.u32 2147483647, %v8349_v3  ;;  %v9544_v40 = vmov 0  ;;  %v3453_v63 = vadd.s32 127, %v3452_v15  ;;  %v3716_v21 = vor.u32 %v3715_v29, %v3714_v51 }
 0x559   :  { %v3719_v60 = vor.u32 %v3718_v38, %v3717_v23  ;;  %v3254_v6 = vmul.f32 30.0, %v3242_v54  ;;  %v8672_v30 = vsub.s32 %v3644_v14, %v3647_v58  ;;  %v3704_v37 = vshrl.u32 %v9374_v16, %v3703_v10 }
 0x55a   :  { %vm8668_vm12 = vcmp.le.f32.partialorder %v9543_v47, 0.7853982  ;;  %vm3720_vm3 = vcmp.lt.s32.totalorder %v3701_v45, 1  ;;  %vm3723_vm8 = vcmp.lt.s32.totalorder %v3701_v45, 4  ;;  %v8675_v11 = vpop.eup %5258  ;;  %vm3722_vm10 = vcmp.lt.s32.totalorder %v3701_v45, 3 }
 0x55b   :  { %v9545_v40 = vsel %vm8668_vm12, 4294967295, %v9544_v40  ;;  %9547 = vst [vmem:[#allocation32_spill] sm:$0xff] %v8675_v11  ;;  %v3725_v50 = vsel %vm3723_vm8, %v3713_v32, 2102212464  ;;  %v3728_v34 = vsel %vm3720_vm3, %v3707_v2, %v3710_v18  ;;  %v3729_v47 = vsel %vm3723_vm8, %v3716_v21, 920167782  ;;  %v8678_v24 = vpop.eup %5260 }
 0x55c   :  { %9546 = vst [vmem:[#allocation28_spill] sm:$0xff] %v9545_v40  ;;  %v3450_v56 = vshrl.u32 %v3432_v46, %v3448_v9  ;;  %v3650_v15 = vsub.s32 0, %v8672_v30  ;;  %vm3721_vm0 = vcmp.lt.s32.totalorder %v3701_v45, 2  ;;  %v3730_v14 = vsel %vm3722_vm10, %v3713_v32, %v3729_v47 }
 0x55d   :  { %v3454_v54 = vshll.u32 %v3453_v63, 23  ;;  %v3731_v10 = vsel %vm3721_vm0, %v3728_v34, %v3730_v14  ;;  %v3732_v29 = vsel %vm3720_vm3, %v3710_v18, %v3713_v32  ;;  %v3733_v51 = vsel %vm3723_vm8, %v3719_v60, 1326507024 }
 0x55e   :  { %v4846_v23 = vmin.u32 %v3650_v15, %v8672_v30  ;;  %v3724_v38 = vsel %vm3720_vm3, %v3704_v37, %v3707_v2  ;;  %v3726_v58 = vsel %vm3722_vm10, %v3710_v18, %v3725_v50  ;;  %v3734_v11 = vsel %vm3722_vm10, %v3716_v21, %v3733_v51 }
 0x55f   :  { %v3735_v46 = vsel %vm3721_vm0, %v3732_v29, %v3734_v11  ;;  %v8690_v9 = vmul.u32.u64.low %v8643_v52, %v3731_v10  ;;  %v8691_v55 = vmul.u32.u64.high %v8643_v52, %v3731_v10, %v8690_v9  ;;  %v8695_v63 = vmul.f32 %v3254_v6, %v8613_v43 }
 0x560   :  { %v3449_v32 = vshll.u32 %v8589_v17, %v8639_v25  ;;  %v3652_v60 = vclz %v4846_v23  ;;  %v8700_v2 = vmul.u32.u64.low %v8643_v52, %v3735_v46  ;;  %v8701_v37 = vmul.u32.u64.high %v8643_v52, %v3735_v46, %v8700_v2 }
 0x561   :  { %v3727_v18 = vsel %vm3721_vm0, %v3724_v38, %v3726_v58  ;;  %v9337_v21 = vand.u32 2147483647, %v8695_v63  ;;  %v3899_v11 = vand.u32 2139095040, %v8695_v63  ;;  %v3231_v50 = vand.u32 2147483647, %v8664_v27 }
 0x562   :  { %5262 = vsinq.f32 %v8622_v53  ;;  %v3360_v43 = vsel %vm8668_vm12, %v8349_v3, %v3357_v33  ;;  %v4847_v17 = vadd.s32 4294967294, %v3652_v60  ;;  %v8713_v25 = vadd.f32 %v8287_v19, %v8106_v12 }
 0x563   :  { %v3451_v6 = vor.u32 %v3450_v56, %v3449_v32  ;;  %v3455_v45 = vor.u32 4788187, %v3454_v54  ;;  %v3746_v34 = vadd.s32 1, %v8691_v55  ;;  %v3900_v47 = vshrl.u32 %v3899_v11, 23 }
 0x564   :  { %vm4848_vm15 = vcmp.lt.s32.totalorder %v4847_v17, 0  ;;  %v3743_v15 = vmul.u32 %v8643_v52, %v3727_v18  ;;  %vm3745_vm1 = vc.u32 %v8701_v37, %v8690_v9  ;;  %v3903_v53 = vand.u32 8388607, %v9337_v21 }
 0x565   :  { %v3655_v33 = vsel %vm4848_vm15, 0, %v4847_v17  ;;  %v3747_v14 = vsel %vm3745_vm1, %v3746_v34, %v8691_v55  ;;  %v4857_v10 = vadd.s32 4294967169, %v3900_v47  ;;  %v3243_v19 = vadd.f32 1.0, %v3231_v50 }
 0x566   :  { %5264 = vcosq.f32 %v3360_v43  ;;  %v3656_v56 = vsub.s32 32, %v3655_v33  ;;  %v3660_v54 = vsub.s32 4294967266, %v3655_v33  ;;  %v3748_v29 = vadd.s32 %v3747_v14, %v3743_v15 }
 0x567   :  { %v3456_v51 = vand.u32 2147483647, %v3455_v45  ;;  %v3458_v23 = vcvt.s32.f32 %v3451_v6  ;;  %v3640_v52 = vadd.s32 %v8603_v1, %v8609_v36  ;;  %v3906_v38 = vadd.s32 1, %v4857_v10 }
 0x568   :  { %v3661_v58 = vadd.s32 127, %v3660_v54  ;;  %v3749_v46 = vadd.s32 536870912, %v3748_v29  ;;  %v3904_v32 = vor.u32 8388608, %v3903_v53  ;;  %v3233_v60 = vand.u32 2147483647, %v8713_v25 }
 0x569   :  { %v3658_v2 = vshrl.u32 %v3640_v52, %v3656_v56  ;;  %vm3907_vm7 = vcmp.gt.s32.totalorder %v3906_v38, 0  ;;  %v3255_v55 = vmul.f32 30.0, %v3243_v19  ;;  %5266 = vsinq.f32 %v3360_v43 }
 0x56a   :  { %v3662_v18 = vshll.u32 %v3661_v58, 23  ;;  %v8725_v11 = vshrl.u32 %v3749_v46, 30  ;;  %v3908_v50 = vsel %vm3907_vm7, %v3906_v38, 0  ;;  %v9336_v17 = vmov 0.0|0.0  }
 0x56b   :  { %4983 = vmatprep.subr.bf16.mxu1 %v9336_v17  ;;  %v8728_v6 = vmul.f32 %v3458_v23, %v3456_v51  ;;  %v3657_v1 = vshll.u32 %v8672_v30, %v3655_v33  ;;  %v3910_v45 = vand.u32 31, %v3908_v50  ;;  %v8735_v43 = vshll.u32 %v3904_v32, 8 }
 0x56c   :  { %v8732_v34 = vpop.eup %5262  ;;  %v3663_v47 = vor.u32 4788187, %v3662_v18  ;;  %v3751_v15 = vshll.u32 %v8725_v11, 30  ;;  %v3245_v53 = vadd.f32 1.0, %v3233_v60  ;;  %v3909_v10 = vshrl.u32 %v3908_v50, 5 }
 0x56d   :  { %v3659_v14 = vor.u32 %v3658_v2, %v3657_v1  ;;  %v3911_v19 = vsub.s32 32, %v3910_v45  ;;  %v8738_v56 = vmul.f32 %v3255_v55, %v8664_v27  ;;  %v3913_v30 = vshll.u32 %v9374_v16, %v3910_v45 }
 0x56e   :  { %v8740_v54 = vsub.s32 %v3748_v29, %v3751_v15  ;;  %v3916_v33 = vshll.u32 %v9375_v22, %v3910_v45  ;;  %v3919_v51 = vshll.u32 %v9376_v41, %v3910_v45  ;;  %v3664_v23 = vand.u32 2147483647, %v3663_v47 }
 0x56f   :  { %v3914_v52 = vshrl.u32 %v9375_v22, %v3911_v19  ;;  %v3917_v38 = vshrl.u32 %v9376_v41, %v3911_v19  ;;  %v3920_v58 = vshrl.u32 %v9373_v49, %v3911_v19  ;;  %v3922_v29 = vshll.u32 %v9373_v49, %v3910_v45 }
 0x570   :  { %v8748_v46 = vpop.eup %5264  ;;  %v3754_v27 = vsub.s32 0, %v8740_v54  ;;  %v3923_v32 = vshrl.u32 %v9522_v62, %v3911_v19  ;;  %v3926_v60 = vshrl.u32 %v9523_v28, %v3911_v19  ;;  %v3925_v50 = vshll.u32 %v9522_v62, %v3910_v45 }
 0x571   :  { %9548 = vst [vmem:[#allocation15_spill] sm:$0xff] %v8748_v46  ;;  %v3915_v2 = vor.u32 %v3914_v52, %v3913_v30  ;;  %v3918_v55 = vor.u32 %v3917_v38, %v3916_v33  ;;  %v3921_v18 = vor.u32 %v3920_v58, %v3919_v51  ;;  %v9341_v15 = vand.u32 2147483647, %v8738_v56 }
 0x572   :  { %v4850_v1 = vmin.u32 %v3754_v27, %v8740_v54  ;;  %v3924_v47 = vor.u32 %v3923_v32, %v3922_v29  ;;  %v3257_v17 = vmul.f32 30.0, %v3245_v53  ;;  %v3666_v21 = vcvt.s32.f32 %v3659_v14 }
 0x573   :  { %v3927_v36 = vor.u32 %v3926_v60, %v3925_v50  ;;  %vm3928_vm11 = vcmp.lt.s32.totalorder %v3909_v10, 1  ;;  %vm3931_vm9 = vcmp.lt.s32.totalorder %v3909_v10, 4  ;;  %v8757_v3 = vpop.eup %5266  ;;  %vm3586_vm14 = vcmp.lt.s32.totalorder %v8473_v48, 0 }
 0x574   :  { %9549 = vst [vmem:[#allocation29_spill] sm:$0xff] %v8757_v3  ;;  %v3756_v46 = vclz %v4850_v1  ;;  %v3933_v30 = vsel %vm3931_vm9, %v3921_v18, 2102212464  ;;  %v3936_v33 = vsel %vm3928_vm11, %v3915_v2, %v3918_v55  ;;  %v4003_v45 = vand.u32 2139095040, %v8738_v56 }
 0x575   :  { %v3667_v51 = vmul.f32 %v3666_v21, %v3664_v23  ;;  %v3912_v52 = vshrl.u32 %v9374_v16, %v3911_v19  ;;  %vm3930_vm6 = vcmp.lt.s32.totalorder %v3909_v10, 3  ;;  %v3937_v53 = vsel %vm3931_vm9, %v3924_v47, 920167782 }
 0x576   :  { %v4851_v14 = vadd.s32 4294967294, %v3756_v46  ;;  %vm3929_vm3 = vcmp.lt.s32.totalorder %v3909_v10, 2  ;;  %v3938_v38 = vsel %vm3930_vm6, %v3921_v18, %v3937_v53  ;;  %v3940_v58 = vsel %vm3928_vm11, %v3918_v55, %v3921_v18 }
 0x577   :  { %vm3378_vm8 = vcmp.lt.s32.totalorder %v8405_v4, 0  ;;  %v3932_v27 = vsel %vm3928_vm11, %v3912_v52, %v3915_v2  ;;  %v3934_v29 = vsel %vm3930_vm6, %v3918_v55, %v3933_v30  ;;  %v3939_v32 = vsel %vm3929_vm3, %v3936_v33, %v3938_v38 }
 0x578   :  { %v3941_v60 = vsel %vm3931_vm9, %v3927_v36, 1326507024  ;;  %vm4852_vm10 = vcmp.lt.s32.totalorder %v4851_v14, 0  ;;  %v8771_v19 = vmul.u32.u64.low %v8735_v43, %v3939_v32  ;;  %v8772_v23 = vmul.u32.u64.high %v8735_v43, %v3939_v32, %v8771_v19 }
 0x579   :  { %v3942_v21 = vsel %vm3930_vm6, %v3924_v47, %v3941_v60  ;;  %v9550_v46 = vand.u32 2147483647, %v8473_v48  ;;  %v9551_v18 = vmov 0  ;;  %v3668_v50 = vxor.u32 2147483648, %v3667_v51 }
 0x57a   :  { %v3759_v2 = vsel %vm4852_vm10, 0, %v4851_v14  ;;  %v3943_v55 = vsel %vm3929_vm3, %v3940_v58, %v3942_v21  ;;  %v4004_v1 = vshrl.u32 %v4003_v45, 23  ;;  %v4007_v47 = vand.u32 8388607, %v9341_v15 }
 0x57b   :  { %vm8777_vm0 = vcmp.le.f32.partialorder %v9550_v46, 0.7853982  ;;  %v3760_v30 = vsub.s32 32, %v3759_v2  ;;  %v3764_v36 = vsub.s32 4294967266, %v3759_v2  ;;  %v8785_v33 = vmul.f32 %v3257_v17, %v8713_v25 }
 0x57c   :  { %v9552_v18 = vsel %vm8777_vm0, 4294967295, %v9551_v18  ;;  %v3935_v52 = vsel %vm3929_vm3, %v3932_v27, %v3934_v29  ;;  %v8789_v53 = vmul.u32.u64.low %v8735_v43, %v3943_v55  ;;  %v8790_v38 = vmul.u32.u64.high %v8735_v43, %v3943_v55, %v8789_v53 }
 0x57d   :  { %9553 = vst [vmem:[#allocation16_spill] sm:$0xff] %v9552_v18  ;;  %v4861_v32 = vadd.s32 4294967169, %v4004_v1  ;;  %v3460_v14 = vxor.u32 2147483648, %v8728_v6  ;;  %v3744_v45 = vadd.s32 %v8690_v9, %v8701_v37  ;;  %v3765_v58 = vadd.s32 127, %v3764_v36 }
 0x57e   :  { %v3954_v60 = vadd.s32 1, %v8772_v23  ;;  %v3669_v21 = vsel %vm3586_vm14, %v3668_v50, %v3667_v51  ;;  %v9554_v25 = vsub.s32 4, %v8650_v7  ;;  %v8807_v27 = vadd.f32 %v8341_v59, %v8106_v12 }
 0x57f   :  { %v4010_v10 = vadd.s32 1, %v4861_v32  ;;  %v3762_v29 = vshrl.u32 %v3744_v45, %v3760_v30  ;;  %v3951_v9 = vmul.u32 %v8735_v43, %v3935_v52  ;;  %v4008_v37 = vor.u32 8388608, %v4007_v47 }
 0x580   :  { %v8803_v17 = vsel %vm3586_vm14, %v9554_v25, %v8650_v7  ;;  %v9342_v46 = vand.u32 2147483647, %v8785_v33  ;;  %v3766_v55 = vshll.u32 %v3765_v58, 23  ;;  %vm3953_vm15 = vc.u32 %v8790_v38, %v8771_v19 }
 0x581   :  { %9555 = vst [vmem:[#allocation11_spill] sm:$0xff] %v8803_v17  ;;  %vm4011_vm1 = vcmp.gt.s32.totalorder %v4010_v10, 0  ;;  %v4211_v51 = vand.u32 2139095040, %v8785_v33  ;;  %v8817_v7 = vsel %vm3378_vm8, %v3460_v14, %v8728_v6  ;;  %v3761_v12 = vshll.u32 %v8740_v54, %v3759_v2 }
 0x582   :  { %v3955_v59 = vsel %vm3953_vm15, %v3954_v60, %v8772_v23  ;;  %v4012_v43 = vsel %vm4011_vm1, %v4010_v10, 0  ;;  %v3234_v30 = vand.u32 2147483647, %v8807_v27  ;;  %v8828_v47 = vsel %vm8777_vm0, %v8473_v48, %v3669_v21 }
 0x583   :  { %v3956_v50 = vadd.s32 %v3955_v59, %v3951_v9  ;;  %v4014_v1 = vand.u32 31, %v4012_v43  ;;  %v8830_v6 = vor.u32 %v3762_v29, %v3761_v12  ;;  %v8832_v52 = vshll.u32 %v4008_v37, 8 }
 0x584   :  { %v8836_v54 = vand.u32 8388607, %v9342_v46  ;;  %v3767_v23 = vor.u32 4788187, %v3766_v55  ;;  %v4212_v32 = vshrl.u32 %v4211_v51, 23  ;;  %v4013_v14 = vshrl.u32 %v4012_v43, 5 }
 0x585   :  { %v3957_v2 = vadd.s32 536870912, %v3956_v50  ;;  %v4015_v53 = vsub.s32 32, %v4014_v1  ;;  %v4017_v45 = vshll.u32 %v9374_v16, %v4014_v1  ;;  %v4020_v58 = vshll.u32 %v9375_v22, %v4014_v1 }
 0x586   :  { %v4023_v60 = vshll.u32 %v9376_v41, %v4014_v1  ;;  %v4026_v29 = vshll.u32 %v9373_v49, %v4014_v1  ;;  %v4029_v55 = vshll.u32 %v9522_v62, %v4014_v1  ;;  %vm4032_vm7 = vcmp.lt.s32.totalorder %v4013_v14, 1 }
 0x587   :  { %v8841_v21 = vshrl.u32 %v3957_v2, 30  ;;  %v4018_v25 = vshrl.u32 %v9375_v22, %v4015_v53  ;;  %v4021_v10 = vshrl.u32 %v9376_v41, %v4015_v53  ;;  %v4024_v9 = vshrl.u32 %v9373_v49, %v4015_v53 }
 0x588   :  { %v4027_v37 = vshrl.u32 %v9522_v62, %v4015_v53  ;;  %v4030_v51 = vshrl.u32 %v9523_v28, %v4015_v53  ;;  %v4869_v2 = vadd.s32 4294967169, %v4212_v32  ;;  %v4016_v15 = vshrl.u32 %v9374_v16, %v4015_v53 }
 0x589   :  { %9556 = vst [vmem:[#allocation19_spill] sm:$0xff] %v8841_v21  ;;  %v3959_v12 = vshll.u32 %v8841_v21, 30  ;;  %v4019_v59 = vor.u32 %v4018_v25, %v4017_v45  ;;  %v4022_v43 = vor.u32 %v4021_v10, %v4020_v58  ;;  %v4025_v46 = vor.u32 %v4024_v9, %v4023_v60 }
 0x58a   :  { %v4028_v36 = vor.u32 %v4027_v37, %v4026_v29  ;;  %v4031_v48 = vor.u32 %v4030_v51, %v4029_v55  ;;  %vm4033_vm11 = vcmp.lt.s32.totalorder %v4013_v14, 2  ;;  %v3246_v17 = vadd.f32 1.0, %v3234_v30 }
 0x58b   :  { %v8852_v18 = vsub.s32 %v3956_v50, %v3959_v12  ;;  %vm4034_vm9 = vcmp.lt.s32.totalorder %v4013_v14, 3  ;;  %vm4035_vm14 = vcmp.lt.s32.totalorder %v4013_v14, 4  ;;  %v4036_v1 = vsel %vm4032_vm7, %v4016_v15, %v4019_v59 }
 0x58c   :  { %v4040_v3 = vsel %vm4032_vm7, %v4019_v59, %v4022_v43  ;;  %v4037_v21 = vsel %vm4035_vm14, %v4025_v46, 2102212464  ;;  %v4041_v45 = vsel %vm4035_vm14, %v4028_v36, 920167782  ;;  %v4044_v58 = vsel %vm4032_vm7, %v4022_v43, %v4025_v46 }
 0x58d   :  { %v3962_v40 = vsub.s32 0, %v8852_v18  ;;  %v4038_v32 = vsel %vm4034_vm9, %v4022_v43, %v4037_v21  ;;  %v4042_v25 = vsel %vm4034_vm9, %v4025_v46, %v4041_v45  ;;  %v4045_v53 = vsel %vm4035_vm14, %v4031_v48, 1326507024 }
 0x58e   :  { %v4218_v60 = vadd.s32 1, %v4869_v2  ;;  %v3768_v10 = vand.u32 2147483647, %v3767_v23  ;;  %v4043_v29 = vsel %vm4033_vm11, %v4040_v3, %v4042_v25  ;;  %v4046_v9 = vsel %vm4034_vm9, %v4028_v36, %v4045_v53 }
 0x58f   :  { %v4858_v50 = vmin.u32 %v3962_v40, %v8852_v18  ;;  %v4039_v30 = vsel %vm4033_vm11, %v4036_v1, %v4038_v32  ;;  %v4047_v15 = vsel %vm4033_vm11, %v4044_v58, %v4046_v9  ;;  %5268 = vcosq.f32 %v8828_v47 }
 0x590   :  { %v8860_v37 = vmul.u32.u64.low %v8832_v52, %v4043_v29  ;;  %v8861_v55 = vmul.u32.u64.high %v8832_v52, %v4043_v29, %v8860_v37  ;;  %v8865_v46 = vmul.u32.u64.low %v8832_v52, %v4047_v15  ;;  %v8866_v48 = vmul.u32.u64.high %v8832_v52, %v4047_v15, %v8865_v46 }
 0x591   :  { %v3964_v51 = vclz %v4858_v50  ;;  %vm4219_vm6 = vcmp.gt.s32.totalorder %v4218_v60, 0  ;;  %v3770_v3 = vcvt.s32.f32 %v8830_v6  ;;  %v3258_v36 = vmul.f32 30.0, %v3246_v17 }
 0x592   :  { %v4220_v40 = vsel %vm4219_vm6, %v4218_v60, 0  ;;  %v3952_v23 = vadd.s32 %v8771_v19, %v8790_v38  ;;  %v4216_v21 = vor.u32 8388608, %v8836_v54  ;;  %v4055_v43 = vmul.u32 %v8832_v52, %v4039_v30 }
 0x593   :  { %v4859_v14 = vadd.s32 4294967294, %v3964_v51  ;;  %v4222_v12 = vand.u32 31, %v4220_v40  ;;  %v8873_v59 = vmul.f32 %v3770_v3, %v3768_v10  ;;  %v4058_v2 = vadd.s32 1, %v8861_v55 }
 0x594   :  { %v9557_v1 = vsel %vm8378_vm2, 0, %v8401_v26  ;;  %vm4057_vm10 = vc.u32 %v8866_v48, %v8860_v37  ;;  %v4221_v19 = vshrl.u32 %v4220_v40, 5  ;;  %v8888_v52 = vmul.f32 %v3258_v36, %v8807_v27 }
 0x595   :  { %v8881_v6 = vadd.s32 3, %v9557_v1  ;;  %vm4860_vm3 = vcmp.lt.s32.totalorder %v4859_v14, 0  ;;  %v4223_v38 = vsub.s32 32, %v4222_v12  ;;  %v4059_v45 = vsel %vm4057_vm10, %v4058_v2, %v8861_v55 }
 0x596   :  { %v3967_v17 = vsel %vm4860_vm3, 0, %v4859_v14  ;;  %v4225_v58 = vshll.u32 %v9374_v16, %v4222_v12  ;;  %v4060_v25 = vadd.s32 %v4059_v45, %v4055_v43  ;;  %v4228_v26 = vshll.u32 %v9375_v22, %v4222_v12 }
 0x597   :  { %v3968_v32 = vsub.s32 32, %v3967_v17  ;;  %v3972_v0 = vsub.s32 4294967266, %v3967_v17  ;;  %v3969_v53 = vshll.u32 %v8852_v18, %v3967_v17  ;;  %v4226_v60 = vshrl.u32 %v9375_v22, %v4223_v38 }
 0x598   :  { %v4229_v10 = vshrl.u32 %v9376_v41, %v4223_v38  ;;  %v4231_v50 = vshll.u32 %v9376_v41, %v4222_v12  ;;  %v4061_v30 = vadd.s32 536870912, %v4060_v25  ;;  %v4232_v15 = vshrl.u32 %v9373_v49, %v4223_v38 }
 0x599   :  { %v3970_v29 = vshrl.u32 %v3952_v23, %v3968_v32  ;;  %v3973_v9 = vadd.s32 127, %v3972_v0  ;;  %v4227_v27 = vor.u32 %v4226_v60, %v4225_v58  ;;  %v4234_v51 = vshll.u32 %v9373_v49, %v4222_v12  ;;  %v8900_v14 = vpop.eup %5268 }
 0x59a   :  { %v4230_v55 = vor.u32 %v4229_v10, %v4228_v26  ;;  %v4235_v46 = vshrl.u32 %v9522_v62, %v4223_v38  ;;  %v8898_v18 = vshrl.u32 %v4061_v30, 30  ;;  %v4233_v36 = vor.u32 %v4232_v15, %v4231_v50 }
 0x59b   :  { %v3971_v3 = vor.u32 %v3970_v29, %v3969_v53  ;;  %v3974_v40 = vshll.u32 %v3973_v9, 23  ;;  %vm3898_vm2 = vcmp.lt.s32.totalorder %v8695_v63, 0  ;;  %v4224_v23 = vshrl.u32 %v9374_v16, %v4223_v38 }
 0x59c   :  { %v4236_v43 = vor.u32 %v4235_v46, %v4234_v51  ;;  %v4237_v2 = vshll.u32 %v9522_v62, %v4222_v12  ;;  %v4238_v1 = vshrl.u32 %v9523_v28, %v4223_v38  ;;  %v4063_v58 = vshll.u32 %v8898_v18, 30 }
 0x59d   :  { %v3975_v17 = vor.u32 4788187, %v3974_v40  ;;  %v3978_v45 = vcvt.s32.f32 %v3971_v3  ;;  %vm4240_vm15 = vcmp.lt.s32.totalorder %v4221_v19, 1  ;;  %vm4242_vm1 = vcmp.lt.s32.totalorder %v4221_v19, 3 }
 0x59e   :  { %v4239_v32 = vor.u32 %v4238_v1, %v4237_v2  ;;  %vm4243_vm7 = vcmp.lt.s32.totalorder %v4221_v19, 4  ;;  %v4244_v0 = vsel %vm4240_vm15, %v4224_v23, %v4227_v27  ;;  %v8907_v53 = vsub.s32 %v4060_v25, %v4063_v58 }
 0x59f   :  { %v3976_v26 = vand.u32 2147483647, %v3975_v17  ;;  %v4245_v60 = vsel %vm4243_vm7, %v4233_v36, 2102212464  ;;  %v4248_v10 = vsel %vm4240_vm15, %v4227_v27, %v4230_v55  ;;  %v4249_v29 = vsel %vm4243_vm7, %v4236_v43, 920167782 }
 0x5a0   :  { %v4246_v50 = vsel %vm4242_vm1, %v4230_v55, %v4245_v60  ;;  %v4252_v12 = vsel %vm4240_vm15, %v4230_v55, %v4233_v36  ;;  %v4253_v9 = vsel %vm4243_vm7, %v4239_v32, 1326507024  ;;  %v4066_v30 = vsub.s32 0, %v8907_v53 }
 0x5a1   :  { %v3979_v38 = vmul.f32 %v3978_v45, %v3976_v26  ;;  %vm4241_vm11 = vcmp.lt.s32.totalorder %v4221_v19, 2  ;;  %v4250_v15 = vsel %vm4242_vm1, %v4233_v36, %v4249_v29  ;;  %v4254_v3 = vsel %vm4242_vm1, %v4236_v43, %v4253_v9 }
 0x5a2   :  { %v4247_v51 = vsel %vm4241_vm11, %v4244_v0, %v4246_v50  ;;  %v4251_v46 = vsel %vm4241_vm11, %v4248_v10, %v4250_v15  ;;  %v4256_v25 = vshll.u32 %v4216_v21, 8  ;;  %vm3690_vm9 = vcmp.lt.s32.totalorder %v8538_v39, 0 }
 0x5a3   :  { %v3980_v27 = vxor.u32 2147483648, %v3979_v38  ;;  %v4862_v40 = vmin.u32 %v4066_v30, %v8907_v53  ;;  %v4255_v55 = vsel %vm4241_vm11, %v4252_v12, %v4254_v3  ;;  %v4312_v23 = vand.u32 2147483647, %v8888_v52 }
 0x5a4   :  { %v8918_v2 = vmul.u32.u64.low %v4256_v25, %v4255_v55  ;;  %v8919_v1 = vmul.u32.u64.high %v4256_v25, %v4255_v55, %v8918_v2  ;;  %v8921_v17 = vmul.u32.u64.low %v4256_v25, %v4251_v46  ;;  %v8922_v36 = vmul.u32.u64.high %v4256_v25, %v4251_v46, %v8921_v17 }
 0x5a5   :  { %v3981_v19 = vsel %vm3898_vm2, %v3980_v27, %v3979_v38  ;;  %v4068_v43 = vclz %v4862_v40  ;;  %v4315_v54 = vand.u32 2139095040, %v8888_v52  ;;  %v3574_v21 = vand.u32 3, %v8881_v6 }
 0x5a6   :  { %5270 = vsinq.f32 %v8828_v47  ;;  %v3772_v45 = vxor.u32 2147483648, %v8873_v59  ;;  %v9558_v58 = vand.u32 2147483647, %v8695_v63  ;;  %v3577_v0 = vxor.u32 2147483648, %v8574_v8 }
 0x5a7   :  { %v4863_v26 = vadd.s32 4294967294, %v4068_v43  ;;  %v4263_v60 = vmul.u32 %v4256_v25, %v4247_v51  ;;  %v4316_v10 = vshrl.u32 %v4315_v54, 23  ;;  %v3580_v50 = vxor.u32 2147483648, %v8499_v20 }
 0x5a8   :  { %vm8932_vm14 = vcmp.le.f32.partialorder %v9558_v58, 0.7853982  ;;  %vm4265_vm6 = vc.u32 %v8919_v1, %v8921_v17  ;;  %v4266_v47 = vadd.s32 1, %v8922_v36  ;;  %v4319_v29 = vand.u32 8388607, %v4312_v23 }
 0x5a9   :  { %v3984_v6 = vsel %vm8932_vm14, %v8695_v63, %v3981_v19  ;;  %vm3572_vm3 = vweird.f32 %v8114_v31  ;;  %vm4864_vm10 = vcmp.lt.s32.totalorder %v4863_v26, 0  ;;  %v4873_v12 = vadd.s32 4294967169, %v4316_v10 }
 0x5aa   :  { %vm3576_vm15 = vcmp.eq.s32.totalorder %v3574_v21, 0  ;;  %vm3579_vm1 = vcmp.eq.s32.totalorder %v3574_v21, 2  ;;  %v4071_v9 = vsel %vm4864_vm10, 0, %v4863_v26  ;;  %v4267_v38 = vsel %vm4265_vm6, %v4266_v47, %v8922_v36 }
 0x5ab   :  { %v3578_v30 = vsel %vm3576_vm15, %v8499_v20, %v3577_v0  ;;  %v3881_v15 = vsel %vm8356_vm4, 0, %v8396_v13  ;;  %v4072_v51 = vsub.s32 32, %v4071_v9  ;;  %v4076_v46 = vsub.s32 4294967266, %v4071_v9 }
 0x5ac   :  { %v4268_v3 = vadd.s32 %v4267_v38, %v4263_v60  ;;  %v3581_v25 = vsel %vm3579_vm1, %v3580_v50, %v8574_v8  ;;  %v8955_v27 = vsel %vm3690_vm9, %v3772_v45, %v8873_v59  ;;  %v4056_v40 = vadd.s32 %v8860_v37, %v8866_v48 }
 0x5ad   :  { %v4322_v55 = vadd.s32 1, %v4873_v12  ;;  %v3885_v2 = vadd.s32 3, %v3881_v15  ;;  %v4077_v20 = vadd.s32 127, %v4076_v46  ;;  %v4320_v19 = vor.u32 8388608, %v4319_v29 }
 0x5ae   :  { %v4269_v36 = vadd.s32 536870912, %v4268_v3  ;;  %vm3575_vm7 = vcmp.lt.s32.totalorder %v3574_v21, 2  ;;  %5272 = vcosq.f32 %v3984_v6  ;;  %v4074_v61 = vshrl.u32 %v4056_v40, %v4072_v51 }
 0x5af   :  { %vm4323_vm4 = vcmp.gt.s32.totalorder %v4322_v55, 0  ;;  %v3582_v13 = vsel %vm3575_vm7, %v3578_v30, %v3581_v25  ;;  %v4078_v43 = vshll.u32 %v4077_v20, 23  ;;  %v8961_v58 = vand.u32 3, %v3885_v2 }
 0x5b0   :  { %v8959_v8 = vshrl.u32 %v4269_v36, 30  ;;  %v4324_v54 = vsel %vm4323_vm4, %v4322_v55, 0  ;;  %v8963_v59 = vpop.eup %5270  ;;  %5274 = vsinq.f32 %v3984_v6  ;;  %v4073_v37 = vshll.u32 %v8907_v53, %v4071_v9 }
 0x5b1   :  { %v8967_v48 = vadd.s32 %v8921_v17, %v8919_v1  ;;  %v4326_v45 = vand.u32 31, %v4324_v54  ;;  %v8970_v0 = vshll.u32 %v4320_v19, 8  ;;  %v8974_v26 = vsel %vm3572_vm3, nan, %v3582_v13 }
 0x5b2   :  { %v4271_v21 = vshll.u32 %v8959_v8, 30  ;;  %v3889_v60 = vxor.u32 2147483648, %v8456_v42  ;;  %v4075_v10 = vor.u32 %v4074_v61, %v4073_v37  ;;  %v4325_v50 = vshrl.u32 %v4324_v54, 5 }
 0x5b3   :  { %v4327_v47 = vsub.s32 32, %v4326_v45  ;;  %v3892_v6 = vxor.u32 2147483648, %v8450_v35  ;;  %v4079_v53 = vor.u32 4788187, %v4078_v43  ;;  %v4329_v1 = vshll.u32 %v9374_v16, %v4326_v45 }
 0x5b4   :  { %v8978_v29 = vsub.s32 %v4268_v3, %v4271_v21  ;;  %v4332_v17 = vshll.u32 %v9375_v22, %v4326_v45  ;;  %vm3888_vm11 = vcmp.eq.s32.totalorder %v8961_v58, 0  ;;  %v4335_v9 = vshll.u32 %v9376_v41, %v4326_v45 }
 0x5b5   :  { %v4330_v31 = vshrl.u32 %v9375_v22, %v4327_v47  ;;  %v4333_v12 = vshrl.u32 %v9376_v41, %v4327_v47  ;;  %v4336_v38 = vshrl.u32 %v9373_v49, %v4327_v47  ;;  %v4338_v15 = vshll.u32 %v9373_v49, %v4326_v45 }
 0x5b6   :  { %v4274_v30 = vsub.s32 0, %v8978_v29  ;;  %v4339_v51 = vshrl.u32 %v9522_v62, %v4327_v47  ;;  %v4341_v46 = vshll.u32 %v9522_v62, %v4326_v45  ;;  %v4342_v55 = vshrl.u32 %v9523_v28, %v4327_v47  ;;  %v9561_v62 = vld [vmem:[#allocation31_spill] sm:$0xff] }
 0x5b7   :  { %v4331_v3 = vor.u32 %v4330_v31, %v4329_v1  ;;  %v4334_v25 = vor.u32 %v4333_v12, %v4332_v17  ;;  %v4337_v40 = vor.u32 %v4336_v38, %v4335_v9  ;;  %v4082_v22 = vcvt.s32.f32 %v4075_v10 }
 0x5b8   :  { %v4870_v2 = vmin.u32 %v4274_v30, %v8978_v29  ;;  %v4328_v41 = vshrl.u32 %v9374_v16, %v4327_v47  ;;  %v4340_v20 = vor.u32 %v4339_v51, %v4338_v15  ;;  %vm3887_vm6 = vcmp.lt.s32.totalorder %v8961_v58, 2  ;;  %v8995_v36 = vpop.eup %5272 }
 0x5b9   :  { %v4080_v49 = vand.u32 2147483647, %v4079_v53  ;;  %v4343_v19 = vor.u32 %v4342_v55, %v4341_v46  ;;  %vm4344_vm3 = vcmp.lt.s32.totalorder %v4325_v50, 1  ;;  %vm4347_vm10 = vcmp.lt.s32.totalorder %v4325_v50, 4 }
 0x5ba   :  { %vm3884_vm15 = vweird.f32 %v9561_v62  ;;  %v4276_v61 = vclz %v4870_v2  ;;  %vm4346_vm1 = vcmp.lt.s32.totalorder %v4325_v50, 3  ;;  %v4348_v13 = vsel %vm4344_vm3, %v4328_v41, %v4331_v3  ;;  %v8998_v43 = vpop.eup %5274 }
 0x5bb   :  { %v4349_v28 = vsel %vm4347_vm10, %v4337_v40, 2102212464  ;;  %v4352_v37 = vsel %vm4344_vm3, %v4331_v3, %v4334_v25  ;;  %v4353_v16 = vsel %vm4347_vm10, %v4340_v20, 920167782  ;;  %v4356_v45 = vsel %vm4344_vm3, %v4334_v25, %v4337_v40 }
 0x5bc   :  { %v4350_v54 = vsel %vm4346_vm1, %v4334_v25, %v4349_v28  ;;  %v4871_v21 = vadd.s32 4294967294, %v4276_v61  ;;  %vm4345_vm7 = vcmp.lt.s32.totalorder %v4325_v50, 2  ;;  %v4354_v10 = vsel %vm4346_vm1, %v4337_v40, %v4353_v16 }
 0x5bd   :  { %v4357_v47 = vsel %vm4347_vm10, %v4343_v19, 1326507024  ;;  %v4351_v53 = vsel %vm4345_vm7, %v4348_v13, %v4350_v54  ;;  %v4355_v1 = vsel %vm4345_vm7, %v4352_v37, %v4354_v10  ;;  %v3890_v31 = vsel %vm3888_vm11, %v8450_v35, %v3889_v60  ;;  %v9562_v19 = vld [vmem:[#allocation12_spill] sm:$0xff] }
 0x5be   :  { %v4358_v17 = vsel %vm4346_vm1, %v4340_v20, %v4357_v47  ;;  %vm4872_vm4 = vcmp.lt.s32.totalorder %v4871_v21, 0  ;;  %v9004_v9 = vmul.u32.u64.low %v8970_v0, %v4355_v1  ;;  %v9005_v38 = vmul.u32.u64.high %v8970_v0, %v4355_v1, %v9004_v9 }
 0x5bf   :  { %v4359_v12 = vsel %vm4345_vm7, %v4356_v45, %v4358_v17  ;;  %v4279_v30 = vsel %vm4872_vm4, 0, %v4871_v21  ;;  %vm3891_vm3 = vcmp.eq.s32.totalorder %v8961_v58, 2  ;;  %v9013_v51 = vmul.f32 %v4082_v22, %v4080_v49  ;;  %v9568_v45 = vld [vmem:[#allocation32_spill] sm:$0xff] }
 0x5c0   :  { %v9009_v15 = vmul.u32.u64.low %v8970_v0, %v4359_v12  ;;  %v9010_v50 = vmul.u32.u64.high %v8970_v0, %v4359_v12, %v9009_v15  ;;  %v4280_v46 = vsub.s32 32, %v4279_v30  ;;  %v4284_v3 = vsub.s32 4294967266, %v4279_v30 }
 0x5c1   :  { %v3893_v35 = vsel %vm3891_vm3, %v3892_v6, %v8456_v42  ;;  %v4281_v60 = vshll.u32 %v8978_v29, %v4279_v30  ;;  %v4367_v25 = vmul.u32 %v8970_v0, %v4351_v53  ;;  %v4193_v55 = vsel %vm8584_vm5, 0, %v8549_v57 }
 0x5c2   :  { %v3894_v40 = vsel %vm3887_vm6, %v3890_v31, %v3893_v35  ;;  %v4282_v2 = vshrl.u32 %v8967_v48, %v4280_v46  ;;  %v4285_v41 = vadd.s32 127, %v4284_v3  ;;  %v4370_v22 = vadd.s32 1, %v9005_v38 }
 0x5c3   :  { %v3895_v20 = vsel %vm3884_vm15, nan, %v3894_v40  ;;  %vm4369_vm11 = vc.u32 %v9010_v50, %v9004_v9  ;;  %v4197_v0 = vadd.s32 3, %v4193_v55  ;;  %v4201_v58 = vxor.u32 2147483648, %v8732_v34  ;;  %v9574_v40 = vld [vmem:[#allocation24_spill] sm:$0xff] }
 0x5c4   :  { %v4984_v42 = vpack.c.bf16 %v3895_v20, %v8974_v26  ;;  %v4283_v6 = vor.u32 %v4282_v2, %v4281_v60  ;;  %v4286_v29 = vshll.u32 %v4285_v41, 23  ;;  %v4371_v57 = vsel %vm4369_vm11, %v4370_v22, %v9005_v38  ;;  %v9569_v38 = vld [vmem:[#allocation27_spill] sm:$0xff]  ;;  %v9575_v22 = vld [vmem:[#allocation8_spill] sm:$0xff] }
 0x5c5   :  { %v4204_v5 = vxor.u32 2147483648, %v8678_v24  ;;  %vm9350_vm5 = vcmp.lt.s32.totalorder %v8785_v33, 0  ;;  %v4372_v48 = vadd.s32 %v4371_v57, %v4367_v25  ;;  %vm4196_vm6 = vweird.f32 %v8132_v44 }
 0x5c6   :  { %4985 = vmatpush3.bf16.msra.mxu1 %v4984_v42  ;;  %v4198_v49 = vand.u32 3, %v4197_v0  ;;  %v4505_v26 = vsel %vm8506_vm13, 0, %v9562_v19  ;;  %v9564_v61 = vand.u32 2147483647, %v8785_v33  ;;  %v4287_v28 = vor.u32 4788187, %v4286_v29 }
 0x5c7   :  { %v4290_v54 = vcvt.s32.f32 %v4283_v6  ;;  %v9567_v37 = vmov 0.0|0.0   ;;  %v4509_v16 = vadd.s32 3, %v4505_v26  ;;  %v4513_v21 = vxor.u32 2147483648, %v9568_v45  ;;  %v9579_v26 = vld [vmem:[#allocation19_spill] sm:$0xff] }
 0x5c8   :  { %vm9040_vm10 = vcmp.le.f32.partialorder %v9564_v61, 0.7853982  ;;  %4986 = vmatprep.subr.bf16.mxu1 %v9567_v37  ;;  %v4373_v10 = vadd.s32 536870912, %v4372_v48  ;;  %vm4199_vm15 = vcmp.lt.s32.totalorder %v4198_v49, 2  ;;  %vm4200_vm1 = vcmp.eq.s32.totalorder %v4198_v49, 0 }
 0x5c9   :  { %vm4203_vm7 = vcmp.eq.s32.totalorder %v4198_v49, 2  ;;  %v4288_v47 = vand.u32 2147483647, %v4287_v28  ;;  %v4202_v53 = vsel %vm4200_vm1, %v8678_v24, %v4201_v58  ;;  %v4510_v17 = vand.u32 3, %v4509_v16 }
 0x5ca   :  { %v4205_v1 = vsel %vm4203_vm7, %v4204_v5, %v8732_v34  ;;  %v9048_v31 = vshrl.u32 %v4373_v10, 30  ;;  %v4516_v30 = vxor.u32 2147483648, %v9569_v38  ;;  %vm5331_vm3 = vmmov 0  }
 0x5cb   :  { %v4206_v12 = vsel %vm4199_vm15, %v4202_v53, %v4205_v1  ;;  %v4291_v15 = vmul.f32 %v4290_v54, %v4288_v47  ;;  %vm4511_vm13 = vcmp.lt.s32.totalorder %v4510_v17, 2  ;;  %vm4512_vm4 = vcmp.eq.s32.totalorder %v4510_v17, 0  ;;  %v9096_v54 = vld [vmem:[%s9228_s7] sm:$0x1]  ;;  %s5333_s7 = smov [#allocation3]  }
 0x5cc   :  { %v4207_v46 = vsel %vm4196_vm6, nan, %v4206_v12  ;;  %v9570_v3 = vmov 0.0   ;;  %vm9351_vm11 = vcmp.lt.s32.totalorder %v8738_v56, 0  ;;  %v4375_v24 = vshll.u32 %v9048_v31, 30  ;;  %s4713_s12 = sshll.u32 %s5333_s7, 4  ;;  %s4714_s12 = int_to_ptr.vmem [resolvable:$true] %s4713_s12 }
 0x5cd   :  { %4940 = vmatprep.mubr.msk.f32.mxu1 %vm5331_vm3, %v9570_v3  ;;  %v4514_v34 = vsel %vm4512_vm4, %v9569_v38, %v4513_v21  ;;  %vm4515_vm1 = vcmp.eq.s32.totalorder %v4510_v17, 2  ;;  %v9571_v35 = vand.u32 2147483647, %v8405_v4  ;;  %v4292_v44 = vxor.u32 2147483648, %v4291_v15  ;;  %v9580_v21 = vld [vmem:[#allocation25_spill] sm:$0xff]  ;;  %s5297_s13 = scalar_lea.vmem %s4714_s12, 48  ;;  %p5302_p1 = scmp.lt.s32.totalorder %s4714_s12, %s4714_s12 }
 0x5ce   :  { %v4517_v25 = vsel %vm4515_vm1, %v4516_v30, %v9568_v45  ;;  %v3462_v55 = vsub.s32 4, %v9574_v40  ;;  %v9069_v41 = vsub.s32 %v4372_v48, %v4375_v24  ;;  %vm4508_vm6 = vweird.f32 %v9575_v22  ;;  %v9584_v24 = vld [vmem:[#allocation11_spill] sm:$0xff]  ;;  %p5298_p0 = scmp.ne.s32.totalorder %s4714_s12, %s5297_s13  ;;  %s5301_s14 = scalar_lea.vmem %s4714_s12, 64 }
 0x5cf   :  { %vm9059_vm15 = vcmp.le.f32.partialorder %v9571_v35, 0.7853982  ;;  %v4518_v20 = vsel %vm4511_vm13, %v4514_v34, %v4517_v25  ;;  %v4293_v42 = vsel %vm9350_vm5, %v4292_v44, %v4291_v15  ;;  %v4084_v5 = vxor.u32 2147483648, %v9013_v51  ;;  %p5303_p2 = scmp.lt.s32.totalorder %s5301_s14, %s5297_s13 }
 0x5d0   :  { %v3464_v2 = vsel %vm9059_vm15, %v8405_v4, %v8817_v7  ;;  %v4519_v0 = vsel %vm4508_vm6, nan, %v4518_v20  ;;  %v3463_v58 = vsel %vm3378_vm8, %v3462_v55, %v9574_v40  ;;  %v4296_v6 = vsel %vm9040_vm10, %v8785_v33, %v4293_v42 }
 0x5d1   :  { %5276 = vcosq.f32 %v3464_v2  ;;  %v4378_v7 = vsub.s32 0, %v9069_v41  ;;  %v4987_v29 = vpack.c.bf16 %v4519_v0, %v4207_v46  ;;  %v3465_v57 = vsel %vm9059_vm15, 0, %v3463_v58  ;;  %v9583_v46 = vld [vmem:[#allocation29_spill] sm:$0xff]  ;;  %p5304_p3 = por %p5303_p2, %p5302_p1 }
 0x5d2   :  { %5278 = vsinq.f32 %v3464_v2  ;;  %v3469_v48 = vadd.s32 3, %v3465_v57  ;;  %v9576_v49 = vand.u32 2147483647, %v8538_v39  ;;  %v3774_v62 = vsub.s32 4, %v8725_v11 }
 0x5d3   :  { %v3982_v61 = vsub.s32 4, %v9579_v26  ;;  %5280 = vcosq.f32 %v4296_v6  ;;  %v4874_v28 = vmin.u32 %v4378_v7, %v9069_v41  ;;  %4988 = vmatpush3.bf16.msra.mxu1 %v4987_v29  ;;  %v3361_v47 = vsel %vm8668_vm12, 0, %v9580_v21  ;;  %v9587_v7 = vld [vmem:[#allocation18_spill] sm:$0xff]  ;;  %v9588_v29 = vld [vmem:[#allocation21_spill] sm:$0xff]  ;;  %p5305_p4 = pnand %p5304_p3, %p5298_p0 }
 0x5d4   :  { %vm9086_vm7 = vcmp.le.f32.partialorder %v9576_v49, 0.7853982  ;;  %v3470_v16 = vand.u32 3, %v3469_v48  ;;  %v3775_v45 = vsel %vm3690_vm9, %v3774_v62, %v8725_v11  ;;  %v4294_v53 = vsub.s32 4, %v8959_v8 }
 0x5d5   :  { %v3776_v37 = vsel %vm9086_vm7, %v8538_v39, %v8955_v27  ;;  %v4380_v1 = vclz %v4874_v28  ;;  %v3777_v17 = vsel %vm9086_vm7, 0, %v3775_v45  ;;  %v9114_v27 = vsel %vm9351_vm11, %v4084_v5, %v9013_v51 }
 0x5d6   :  { %5282 = vcosq.f32 %v3776_v37  ;;  %v4368_v11 = vadd.s32 %v9004_v9, %v9010_v50  ;;  %vm9582_vm8 = vcmask 261120   ;;  %v3781_v12 = vadd.s32 3, %v3777_v17  ;;  %v9586_v9 = vld [vmem:[#allocation15_spill] sm:$0xff] }
 0x5d7   :  { %5284 = vsinq.f32 %v3776_v37  ;;  %4941 = vmatmul.mubr.msk.f32.vlgmr.msra.gmra.mrb[12].mxu1 %vm9582_vm8, %v9096_v54  ;;  %v4875_v38 = vadd.s32 4294967294, %v4380_v1  ;;  %vm3471_vm12 = vcmp.lt.s32.totalorder %v3470_v16, 2  ;;  %vm3472_vm9 = vcmp.eq.s32.totalorder %v3470_v16, 0 }
 0x5d8   :  { %5286 = vsinq.f32 %v4296_v6  ;;  %v3365_v30 = vadd.s32 3, %v3361_v47  ;;  %vm3475_vm13 = vcmp.eq.s32.totalorder %v3470_v16, 2  ;;  %v3782_v15 = vand.u32 3, %v3781_v12 }
 0x5d9   :  { %v3369_v3 = vxor.u32 2147483648, %v9583_v46  ;;  %v3673_v51 = vsel %vm8777_vm0, 0, %v9584_v24  ;;  %vm4876_vm4 = vcmp.lt.s32.totalorder %v4875_v38, 0  ;;  %v3372_v50 = vxor.u32 2147483648, %v9586_v9 }
 0x5da   :  { %v3366_v60 = vand.u32 3, %v3365_v30  ;;  %v3681_v44 = vxor.u32 2147483648, %v8963_v59  ;;  %v4383_v40 = vsel %vm4876_vm4, 0, %v4875_v38  ;;  %v3677_v2 = vadd.s32 3, %v3673_v51 }
 0x5db   :  { %v5277_v35 = vpop.eup %5276  ;;  %v3684_v22 = vxor.u32 2147483648, %v8900_v14  ;;  %v4384_v20 = vsub.s32 32, %v4383_v40  ;;  %v4388_v42 = vsub.s32 4294967266, %v4383_v40  ;;  %vm3468_vm3 = vweird.f32 %v8405_v4 }
 0x5dc   :  { %v5279_v25 = vpop.eup %5278  ;;  %v3476_v55 = vxor.u32 2147483648, %v5277_v35  ;;  %vm3780_vm0 = vweird.f32 %v8538_v39  ;;  %vm3783_vm1 = vcmp.lt.s32.totalorder %v3782_v15, 2  ;;  %v4385_v58 = vshll.u32 %v9069_v41, %v4383_v40 }
 0x5dd   :  { %v3473_v0 = vxor.u32 2147483648, %v5279_v25  ;;  %vm3784_vm15 = vcmp.eq.s32.totalorder %v3782_v15, 0  ;;  %vm3787_vm6 = vcmp.eq.s32.totalorder %v3782_v15, 2  ;;  %vm3364_vm7 = vweird.f32 %v9587_v7  ;;  %v9133_v57 = vpop.eup %5280 }
 0x5de   :  { %v3477_v6 = vsel %vm3475_vm13, %v3476_v55, %v5279_v25  ;;  %vm3676_vm8 = vweird.f32 %v9588_v29  ;;  %v4386_v5 = vshrl.u32 %v4368_v11, %v4384_v20  ;;  %v4389_v48 = vadd.s32 127, %v4388_v42 }
 0x5df   :  { %v3474_v49 = vsel %vm3472_vm9, %v5277_v35, %v3473_v0  ;;  %vm3368_vm4 = vcmp.eq.s32.totalorder %v3366_v60, 0  ;;  %vm3367_vm5 = vcmp.lt.s32.totalorder %v3366_v60, 2  ;;  %v3678_v28 = vand.u32 3, %v3677_v2 }
 0x5e0   :  { %v5283_v19 = vpop.eup %5282  ;;  %v3478_v62 = vsel %vm3471_vm12, %v3474_v49, %v3477_v6  ;;  %v3370_v41 = vsel %vm3368_vm4, %v9586_v9, %v3369_v3  ;;  %v4387_v45 = vor.u32 %v4386_v5, %v4385_v58  ;;  %v4390_v21 = vshll.u32 %v4389_v48, 23 }
 0x5e1   :  { %v5285_v37 = vpop.eup %5284  ;;  %v3788_v10 = vxor.u32 2147483648, %v5283_v19  ;;  %vm3371_vm13 = vcmp.eq.s32.totalorder %v3366_v60, 2  ;;  %vm3679_vm11 = vcmp.lt.s32.totalorder %v3678_v28, 2  ;;  %v9589_v11 = vand.u32 2147483647, %v8738_v56 }
 0x5e2   :  { %v9138_v47 = vpop.eup %5286  ;;  %v3785_v1 = vxor.u32 2147483648, %v5285_v37  ;;  %v3373_v17 = vsel %vm3371_vm13, %v3372_v50, %v9583_v46  ;;  %v4391_v12 = vor.u32 4788187, %v4390_v21  ;;  %v4394_v38 = vcvt.s32.f32 %v4387_v45 }
 0x5e3   :  { %vm9143_vm9 = vcmp.le.f32.partialorder %v9589_v11, 0.7853982  ;;  %v3789_v30 = vsel %vm3787_vm6, %v3788_v10, %v5285_v37  ;;  %vm3680_vm12 = vcmp.eq.s32.totalorder %v3678_v28, 0  ;;  %v3374_v24 = vsel %vm3367_vm5, %v3370_v41, %v3373_v17 }
 0x5e4   :  { %v3786_v3 = vsel %vm3784_vm15, %v5283_v19, %v3785_v1  ;;  %v3682_v34 = vsel %vm3680_vm12, %v8900_v14, %v3681_v44  ;;  %vm3683_vm4 = vcmp.eq.s32.totalorder %v3678_v28, 2  ;;  %v4392_v46 = vand.u32 2147483647, %v4391_v12 }
 0x5e5   :  { %v3790_v51 = vsel %vm3783_vm1, %v3786_v3, %v3789_v30  ;;  %v3685_v35 = vsel %vm3683_vm4, %v3684_v22, %v8963_v59  ;;  %v4086_v9 = vsub.s32 4, %v8898_v18  ;;  %v3479_v50 = vsel %vm3468_vm3, nan, %v3478_v62 }
 0x5e6   :  { %v3791_v25 = vsel %vm3780_vm0, nan, %v3790_v51  ;;  %v3686_v40 = vsel %vm3679_vm11, %v3682_v34, %v3685_v35  ;;  %v4088_v14 = vsel %vm9143_vm9, %v8738_v56, %v9114_v27  ;;  %v4395_v60 = vmul.f32 %v4394_v38, %v4392_v46 }
 0x5e7   :  { %v4975_v15 = vpack.c.bf16 %v3791_v25, %v3479_v50  ;;  %v3375_v59 = vsel %vm3364_vm7, nan, %v3374_v24  ;;  %v3687_v44 = vsel %vm3676_vm8, nan, %v3686_v40  ;;  %v3983_v4 = vsel %vm3898_vm2, %v3982_v61, %v9579_v26  ;;  %v4525_v40 = vpop.permute.xlu0 %4524 }
 0x5e8   :  { %v4977_v39 = vpack.c.bf16 %v3687_v44, %v3375_v59  ;;  %vm9592_vm5 = vcmp.lt.s32.totalorder %v8738_v56, 0  ;;  %5288 = vcosq.f32 %v4088_v14  ;;  %vm9593_vm11 = vcmp.lt.s32.totalorder %v8785_v33, 0 }
 0x5e9   :  { %v4087_v55 = vsel %vm9592_vm5, %v4086_v9, %v8898_v18  ;;  %v4295_v27 = vsel %vm9593_vm11, %v4294_v53, %v8959_v8  ;;  %v4396_v2 = vxor.u32 2147483648, %v4395_v60  ;;  %4976 = vmatprep.subr.bf16.mxu0 %v4975_v15  ;;  %5290 = vsinq.f32 %v4088_v14  ;;  %v9595_v14 = vld [vmem:[#allocation7_spill] sm:$0xff] }
 0x5ea   :  { %v4398_v22 = vsub.s32 4, %v9048_v31  ;;  %vm4314_vm3 = vcmp.lt.s32.totalorder %v8888_v52, 0  ;;  %4978 = vmatpush1.bf16.msra.mxu0 %v4977_v39  ;;  %v4089_v61 = vsel %vm9143_vm9, 0, %v4087_v55  ;;  %vm4313_vm2 = vcmp.le.f32.partialorder %v4312_v23, 0.7853982 }
 0x5eb   :  { %v4397_v26 = vsel %vm4314_vm3, %v4396_v2, %v4395_v60  ;;  %v3985_v8 = vsel %vm8932_vm14, 0, %v3983_v4  ;;  %v4297_v53 = vsel %vm9040_vm10, 0, %v4295_v27  ;;  %v4093_v42 = vadd.s32 3, %v4089_v61  ;;  %v9596_v4 = vld [vmem:[#allocation6_spill] sm:$0xff] }
 0x5ec   :  { %v4399_v18 = vsel %vm4314_vm3, %v4398_v22, %v9048_v31  ;;  %v4400_v20 = vsel %vm4313_vm2, %v8888_v52, %v4397_v26  ;;  %v3989_v58 = vadd.s32 3, %v3985_v8  ;;  %v4301_v6 = vadd.s32 3, %v4297_v53 }
 0x5ed   :  { %5292 = vcosq.f32 %v4400_v20  ;;  %v4401_v0 = vsel %vm4313_vm2, 0, %v4399_v18  ;;  %v4094_v23 = vand.u32 3, %v4093_v42  ;;  %v4305_v31 = vxor.u32 2147483648, %v9138_v47 }
 0x5ee   :  { %5294 = vsinq.f32 %v4400_v20  ;;  %v4405_v7 = vadd.s32 3, %v4401_v0  ;;  %v4302_v29 = vand.u32 3, %v4301_v6  ;;  %v4308_v48 = vxor.u32 2147483648, %v9133_v57 }
 0x5ef   :  { %v3990_v19 = vand.u32 3, %v3989_v58  ;;  %v3993_v13 = vxor.u32 2147483648, %v8998_v43  ;;  %v3996_v41 = vxor.u32 2147483648, %v8995_v36  ;;  %vm4096_vm0 = vcmp.eq.s32.totalorder %v4094_v23, 0 }
 0x5f0   :  { %v4406_v28 = vand.u32 3, %v4405_v7  ;;  %vm4304_vm14 = vcmp.eq.s32.totalorder %v4302_v29, 0  ;;  %vm4307_vm10 = vcmp.eq.s32.totalorder %v4302_v29, 2  ;;  %vm4099_vm1 = vcmp.eq.s32.totalorder %v4094_v23, 2 }
 0x5f1   :  { %v4306_v37 = vsel %vm4304_vm14, %v9133_v57, %v4305_v31  ;;  %v4309_v45 = vsel %vm4307_vm10, %v4308_v48, %v9138_v47  ;;  %vm3992_vm15 = vcmp.eq.s32.totalorder %v3990_v19, 0  ;;  %vm3995_vm6 = vcmp.eq.s32.totalorder %v3990_v19, 2 }
 0x5f2   :  { %v5289_v5 = vpop.eup %5288  ;;  %v3994_v16 = vsel %vm3992_vm15, %v8995_v36, %v3993_v13  ;;  %v3997_v12 = vsel %vm3995_vm6, %v3996_v41, %v8998_v43  ;;  %vm4303_vm7 = vcmp.lt.s32.totalorder %v4302_v29, 2  ;;  %vm4095_vm8 = vcmp.lt.s32.totalorder %v4094_v23, 2 }
 0x5f3   :  { %v5291_v49 = vpop.eup %5290  ;;  %v4100_v32 = vxor.u32 2147483648, %v5289_v5  ;;  %vm4411_vm13 = vcmp.eq.s32.totalorder %v4406_v28, 2  ;;  %v4310_v30 = vsel %vm4303_vm7, %v4306_v37, %v4309_v45  ;;  %vm4408_vm9 = vcmp.eq.s32.totalorder %v4406_v28, 0 }
 0x5f4   :  { %v4097_v62 = vxor.u32 2147483648, %v5291_v49  ;;  %vm3991_vm12 = vcmp.lt.s32.totalorder %v3990_v19, 2  ;;  %vm4407_vm4 = vcmp.lt.s32.totalorder %v4406_v28, 2  ;;  %vm4300_vm5 = vweird.f32 %v8785_v33 }
 0x5f5   :  { %v4101_v1 = vsel %vm4099_vm1, %v4100_v32, %v5291_v49  ;;  %v3998_v24 = vsel %vm3991_vm12, %v3994_v16, %v3997_v12  ;;  %vm4092_vm11 = vweird.f32 %v8738_v56  ;;  %vm4404_vm3 = vweird.f32 %v8888_v52 }
 0x5f6   :  { %v4098_v10 = vsel %vm4096_vm0, %v5289_v5, %v4097_v62  ;;  %v4311_v43 = vsel %vm4300_vm5, nan, %v4310_v30  ;;  %vm3988_vm2 = vweird.f32 %v8695_v63  ;;  %vm9594_vm14 = vcmask 261120  }
 0x5f7   :  { %v5293_v21 = vpop.eup %5292  ;;  %v4102_v3 = vsel %vm4095_vm8, %v4098_v10, %v4101_v1  ;;  %v3999_v35 = vsel %vm3988_vm2, nan, %v3998_v24  ;;  %v5332_v25 = vmov 1966171168   ;;  %v4530_v60 = vrot.slane %v4525_v40, %v9595_v14 }
 0x5f8   :  { %v5295_v17 = vpop.eup %5294  ;;  %v4412_v11 = vxor.u32 2147483648, %v5293_v21  ;;  %v4103_v34 = vsel %vm4092_vm11, nan, %v4102_v3  ;;  %v4981_v9 = vpack.c.bf16 %v4311_v43, %v3999_v35  ;;  %v4680_v56 = vunpack.c.l.s4 %v5332_v25 }
 0x5f9   :  { %v4409_v38 = vxor.u32 2147483648, %v5295_v17  ;;  %v9597_v26 = vlaneseq }
 0x5fa   :  { %v4413_v57 = vsel %vm4411_vm13, %v4412_v11, %v5295_v17  ;;  %v4681_v52 = vunpack.c.0.s8 %v4680_v56 }
 0x5fb   :  { %v4410_v47 = vsel %vm4408_vm9, %v5293_v21, %v4409_v38  ;;  %vm4704_vm10 = vcmp.lt.s32.totalorder %v9597_v26, 384 }
 0x5fc   :  { %v4414_v36 = vsel %vm4407_vm4, %v4410_v47, %v4413_v57  ;;  %v4684_v39 = vsub.s32 %v4681_v52, %v9596_v4 }
 0x5fd   :  { %v4415_v46 = vsel %vm4404_vm3, nan, %v4414_v36 }
 0x5fe   :  { %v4979_v51 = vpack.c.bf16 %v4415_v46, %v4103_v34 }
 0x600   :  { %4980 = vmatprep.subr.bf16.mxu0 %v4979_v51 }
 0x601   :  { %4982 = vmatpush1.bf16.msra.mxu0 %v4981_v9 }
 0x604   :  { %4881 = vmatmul.mubr.msk.f32.vlgmr.msra.gmra.mrb[12].mxu0 %vm9594_vm14, %v9096_v54 }
 0x6aa   :  { %v4671_v50 = vpop.f32.mrb[12].mxu1 }
 0x6ab   :  { %v4942_v33 = vpop.f32.mrb[13].mxu1  ;;  %v4672_v63 = vadd.f32 %v4671_v50, %v4530_v60 }
 0x6ad   :  { %v4692_v2 = vrot.slane %v4672_v63, %v4684_v39 }
 0x6d7   :  { %v4600_v15 = vpop.f32.mrb[12].mxu0 }
 0x6d8   :  { %v4601_v59 = vadd.f32 %v4600_v15, %v4530_v60  ;;  %v4602_v44 = vpop.f32.mrb[13].mxu0 }
 0x6d9   :  { %v4603_v55 = vadd.f32 %v4602_v44, %v4530_v60 }
 0x6db   :  { %v4678_v27 = vcombine.low %v4601_v59, %v4603_v55 }
 0x6dd   :  { %v4685_v22 = vrot.slane %v4678_v27, %v4684_v39 }
 0x6df   :  { %v4693_v54 = vcombine.low %v4685_v22, %v4692_v2 }
 0x6e1   :  { %v4700_v61 = vrot.slane %v4693_v54, %v4684_v39 }
 0x6e3   :  { %4706 = vst.msk [vmem:[#allocation3] sm:$0x7] %vm4704_vm10, %v4700_v61 }
 0x6e4   :  { %5308 = shalt.err (!%p5305_p4)
}
 0x6e5   :  { %s5309_s2 = scalar_lea.hbm %s9230_s9, 48 }
 0x6e6   :  { %p5310_p5 = scmp.ne.s32.totalorder %s9230_s9, %s5309_s2  ;;  %p5313_p6 = scmp.lt.u32.totalorder %s5309_s2, %s9230_s9 }
 0x6e8   :  { %p5315_p7 = pnand %p5313_p6, %p5310_p5 }
 0x6ea   :  { %5318 = shalt.err (!%p5315_p7)
}
 0x6eb   :  { %4716 = dma.vmem_to_hbm [thread:$0]  %s4714_s12, 48, %s9230_s9, [#allocation4]  }
 0x6ec   :  { %5319 = dma.done.wait [#allocation4], 48  }
 0x6ed   :  { %5320 = vsyncadd [#allocation4], 4294967248 }
 0x6ee   :  { %4720 = vsyncpa [#allocation4], 1 }

</bundles_post_ra>
